<compile_context>
chip_gen: v6e
topology: v6e:2x2x1
jax: 0.10.0
libtpu: 0.0.40
codegen_flags: <defaults>
</compile_context>

<pallas_src>
from functools import partial

import jax
import jax.numpy as jnp
import numpy as np
from jax.experimental import pallas as pl
from jax.experimental.pallas import tpu as pltpu


# ----------------------------------------------------------------------------
# Pallas kernel: `images_per_step` images per grid step, (C, L=S*H*W) layout.
# ----------------------------------------------------------------------------
def _inverted_residual_kernel(x_ref, mask_ref, w1_ref, b1_ref, dw_ref, bdw_ref,
                              w2_ref, b2_ref, o_ref, *, W, identity, dw_dtype):
    L = x_ref.shape[-1]
    Hd = dw_ref.shape[0]

    x = x_ref[0]                                            # (Cin, L) f32

    # ---- 1x1 expand conv + folded BN + ReLU6 (MXU bf16 operands, f32 acc) -----
    h1 = jnp.dot(w1_ref[...], x.astype(jnp.bfloat16),
                 preferred_element_type=jnp.float32)        # (Hd, L)
    h1 = jnp.clip(h1 + b1_ref[...], 0.0, 6.0).astype(dw_dtype)

    # ---- 3x3 depthwise conv (stride 1, pad 1) + folded BN + ReLU6 -------------
    # 9 shifted taps via lane rotation (XLU) + precomputed {0,1} masks (VPU).
    # The mask also zeroes cross-image leakage from rolls over the folded batch.
    dw = dw_ref[...]                                        # (Hd, 9), loaded once
    mask = mask_ref[...]                                    # (9, L), loaded once
    acc = jnp.broadcast_to(bdw_ref[...], (Hd, L))           # init with folded bias
    for t in range(9):
        dh, dc = t // 3 - 1, t % 3 - 1
        shift = dh * W + dc                                 # flat-lane offset
        tap = h1 if shift == 0 else pltpu.roll(h1, (-shift) % L, axis=1)
        if shift != 0:
            tap = tap * mask[t:t + 1, :]
        acc = acc + tap * dw[:, t:t + 1]
    h2 = jnp.clip(acc, 0.0, 6.0)                            # (Hd, L) dw_dtype

    # ---- 1x1 project conv + folded BN (+ residual) ----------------------------
    out = jnp.dot(w2_ref[...], h2.astype(jnp.bfloat16),
                  preferred_element_type=jnp.float32)       # (Cout, L)
    out = out + b2_ref[...]
    if identity:
        out = out + x
    o_ref[0] = out.astype(o_ref.dtype)


# ----------------------------------------------------------------------------
# Wrapper: BN folding, batch-fold layout, mask precompute, pallas_call.
# ----------------------------------------------------------------------------
def _fold_bn_scale(bn, eps=1e-5):
    scale = bn["gamma"] / jnp.sqrt(bn["var"] + eps)
    bias = bn["beta"] - bn["mean"] * scale
    return scale, bias


def _build_border_mask(H, W, images_per_step, dtype):
    """(9, S*H*W) {0,1} mask: zero-pads the 3x3 border per image and, because it
    is derived from the per-image position, also kills cross-image roll leakage."""
    HW = H * W
    pos = np.arange(HW)
    row, col = pos // W, pos % W
    m = np.ones((9, HW), np.float32)
    for t in range(9):
        dh, dc = t // 3 - 1, t % 3 - 1
        valid = (row + dh >= 0) & (row + dh < H) & (col + dc >= 0) & (col + dc < W)
        m[t] = valid.astype(np.float32)
    return jnp.asarray(np.tile(m, (1, images_per_step)), dtype=dtype)


def inverted_residual_pallas(x_nchw, params, identity, *,
                             images_per_step=None, dw_dtype=None,
                             vmem_limit_bytes=None):
    N, Cin, H, W = x_nchw.shape
    Hd = params["w_expand"].shape[0]
    Cout = params["w_proj"].shape[0]
    HW = H * W

    kind = jax.devices()[0].device_kind.lower()
    if dw_dtype is None:
        # bf16 VPU exists on v6e / v7x; keep f32 on v5e and older (no bf16 VPU).
        dw_dtype = jnp.bfloat16 if ("v6" in kind or "v7" in kind or "7x" in kind) \
            else jnp.float32
    if images_per_step is None:
        # v7x has 2 TensorCores -> keep >=2 grid steps for megacore sharding;
        # single-TC chips: fold the whole batch into one step.
        two_cores = ("v7" in kind or "7x" in kind)
        grid_steps = 2 if (two_cores and N >= 2 and N % 2 == 0) else 1
        images_per_step = N // grid_steps
    assert N % images_per_step == 0, "batch must divide evenly into grid steps"
    S = images_per_step
    G = N // S
    L = S * HW                                   # lane width per grid step

    s1, bias1 = _fold_bn_scale(params["bn1"])
    s2, bias2 = _fold_bn_scale(params["bn2"])
    s3, bias3 = _fold_bn_scale(params["bn3"])

    # 1x1 expand: torch (Hd, Cin, 1, 1) -> (Hd, Cin), BN-scaled, bf16 for the MXU.
    w1 = (params["w_expand"][:, :, 0, 0] * s1[:, None]).astype(jnp.bfloat16)
    b1 = bias1.reshape(Hd, 1)                                     # f32
    # depthwise 3x3: torch (Hd, 1, 3, 3) -> (Hd, 9), BN-scaled, depthwise dtype.
    dw = (params["w_dw"][:, 0] * s2[:, None, None]).reshape(Hd, 9).astype(dw_dtype)
    bdw = bias2.reshape(Hd, 1).astype(dw_dtype)
    # 1x1 project: torch (Cout, Hd, 1, 1) -> (Cout, Hd), BN-scaled, bf16.
    w2 = (params["w_proj"][:, :, 0, 0] * s3[:, None]).astype(jnp.bfloat16)
    b2 = bias3.reshape(Cout, 1)                                   # f32

    mask = _build_border_mask(H, W, S, dw_dtype)                  # (9, L)

    # Channels on sublanes, folded (image, spatial) on lanes.  The small
    # (S, Cin) transpose is wrapper-side layout plumbing handled by XLA.
    x_flat = x_nchw.reshape(G, S, Cin, HW).transpose(0, 2, 1, 3).reshape(G, Cin, L)

    cp = dict(dimension_semantics=("parallel",))
    if vmem_limit_bytes is not None:       # needed on v5e (16 MiB scoped default)
        cp["vmem_limit_bytes"] = vmem_limit_bytes  # once blocks grow beyond toys

    out_flat = pl.pallas_call(
        partial(_inverted_residual_kernel, W=W, identity=identity,
                dw_dtype=dw_dtype),
        out_shape=jax.ShapeDtypeStruct((G, Cout, L), x_nchw.dtype),
        grid_spec=pltpu.PrefetchScalarGridSpec(
            num_scalar_prefetch=0,
            grid=(G,),
            in_specs=[
                pl.BlockSpec((1, Cin, L), lambda g: (g, 0, 0)),
                pl.BlockSpec((9, L), lambda g: (0, 0)),
                pl.BlockSpec((Hd, Cin), lambda g: (0, 0)),
                pl.BlockSpec((Hd, 1), lambda g: (0, 0)),
                pl.BlockSpec((Hd, 9), lambda g: (0, 0)),
                pl.BlockSpec((Hd, 1), lambda g: (0, 0)),
                pl.BlockSpec((Cout, Hd), lambda g: (0, 0)),
                pl.BlockSpec((Cout, 1), lambda g: (0, 0)),
            ],
            out_specs=pl.BlockSpec((1, Cout, L), lambda g: (g, 0, 0)),
        ),
        compiler_params=pltpu.CompilerParams(**cp),
    )(x_flat, mask, w1, b1, dw, bdw, w2, b2)

    return (out_flat.reshape(G, Cout, S, HW).transpose(0, 2, 1, 3)
            .reshape(N, Cout, H, W))


# ----------------------------------------------------------------------------
# Pure-JAX (NCHW, torch-style, full f32) reference for validation.
# ----------------------------------------------------------------------------
def _bn_eval(x, bn, eps=1e-5):
    s = bn["gamma"] / jnp.sqrt(bn["var"] + eps)
    b = bn["beta"] - bn["mean"] * s
    return x * s[None, :, None, None] + b[None, :, None, None]


def _relu6(x):
    return jnp.clip(x, 0.0, 6.0)


def inverted_residual_reference(x, p, identity):
    hp = jax.lax.Precision.HIGHEST
    dn = ("NCHW", "OIHW", "NCHW")
    y = jax.lax.conv_general_dilated(x, p["w_expand"], (1, 1), "VALID",
                                     dimension_numbers=dn, precision=hp)
    y = _relu6(_bn_eval(y, p["bn1"]))
    y = jax.lax.conv_general_dilated(y, p["w_dw"], (1, 1), ((1, 1), (1, 1)),
                                     dimension_numbers=dn,
                                     feature_group_count=p["w_dw"].shape[0],
                                     precision=hp)
    y = _relu6(_bn_eval(y, p["bn2"]))
    y = jax.lax.conv_general_dilated(y, p["w_proj"], (1, 1), "VALID",
                                     dimension_numbers=dn, precision=hp)
    y = _bn_eval(y, p["bn3"])
    return x + y if identity else y


# ----------------------------------------------------------------------------
# Deterministic parameter construction (shapes per the module's __init__).
# ----------------------------------------------------------------------------
def make_params(key, inp, hidden, oup):
    ks = jax.random.split(key, 15)
    params = {
        "w_expand": jax.random.normal(ks[0], (hidden, inp, 1, 1), jnp.float32) * 0.1,
        "w_dw": jax.random.normal(ks[1], (hidden, 1, 3, 3), jnp.float32) * 0.1,
        "w_proj": jax.random.normal(ks[2], (oup, hidden, 1, 1), jnp.float32) * 0.1,
    }
    for i, (name, c) in enumerate([("bn1", hidden), ("bn2", hidden), ("bn3", oup)]):
        k0, k1, k2, k3 = ks[3 + 4 * i: 7 + 4 * i]
        params[name] = dict(
            gamma=1.0 + 0.1 * jax.random.normal(k0, (c,), jnp.float32),
            beta=0.1 * jax.random.normal(k1, (c,), jnp.float32),
            mean=0.1 * jax.random.normal(k2, (c,), jnp.float32),
            var=0.75 + 0.5 * jax.random.uniform(k3, (c,), jnp.float32),
        )
    return params


if __name__ == "__main__":
    # InvertedResidual(channel_number=[32], inp=8, oup=8, stride=1, expand_ratio=6)
    # -> hidden_dim = channel_number.pop(0) = 32; identity residual active.
    N, inp, oup, H, W = 4, 8, 8, 16, 16
    hidden = 32
    identity = True      # stride == 1 and inp == oup

    key = jax.random.PRNGKey(0)
    kx, kp = jax.random.split(key)
    x = jax.random.normal(kx, (N, inp, H, W), jnp.float32)   # NCHW, like PyTorch
    params = make_params(kp, inp, hidden, oup)

    out = jax.block_until_ready(inverted_residual_pallas(x, params, identity))
    ref = jax.block_until_ready(inverted_residual_reference(x, params, identity))

    # Kernel matmuls use bf16 operands (f32 accumulation) and the depthwise stage
    # runs in bf16 on v6e/v7x per the perf review; the reference is full-f32
    # HIGHEST precision, so the tolerance reflects bf16 rounding.
    np.testing.assert_allclose(np.asarray(out), np.asarray(ref),
                               rtol=4e-2, atol=4e-2)
    print("KERNEL_OK")
</pallas_src>

<mosaic_0001>
module attributes {stable_mosaic.version = 11 : i64} {
  func.func @_inverted_residual_kernel(%arg0: i32, %arg1: memref<1x8x1024xf32, #tpu.memory_space<vmem>>, %arg2: memref<9x1024xf32, #tpu.memory_space<vmem>>, %arg3: memref<32x8xbf16, #tpu.memory_space<vmem>>, %arg4: memref<32x1xf32, #tpu.memory_space<vmem>>, %arg5: memref<32x9xf32, #tpu.memory_space<vmem>>, %arg6: memref<32x1xf32, #tpu.memory_space<vmem>>, %arg7: memref<8x32xbf16, #tpu.memory_space<vmem>>, %arg8: memref<8x1xf32, #tpu.memory_space<vmem>>, %arg9: memref<1x8x1024xf32, #tpu.memory_space<vmem>>) attributes {dimension_semantics = [#tpu.dimension_semantics<parallel>], iteration_bounds = array<i64: 1>, scalar_prefetch = 0 : i64, scratch_operands = 0 : i64, tpu.core_type = #tpu.core_type<tc>, window_params = [{transform_indices = @transform_0, window_bounds = array<i64: 1, 8, 1024>}, {pipeline_mode = #tpu.pipeline_mode<synchronous>, transform_indices = @transform_1, window_bounds = array<i64: 9, 1024>}, {pipeline_mode = #tpu.pipeline_mode<synchronous>, transform_indices = @transform_2, window_bounds = array<i64: 32, 8>}, {pipeline_mode = #tpu.pipeline_mode<synchronous>, transform_indices = @transform_3, window_bounds = array<i64: 32, 1>}, {pipeline_mode = #tpu.pipeline_mode<synchronous>, transform_indices = @transform_4, window_bounds = array<i64: 32, 9>}, {pipeline_mode = #tpu.pipeline_mode<synchronous>, transform_indices = @transform_5, window_bounds = array<i64: 32, 1>}, {pipeline_mode = #tpu.pipeline_mode<synchronous>, transform_indices = @transform_6, window_bounds = array<i64: 8, 32>}, {pipeline_mode = #tpu.pipeline_mode<synchronous>, transform_indices = @transform_7, window_bounds = array<i64: 8, 1>}, {transform_indices = @transform_8, window_bounds = array<i64: 1, 8, 1024>}]} {
    %c0 = arith.constant 0 : index
    %c0_0 = arith.constant 0 : index
    %c0_1 = arith.constant 0 : index
    %0 = vector.load %arg1[%c0, %c0_0, %c0_1] : memref<1x8x1024xf32, #tpu.memory_space<vmem>>, vector<1x8x1024xf32>
    %1 = vector.shape_cast %0 : vector<1x8x1024xf32> to vector<8x1024xf32>
    %c0_2 = arith.constant 0 : index
    %c0_3 = arith.constant 0 : index
    %2 = vector.load %arg3[%c0_2, %c0_3] : memref<32x8xbf16, #tpu.memory_space<vmem>>, vector<32x8xbf16>
    %3 = arith.truncf %1 : vector<8x1024xf32> to vector<8x1024xbf16>
    %cst = arith.constant dense<0.000000e+00> : vector<32x1024xf32>
    %4 = tpu.matmul %2, %3, %cst {dimension_numbers = #tpu.dot_dimension_numbers<[1], [0], [0], [1], [0, 0, 1, 1], [], []>} : vector<32x8xbf16>, vector<8x1024xbf16>, vector<32x1024xf32> -> vector<32x1024xf32>
    %c0_4 = arith.constant 0 : index
    %c0_5 = arith.constant 0 : index
    %5 = vector.load %arg4[%c0_4, %c0_5] : memref<32x1xf32, #tpu.memory_space<vmem>>, vector<32x1xf32>
    %6 = vector.broadcast %5 : vector<32x1xf32> to vector<32x1024xf32>
    %7 = arith.addf %4, %6 : vector<32x1024xf32>
    %cst_6 = arith.constant 0.000000e+00 : f32
    %cst_7 = arith.constant 6.000000e+00 : f32
    %8 = vector.broadcast %cst_6 : f32 to vector<32x1024xf32>
    %9 = arith.maximumf %8, %7 : vector<32x1024xf32>
    %10 = vector.broadcast %cst_7 : f32 to vector<32x1024xf32>
    %11 = arith.minimumf %10, %9 : vector<32x1024xf32>
    %c0_8 = arith.constant 0 : index
    %c0_9 = arith.constant 0 : index
    %12 = vector.load %arg5[%c0_8, %c0_9] : memref<32x9xf32, #tpu.memory_space<vmem>>, vector<32x9xf32>
    %c0_10 = arith.constant 0 : index
    %c0_11 = arith.constant 0 : index
    %13 = vector.load %arg2[%c0_10, %c0_11] : memref<9x1024xf32, #tpu.memory_space<vmem>>, vector<9x1024xf32>
    %c0_12 = arith.constant 0 : index
    %c0_13 = arith.constant 0 : index
    %14 = vector.load %arg6[%c0_12, %c0_13] : memref<32x1xf32, #tpu.memory_space<vmem>>, vector<32x1xf32>
    %15 = vector.shape_cast %14 : vector<32x1xf32> to vector<32x1xf32>
    %16 = vector.broadcast %15 : vector<32x1xf32> to vector<32x1024xf32>
    %c17_i32 = arith.constant 17 : i32
    %17 = tpu.dynamic_rotate %11 by %c17_i32 dim 1 : vector<32x1024xf32>, i32 -> vector<32x1024xf32>
    %18 = vector.extract_strided_slice %13 {offsets = [0, 0], sizes = [1, 1024], strides = [1, 1]} : vector<9x1024xf32> to vector<1x1024xf32>
    %19 = vector.broadcast %18 : vector<1x1024xf32> to vector<32x1024xf32>
    %20 = arith.mulf %17, %19 : vector<32x1024xf32>
    %21 = vector.extract_strided_slice %12 {offsets = [0, 0], sizes = [32, 1], strides = [1, 1]} : vector<32x9xf32> to vector<32x1xf32>
    %22 = vector.broadcast %21 : vector<32x1xf32> to vector<32x1024xf32>
    %23 = arith.mulf %20, %22 : vector<32x1024xf32>
    %24 = arith.addf %16, %23 : vector<32x1024xf32>
    %c16_i32 = arith.constant 16 : i32
    %25 = tpu.dynamic_rotate %11 by %c16_i32 dim 1 : vector<32x1024xf32>, i32 -> vector<32x1024xf32>
    %26 = vector.extract_strided_slice %13 {offsets = [1, 0], sizes = [1, 1024], strides = [1, 1]} : vector<9x1024xf32> to vector<1x1024xf32>
    %27 = vector.broadcast %26 : vector<1x1024xf32> to vector<32x1024xf32>
    %28 = arith.mulf %25, %27 : vector<32x1024xf32>
    %29 = vector.extract_strided_slice %12 {offsets = [0, 1], sizes = [32, 1], strides = [1, 1]} : vector<32x9xf32> to vector<32x1xf32>
    %30 = vector.broadcast %29 : vector<32x1xf32> to vector<32x1024xf32>
    %31 = arith.mulf %28, %30 : vector<32x1024xf32>
    %32 = arith.addf %24, %31 : vector<32x1024xf32>
    %c15_i32 = arith.constant 15 : i32
    %33 = tpu.dynamic_rotate %11 by %c15_i32 dim 1 : vector<32x1024xf32>, i32 -> vector<32x1024xf32>
    %34 = vector.extract_strided_slice %13 {offsets = [2, 0], sizes = [1, 1024], strides = [1, 1]} : vector<9x1024xf32> to vector<1x1024xf32>
    %35 = vector.broadcast %34 : vector<1x1024xf32> to vector<32x1024xf32>
    %36 = arith.mulf %33, %35 : vector<32x1024xf32>
    %37 = vector.extract_strided_slice %12 {offsets = [0, 2], sizes = [32, 1], strides = [1, 1]} : vector<32x9xf32> to vector<32x1xf32>
    %38 = vector.broadcast %37 : vector<32x1xf32> to vector<32x1024xf32>
    %39 = arith.mulf %36, %38 : vector<32x1024xf32>
    %40 = arith.addf %32, %39 : vector<32x1024xf32>
    %c1_i32 = arith.constant 1 : i32
    %41 = tpu.dynamic_rotate %11 by %c1_i32 dim 1 : vector<32x1024xf32>, i32 -> vector<32x1024xf32>
    %42 = vector.extract_strided_slice %13 {offsets = [3, 0], sizes = [1, 1024], strides = [1, 1]} : vector<9x1024xf32> to vector<1x1024xf32>
    %43 = vector.broadcast %42 : vector<1x1024xf32> to vector<32x1024xf32>
    %44 = arith.mulf %41, %43 : vector<32x1024xf32>
    %45 = vector.extract_strided_slice %12 {offsets = [0, 3], sizes = [32, 1], strides = [1, 1]} : vector<32x9xf32> to vector<32x1xf32>
    %46 = vector.broadcast %45 : vector<32x1xf32> to vector<32x1024xf32>
    %47 = arith.mulf %44, %46 : vector<32x1024xf32>
    %48 = arith.addf %40, %47 : vector<32x1024xf32>
    %49 = vector.extract_strided_slice %12 {offsets = [0, 4], sizes = [32, 1], strides = [1, 1]} : vector<32x9xf32> to vector<32x1xf32>
    %50 = vector.broadcast %49 : vector<32x1xf32> to vector<32x1024xf32>
    %51 = arith.mulf %11, %50 : vector<32x1024xf32>
    %52 = arith.addf %48, %51 : vector<32x1024xf32>
    %c1023_i32 = arith.constant 1023 : i32
    %53 = tpu.dynamic_rotate %11 by %c1023_i32 dim 1 : vector<32x1024xf32>, i32 -> vector<32x1024xf32>
    %54 = vector.extract_strided_slice %13 {offsets = [5, 0], sizes = [1, 1024], strides = [1, 1]} : vector<9x1024xf32> to vector<1x1024xf32>
    %55 = vector.broadcast %54 : vector<1x1024xf32> to vector<32x1024xf32>
    %56 = arith.mulf %53, %55 : vector<32x1024xf32>
    %57 = vector.extract_strided_slice %12 {offsets = [0, 5], sizes = [32, 1], strides = [1, 1]} : vector<32x9xf32> to vector<32x1xf32>
    %58 = vector.broadcast %57 : vector<32x1xf32> to vector<32x1024xf32>
    %59 = arith.mulf %56, %58 : vector<32x1024xf32>
    %60 = arith.addf %52, %59 : vector<32x1024xf32>
    %c1009_i32 = arith.constant 1009 : i32
    %61 = tpu.dynamic_rotate %11 by %c1009_i32 dim 1 : vector<32x1024xf32>, i32 -> vector<32x1024xf32>
    %62 = vector.extract_strided_slice %13 {offsets = [6, 0], sizes = [1, 1024], strides = [1, 1]} : vector<9x1024xf32> to vector<1x1024xf32>
    %63 = vector.broadcast %62 : vector<1x1024xf32> to vector<32x1024xf32>
    %64 = arith.mulf %61, %63 : vector<32x1024xf32>
    %65 = vector.extract_strided_slice %12 {offsets = [0, 6], sizes = [32, 1], strides = [1, 1]} : vector<32x9xf32> to vector<32x1xf32>
    %66 = vector.broadcast %65 : vector<32x1xf32> to vector<32x1024xf32>
    %67 = arith.mulf %64, %66 : vector<32x1024xf32>
    %68 = arith.addf %60, %67 : vector<32x1024xf32>
    %c1008_i32 = arith.constant 1008 : i32
    %69 = tpu.dynamic_rotate %11 by %c1008_i32 dim 1 : vector<32x1024xf32>, i32 -> vector<32x1024xf32>
    %70 = vector.extract_strided_slice %13 {offsets = [7, 0], sizes = [1, 1024], strides = [1, 1]} : vector<9x1024xf32> to vector<1x1024xf32>
    %71 = vector.broadcast %70 : vector<1x1024xf32> to vector<32x1024xf32>
    %72 = arith.mulf %69, %71 : vector<32x1024xf32>
    %73 = vector.extract_strided_slice %12 {offsets = [0, 7], sizes = [32, 1], strides = [1, 1]} : vector<32x9xf32> to vector<32x1xf32>
    %74 = vector.broadcast %73 : vector<32x1xf32> to vector<32x1024xf32>
    %75 = arith.mulf %72, %74 : vector<32x1024xf32>
    %76 = arith.addf %68, %75 : vector<32x1024xf32>
    %c1007_i32 = arith.constant 1007 : i32
    %77 = tpu.dynamic_rotate %11 by %c1007_i32 dim 1 : vector<32x1024xf32>, i32 -> vector<32x1024xf32>
    %78 = vector.extract_strided_slice %13 {offsets = [8, 0], sizes = [1, 1024], strides = [1, 1]} : vector<9x1024xf32> to vector<1x1024xf32>
    %79 = vector.broadcast %78 : vector<1x1024xf32> to vector<32x1024xf32>
    %80 = arith.mulf %77, %79 : vector<32x1024xf32>
    %81 = vector.extract_strided_slice %12 {offsets = [0, 8], sizes = [32, 1], strides = [1, 1]} : vector<32x9xf32> to vector<32x1xf32>
    %82 = vector.broadcast %81 : vector<32x1xf32> to vector<32x1024xf32>
    %83 = arith.mulf %80, %82 : vector<32x1024xf32>
    %84 = arith.addf %76, %83 : vector<32x1024xf32>
    %cst_14 = arith.constant 0.000000e+00 : f32
    %cst_15 = arith.constant 6.000000e+00 : f32
    %85 = vector.broadcast %cst_14 : f32 to vector<32x1024xf32>
    %86 = arith.maximumf %85, %84 : vector<32x1024xf32>
    %87 = vector.broadcast %cst_15 : f32 to vector<32x1024xf32>
    %88 = arith.minimumf %87, %86 : vector<32x1024xf32>
    %c0_16 = arith.constant 0 : index
    %c0_17 = arith.constant 0 : index
    %89 = vector.load %arg7[%c0_16, %c0_17] : memref<8x32xbf16, #tpu.memory_space<vmem>>, vector<8x32xbf16>
    %90 = arith.truncf %88 : vector<32x1024xf32> to vector<32x1024xbf16>
    %cst_18 = arith.constant dense<0.000000e+00> : vector<8x1024xf32>
    %91 = tpu.matmul %89, %90, %cst_18 {dimension_numbers = #tpu.dot_dimension_numbers<[1], [0], [0], [1], [0, 0, 1, 1], [], []>} : vector<8x32xbf16>, vector<32x1024xbf16>, vector<8x1024xf32> -> vector<8x1024xf32>
    %c0_19 = arith.constant 0 : index
    %c0_20 = arith.constant 0 : index
    %92 = vector.load %arg8[%c0_19, %c0_20] : memref<8x1xf32, #tpu.memory_space<vmem>>, vector<8x1xf32>
    %93 = vector.broadcast %92 : vector<8x1xf32> to vector<8x1024xf32>
    %94 = arith.addf %91, %93 : vector<8x1024xf32>
    %95 = arith.addf %94, %1 : vector<8x1024xf32>
    %c0_21 = arith.constant 0 : index
    %c0_22 = arith.constant 0 : index
    %c0_23 = arith.constant 0 : index
    %96 = vector.load %arg9[%c0_21, %c0_22, %c0_23] : memref<1x8x1024xf32, #tpu.memory_space<vmem>>, vector<1x8x1024xf32>
    %97 = vector.shape_cast %96 : vector<1x8x1024xf32> to vector<8x1024xf32>
    %98 = vector.shape_cast %95 : vector<8x1024xf32> to vector<1x8x1024xf32>
    tpu.vector_store %arg9[%c0_21, %c0_22, %c0_23], %98 {strides = array<i32>} : memref<1x8x1024xf32, #tpu.memory_space<vmem>>, vector<1x8x1024xf32>,
    return
  }
  func.func @transform_0(%arg0: i32) -> (i32, i32, i32) {
    %c0_i32 = arith.constant 0 : i32
    %c0_i32_0 = arith.constant 0 : i32
    %c0_i32_1 = arith.constant 0 : i32
    return %arg0, %c0_i32, %c0_i32_0 : i32, i32, i32
  }
  func.func @transform_1(%arg0: i32) -> (i32, i32) {
    %c0_i32 = arith.constant 0 : i32
    %c0_i32_0 = arith.constant 0 : i32
    %c0_i32_1 = arith.constant 0 : i32
    return %c0_i32, %c0_i32_0 : i32, i32
  }
  func.func @transform_2(%arg0: i32) -> (i32, i32) {
    %c0_i32 = arith.constant 0 : i32
    %c0_i32_0 = arith.constant 0 : i32
    %c0_i32_1 = arith.constant 0 : i32
    return %c0_i32, %c0_i32_0 : i32, i32
  }
  func.func @transform_3(%arg0: i32) -> (i32, i32) {
    %c0_i32 = arith.constant 0 : i32
    %c0_i32_0 = arith.constant 0 : i32
    %c0_i32_1 = arith.constant 0 : i32
    return %c0_i32, %c0_i32_0 : i32, i32
  }
  func.func @transform_4(%arg0: i32) -> (i32, i32) {
    %c0_i32 = arith.constant 0 : i32
    %c0_i32_0 = arith.constant 0 : i32
    %c0_i32_1 = arith.constant 0 : i32
    return %c0_i32, %c0_i32_0 : i32, i32
  }
  func.func @transform_5(%arg0: i32) -> (i32, i32) {
    %c0_i32 = arith.constant 0 : i32
    %c0_i32_0 = arith.constant 0 : i32
    %c0_i32_1 = arith.constant 0 : i32
    return %c0_i32, %c0_i32_0 : i32, i32
  }
  func.func @transform_6(%arg0: i32) -> (i32, i32) {
    %c0_i32 = arith.constant 0 : i32
    %c0_i32_0 = arith.constant 0 : i32
    %c0_i32_1 = arith.constant 0 : i32
    return %c0_i32, %c0_i32_0 : i32, i32
  }
  func.func @transform_7(%arg0: i32) -> (i32, i32) {
    %c0_i32 = arith.constant 0 : i32
    %c0_i32_0 = arith.constant 0 : i32
    %c0_i32_1 = arith.constant 0 : i32
    return %c0_i32, %c0_i32_0 : i32, i32
  }
  func.func @transform_8(%arg0: i32) -> (i32, i32, i32) {
    %c0_i32 = arith.constant 0 : i32
    %c0_i32_0 = arith.constant 0 : i32
    %c0_i32_1 = arith.constant 0 : i32
    return %arg0, %c0_i32, %c0_i32_0 : i32, i32, i32
  }
}

</mosaic_0001>

<bundles_post_ra>
// kernel: tpu_custom_call.1
= control target key start
LH: loop header
LB: loop body
LE: loop exit
PB: predicated region body
PF: predicated region fallthrough
CT: control target
= control target key end

     0   :  { %13 = vsyncpa [#allocation3], 0  ;;  %s6527_s0 = inlined_call_operand.hbm [shape: f32[1,8,1024], index: 0, kind: input, shape index: {}]   ;;  %s6528_s1 = inlined_call_operand.vmem [shape: f32[9,1024], index: 1, kind: input, shape index: {}]   ;;  %s6529_s2 = inlined_call_operand.vmem [shape: bf16[32,8], index: 2, kind: input, shape index: {}]   ;;  %s6530_s3 = inlined_call_operand.vmem [shape: f32[32,1], index: 3, kind: input, shape index: {}]   ;;  %s6531_s4 = inlined_call_operand.vmem [shape: f32[32,9], index: 4, kind: input, shape index: {}]   ;;  %s6532_s5 = inlined_call_operand.vmem [shape: f32[32,1], index: 5, kind: input, shape index: {}]   ;;  %s6533_s6 = inlined_call_operand.vmem [shape: bf16[8,32], index: 6, kind: input, shape index: {}]   ;;  %s6534_s7 = inlined_call_operand.vmem [shape: f32[8,1], index: 7, kind: input, shape index: {}]   ;;  %s6535_s8 = inlined_call_operand.hbm [shape: f32[1,8,1024], index: 8, kind: output, shape index: {}]  }
   0x1   :  { %14 = vsyncpa [#allocation4], 0  ;;  %s2888_s27 = smov [#allocation2]  }
   0x2   :  { %s21_s28 = sshll.u32 %s2888_s27, 4  ;;  %s22_s28 = int_to_ptr.vmem [resolvable:$true] %s21_s28 }
   0x3   :  { %s2852_s29 = scalar_lea.vmem %s22_s28, 1024  ;;  %p2857_p1 = scmp.lt.s32.totalorder %s22_s28, %s22_s28 }
   0x4   :  { %p2853_p0 = scmp.ne.s32.totalorder %s22_s28, %s2852_s29  ;;  %p2858_p2 = scmp.lt.s32.totalorder %s2852_s29, %s2852_s29 }
   0x6   :  { %p2859_p3 = por %p2858_p2, %p2857_p1 }
   0x8   :  { %p2860_p4 = pnand %p2859_p3, %p2853_p0 }
   0xa   :  { %2863 = shalt.err (!%p2860_p4)
}
   0xb   :  { %24 = dma.hbm_to_vmem [thread:$0]  %s6527_s0, 1024, %s22_s28, [#allocation3]  }
   0xc   :  { %2884 = dma.done.wait [#allocation3], 1024  }
   0xd   :  { %2885 = vsyncadd [#allocation3], 4294966272  ;;  %v6536_v0 = vmov 0   ;;  %v44_v1 = vld [vmem:[#allocation2 + $0x8] sm:$0xff]  ;;  %vm104_vm0 = vcmask 1043456   ;;  %v46_v2 = vld [vmem:[#allocation2 + $0x18] sm:$0xff] }
   0xe   :  { %161 = vmatprep.mubr.bf16.mxu0 %v6536_v0  ;;  %214 = vmatprep.mubr.bf16.mxu1 %v6536_v0  ;;  %v43_v3 = vld [vmem:[#allocation2] sm:$0xff]  ;;  %v56_v4 = vpack.c.bf16 %v44_v1, %v44_v1  ;;  %v58_v5 = vpack.c.bf16 %v46_v2, %v46_v2  ;;  %v45_v7 = vld [vmem:[#allocation2 + $0x10] sm:$0xff]  ;;  %v48_v11 = vld [vmem:[#allocation2 + $0x28] sm:$0xff]  ;;  %vm97_vm1 = vcmask 64512   ;;  %v2890_v35 = vmov 1   ;;  %s2892_s11 = smov 15  }
   0xf   :  { %2794 = vset.pattern.permute.xlu0 %v6536_v0  ;;  %2795 = vset.pattern.permute.xlu1 %v6536_v0  ;;  %v55_v6 = vpack.c.bf16 %v43_v3, %v43_v3  ;;  %v57_v8 = vpack.c.bf16 %v45_v7, %v45_v7  ;;  %v2818_v10 = vld [vmem:[%s6529_s2] sm:$0xff]   ;;  %v50_v12 = vld [vmem:[#allocation2 + $0x38] sm:$0xff]  ;;  %v60_v14 = vpack.c.bf16 %v48_v11, %v48_v11  ;;  %v49_v17 = vld [vmem:[#allocation2 + $0x30] sm:$0xff]  ;;  %v2891_v36 = vmov 2   ;;  %s2893_s12 = smov 17   ;;  %s2894_s13 = smov 16  }
  0x10   :  { %2751 = vmatprep.subr.msk.bf16.mxu0 %vm104_vm0, %v56_v4  ;;  %2754 = vmatprep.subr.msk.bf16.mxu1 %vm104_vm0, %v58_v5  ;;  %v62_v15 = vpack.c.bf16 %v50_v12, %v50_v12  ;;  %v47_v16 = vld [vmem:[#allocation2 + $0x20] sm:$0xff]  ;;  %v61_v20 = vpack.c.bf16 %v49_v17, %v49_v17  ;;  %v65_v21 = vld [vmem:[%s6530_s3 + $0x10] sm:$0xff]  ;;  %v64_v24 = vld [vmem:[%s6530_s3 + $0x8] sm:$0xff]  ;;  %s2895_s14 = smov 1   ;;  %s2898_s15 = smov 127   ;;  %vm2550_vm10 = vcmask 261120  }
  0x11   :  { %v106_v9 = vsel %vm104_vm0, %v55_v6, 0  ;;  %v112_v13 = vsel %vm104_vm0, %v57_v8, 0  ;;  %v63_v18 = vld [vmem:[%s6530_s3] sm:$0xff]  ;;  %v59_v19 = vpack.c.bf16 %v47_v16, %v47_v16  ;;  %79 = vperm.xlu1 %2795, %v65_v21   ;;  %v66_v25 = vld [vmem:[%s6530_s3 + $0x18] sm:$0xff]  ;;  %v2819_v26 = vld [vmem:[%s6529_s2 + $0x8] sm:$0xff]   ;;  %s2901_s18 = smov 113  }
  0x12   :  { %144 = vmatpush1.bf16.msra.mxu0 %v106_v9  ;;  %197 = vmatpush1.bf16.msra.mxu1 %v112_v13  ;;  %v124_v23 = vsel %vm104_vm0, %v61_v20, 0  ;;  %v425_v27 = vld [vmem:[%s6532_s5] sm:$0xff]  ;;  %v426_v28 = vld [vmem:[%s6532_s5 + $0x8] sm:$0xff]  ;;  %v427_v29 = vld [vmem:[%s6532_s5 + $0x10] sm:$0xff]  ;;  %s2903_s29 = smov 112  }
  0x13   :  { %69 = vperm.xlu0 %2794, %v63_v18   ;;  %2757 = vmatprep.subr.msk.bf16.mxu0 %vm104_vm0, %v60_v14  ;;  %v118_v22 = vsel %vm104_vm0, %v59_v19, 0  ;;  %v428_v30 = vld [vmem:[%s6532_s5 + $0x18] sm:$0xff]  ;;  %v3008_v31 = vld [vmem:[%s6531_s4] sm:$0xff]  ;;  %v3013_v32 = vld [vmem:[%s6531_s4 + $0x8] sm:$0xff] }
  0x14   :  { %2760 = vmatprep.subr.msk.bf16.mxu1 %vm104_vm0, %v62_v15  ;;  %v3020_v33 = vld [vmem:[%s6531_s4 + $0x10] sm:$0xff]  ;;  %v3028_v34 = vld [vmem:[%s6531_s4 + $0x18] sm:$0xff] }
  0x15   :  { %2752 = vmatmul.mubr.msk.bf16.vlgmr.msra.gmra.mxu0 %vm97_vm1, %v2818_v10  ;;  %2755 = vmatmul.mubr.msk.bf16.vlgmr.msra.gmra.mxu1 %vm97_vm1, %v2818_v10 }
  0x16   :  { %171 = vmatprep.mubr.bf16.mxu0 %v6536_v0  ;;  %224 = vmatprep.mubr.bf16.mxu1 %v6536_v0 }
  0x17   :  { %250 = vmatpush1.bf16.msra.mxu0 %v118_v22  ;;  %303 = vmatpush1.bf16.msra.mxu1 %v124_v23 }
  0x18   :  { %74 = vperm.xlu0 %2794, %v64_v24   ;;  %84 = vperm.xlu1 %2795, %v66_v25  }
  0x1c   :  { %431 = vperm.xlu0 %2794, %v425_v27   ;;  %436 = vperm.xlu1 %2795, %v426_v28  }
  0x1d   :  { %2753 = vmatmul.mubr.msk.bf16.gmra.mxu0 %vm97_vm1, %v2819_v26  ;;  %2756 = vmatmul.mubr.msk.bf16.gmra.mxu1 %vm97_vm1, %v2819_v26 }
  0x1e   :  { %267 = vmatprep.mubr.bf16.mxu0 %v6536_v0  ;;  %320 = vmatprep.mubr.bf16.mxu1 %v6536_v0 }
  0x20   :  { %441 = vperm.xlu0 %2794, %v427_v29   ;;  %446 = vperm.xlu1 %2795, %v428_v30  }
  0x24   :  { %614 = vperm.xlu0 %2794, %v3008_v31   ;;  %619 = vperm.xlu1 %2795, %v3013_v32  }
  0x25   :  { %2758 = vmatmul.mubr.msk.bf16.vlgmr.msra.gmra.mxu0 %vm97_vm1, %v2818_v10  ;;  %2761 = vmatmul.mubr.msk.bf16.vlgmr.msra.gmra.mxu1 %vm97_vm1, %v2818_v10 }
  0x26   :  { %277 = vmatprep.mubr.bf16.mxu0 %v6536_v0  ;;  %330 = vmatprep.mubr.bf16.mxu1 %v6536_v0 }
  0x28   :  { %624 = vperm.xlu0 %2794, %v3020_v33   ;;  %629 = vperm.xlu1 %2795, %v3028_v34  }
  0x2c   :  { %2796 = vset.pattern.permute.xlu0 %v2890_v35  ;;  %2797 = vset.pattern.permute.xlu1 %v2890_v35 }
  0x2d   :  { %2759 = vmatmul.mubr.msk.bf16.gmra.mxu0 %vm97_vm1, %v2819_v26  ;;  %2762 = vmatmul.mubr.msk.bf16.gmra.mxu1 %vm97_vm1, %v2819_v26 }
  0x2e   :  { %862 = vperm.xlu1 %2797, %v3013_v32   ;;  %858 = vperm.xlu0 %2796, %v3008_v31  }
  0x2f   :  { %2586 = vmatprep.mubr.bf16.mxu0 %v6536_v0  ;;  %2627 = vmatprep.mubr.bf16.mxu1 %v6536_v0 }
  0x32   :  { %866 = vperm.xlu1 %2797, %v3020_v33   ;;  %870 = vperm.xlu0 %2796, %v3028_v34  }
  0x36   :  { %2798 = vset.pattern.permute.xlu1 %v2891_v36  ;;  %2799 = vset.pattern.permute.xlu0 %v2891_v36 }
  0x37   :  { %1099 = vperm.xlu1 %2798, %v3008_v31   ;;  %1103 = vperm.xlu0 %2799, %v3013_v32  }
  0x3b   :  { %1107 = vperm.xlu1 %2798, %v3020_v33  }
  0x3f   :  { %1111 = vperm.xlu1 %2798, %v3028_v34  }
  0x8c   :  { %v3113_v9 = vpop.permute.xlu1 %79 }
  0x8e   :  { %v3045_v37 = vpop.permute.xlu0 %69 }
  0x93   :  { %v3063_v52 = vpop.permute.xlu0 %74  ;;  %v3139_v22 = vpop.permute.xlu1 %84 }
  0x97   :  { %v3155_v35 = vpop.permute.xlu1 %436 }
  0x98   :  { %6942 = vst [vmem:[#allocation20_spill] sm:$0xff] %v3155_v35 }
  0xd5   :  { %v163_v38 = vpop.f32.mrf.mxu0  ;;  %v216_v40 = vpop.f32.mrf.mxu1 }
  0xd6   :  { %v164_v39 = vadd.f32 %v163_v38, %v3045_v37  ;;  %v217_v41 = vadd.f32 %v216_v40, %v3045_v37 }
  0xd7   :  { %v165_v42 = vpop.f32.mrf.mxu0  ;;  %v218_v47 = vpop.f32.mrf.mxu1 }
  0xd8   :  { %v341_v43 = vmax.f32 %v164_v39, 0.0  ;;  %v343_v45 = vmax.f32 %v217_v41, 0.0  ;;  %v166_v46 = vadd.f32 %v165_v42, %v3045_v37  ;;  %v219_v50 = vadd.f32 %v218_v47, %v3045_v37  ;;  %v3163_v39 = vpop.permute.xlu1 %446  ;;  %v3175_v41 = vpop.permute.xlu0 %431 }
  0xd9   :  { %v167_v51 = vpop.f32.mrf.mxu0  ;;  %v220_v56 = vpop.f32.mrf.mxu1  ;;  %6944 = vst [vmem:[#allocation22_spill] sm:$0xff] %v3163_v39  ;;  %6946 = vst [vmem:[#allocation24_spill] sm:$0xff] %v3175_v41 }
  0xda   :  { %v3049_v44 = vmin.f32 %v341_v43, 6.0  ;;  %v3056_v48 = vmin.f32 %v343_v45, 6.0  ;;  %v342_v49 = vmax.f32 %v166_v46, 0.0  ;;  %v344_v54 = vmax.f32 %v219_v50, 0.0 }
  0xdb   :  { %v168_v55 = vadd.f32 %v167_v51, %v3063_v52  ;;  %v221_v59 = vadd.f32 %v220_v56, %v3063_v52  ;;  %v169_v63 = vpop.f32.mrf.mxu0  ;;  %v222_v2 = vpop.f32.mrf.mxu1 }
  0xdc   :  { %6930 = vst [vmem:[#allocation8_spill] sm:$0xff] %v3049_v44  ;;  %937 = vrot.lane.b32.xlu1 %v3049_v44, %s2892_s11  ;;  %449 = vrot.lane.b32.xlu0 %v3049_v44, %s2893_s12  ;;  %6931 = vst [vmem:[#allocation9_spill] sm:$0xff] %v3056_v48  ;;  %v3065_v53 = vmin.f32 %v342_v49, 6.0  ;;  %v3072_v57 = vmin.f32 %v344_v54, 6.0  ;;  %v170_v1 = vadd.f32 %v169_v63, %v3063_v52  ;;  %v3177_v42 = vpop.permute.xlu1 %619  ;;  %v3184_v46 = vpop.permute.xlu0 %441 }
  0xdd   :  { %v349_v58 = vmax.f32 %v168_v55, 0.0  ;;  %v351_v61 = vmax.f32 %v221_v59, 0.0  ;;  %v223_v4 = vadd.f32 %v222_v2, %v3063_v52  ;;  %v173_v8 = vpop.f32.mrf.mxu0  ;;  %v226_v12 = vpop.f32.mrf.mxu1  ;;  %6947 = vst [vmem:[#allocation25_spill] sm:$0xff] %v3177_v42  ;;  %6948 = vst [vmem:[#allocation26_spill] sm:$0xff] %v3184_v46 }
  0xde   :  { %6932 = vst [vmem:[#allocation10_spill] sm:$0xff] %v3065_v53  ;;  %6933 = vst [vmem:[#allocation11_spill] sm:$0xff] %v3072_v57  ;;  %v350_v3 = vmax.f32 %v170_v1, 0.0  ;;  %v174_v10 = vadd.f32 %v173_v8, %v3113_v9  ;;  %v227_v13 = vadd.f32 %v226_v12, %v3113_v9 }
  0xdf   :  { %v3079_v60 = vmin.f32 %v349_v58, 6.0  ;;  %v3085_v62 = vmin.f32 %v351_v61, 6.0  ;;  %v352_v6 = vmax.f32 %v223_v4, 0.0  ;;  %v175_v15 = vpop.f32.mrf.mxu0  ;;  %v228_v18 = vpop.f32.mrf.mxu1 }
  0xe0   :  { %953 = vrot.lane.b32.xlu1 %v3056_v48, %s2892_s11  ;;  %465 = vrot.lane.b32.xlu0 %v3056_v48, %s2893_s12  ;;  %v3105_v5 = vmin.f32 %v350_v3, 6.0  ;;  %v357_v11 = vmax.f32 %v174_v10, 0.0  ;;  %v176_v16 = vadd.f32 %v175_v15, %v3113_v9  ;;  %v359_v17 = vmax.f32 %v227_v13, 0.0  ;;  %v3186_v47 = vpop.permute.xlu1 %629  ;;  %v3199_v55 = vpop.permute.xlu0 %614 }
  0xe1   :  { %6934 = vst [vmem:[#allocation12_spill] sm:$0xff] %v3079_v60  ;;  %6935 = vst [vmem:[#allocation13_spill] sm:$0xff] %v3085_v62  ;;  %v3111_v7 = vmin.f32 %v352_v6, 6.0  ;;  %v229_v19 = vadd.f32 %v228_v18, %v3113_v9  ;;  %v177_v23 = vpop.f32.mrf.mxu0  ;;  %v230_v27 = vpop.f32.mrf.mxu1 }
  0xe2   :  { %6936 = vst [vmem:[#allocation14_spill] sm:$0xff] %v3105_v5  ;;  %v3125_v14 = vmin.f32 %v357_v11, 6.0  ;;  %v358_v20 = vmax.f32 %v176_v16, 0.0  ;;  %v3137_v21 = vmin.f32 %v359_v17, 6.0  ;;  %v178_v26 = vadd.f32 %v177_v23, %v3139_v22  ;;  %6949 = vst [vmem:[#allocation27_spill] sm:$0xff] %v3186_v47 }
  0xe3   :  { %6937 = vst [vmem:[#allocation15_spill] sm:$0xff] %v3111_v7  ;;  %v360_v24 = vmax.f32 %v229_v19, 0.0  ;;  %v231_v29 = vadd.f32 %v230_v27, %v3139_v22  ;;  %v179_v43 = vpop.f32.mrf.mxu0  ;;  %v232_v49 = vpop.f32.mrf.mxu1  ;;  %6951 = vst [vmem:[#allocation29_spill] sm:$0xff] %v3199_v55 }
  0xe4   :  { %945 = vrot.lane.b32.xlu1 %v3065_v53, %s2892_s11  ;;  %696 = vrot.lane.b32.xlu0 %v3049_v44, %s2894_s13  ;;  %6938 = vst [vmem:[#allocation16_spill] sm:$0xff] %v3125_v14  ;;  %6939 = vst [vmem:[#allocation17_spill] sm:$0xff] %v3137_v21  ;;  %v3145_v25 = vmin.f32 %v358_v20, 6.0  ;;  %v365_v30 = vmax.f32 %v178_v26, 0.0  ;;  %v180_v45 = vadd.f32 %v179_v43, %v3139_v22  ;;  %v3197_v54 = vpop.permute.xlu1 %862  ;;  %v3211_v1 = vpop.permute.xlu0 %624 }
  0xe5   :  { %v3152_v28 = vmin.f32 %v360_v24, 6.0  ;;  %v367_v36 = vmax.f32 %v231_v29, 0.0  ;;  %v233_v50 = vadd.f32 %v232_v49, %v3139_v22  ;;  %6950 = vst [vmem:[#allocation28_spill] sm:$0xff] %v3197_v54  ;;  %v269_v63 = vpop.f32.mrf.mxu0  ;;  %6955 = vst [vmem:[#allocation33_spill] sm:$0xff] %v3211_v1  ;;  %v322_v3 = vpop.f32.mrf.mxu1 }
  0xe6   :  { %6940 = vst [vmem:[#allocation18_spill] sm:$0xff] %v3145_v25  ;;  %v3161_v38 = vmin.f32 %v365_v30, 6.0  ;;  %v366_v51 = vmax.f32 %v180_v45, 0.0  ;;  %v270_v2 = vadd.f32 %v269_v63, %v3045_v37  ;;  %v323_v10 = vadd.f32 %v322_v3, %v3045_v37 }
  0xe7   :  { %6941 = vst [vmem:[#allocation19_spill] sm:$0xff] %v3152_v28  ;;  %v3169_v40 = vmin.f32 %v367_v36, 6.0  ;;  %v368_v56 = vmax.f32 %v233_v50, 0.0  ;;  %v271_v11 = vpop.f32.mrf.mxu0  ;;  %v324_v18 = vpop.f32.mrf.mxu1 }
  0xe8   :  { %961 = vrot.lane.b32.xlu1 %v3072_v57, %s2892_s11  ;;  %712 = vrot.lane.b32.xlu0 %v3056_v48, %s2894_s13  ;;  %6943 = vst [vmem:[#allocation21_spill] sm:$0xff] %v3161_v38  ;;  %v3201_v58 = vmin.f32 %v366_v51, 6.0  ;;  %v3209_v61 = vpop.permute.xlu1 %866  ;;  %v3224_v6 = vpop.permute.xlu0 %858  ;;  %v345_v8 = vmax.f32 %v270_v2, 0.0  ;;  %v347_v13 = vmax.f32 %v323_v10, 0.0  ;;  %v272_v15 = vadd.f32 %v271_v11, %v3045_v37 }
  0xe9   :  { %6945 = vst [vmem:[#allocation23_spill] sm:$0xff] %v3169_v40  ;;  %v3207_v59 = vmin.f32 %v368_v56, 6.0  ;;  %6954 = vst [vmem:[#allocation32_spill] sm:$0xff] %v3209_v61  ;;  %v325_v23 = vadd.f32 %v324_v18, %v3045_v37  ;;  %v273_v24 = vpop.f32.mrf.mxu0  ;;  %v326_v43 = vpop.f32.mrf.mxu1 }
  0xea   :  { %6952 = vst [vmem:[#allocation30_spill] sm:$0xff] %v3201_v58  ;;  %6957 = vst [vmem:[#allocation35_spill] sm:$0xff] %v3224_v6  ;;  %v3231_v12 = vmin.f32 %v345_v8, 6.0  ;;  %v3242_v19 = vmin.f32 %v347_v13, 6.0  ;;  %v346_v20 = vmax.f32 %v272_v15, 0.0  ;;  %v274_v36 = vadd.f32 %v273_v24, %v3063_v52 }
  0xeb   :  { %6953 = vst [vmem:[#allocation31_spill] sm:$0xff] %v3207_v59  ;;  %v348_v30 = vmax.f32 %v325_v23, 0.0  ;;  %v327_v49 = vadd.f32 %v326_v43, %v3063_v52  ;;  %v275_v13 = vpop.f32.mrf.mxu0  ;;  %v328_v23 = vpop.f32.mrf.mxu1  ;;  %v2896_v24 = vmov 3  }
  0xec   :  { %451 = vrot.lane.b32.xlu1 %v3079_v60, %s2893_s12  ;;  %1178 = vrot.lane.b32.xlu0 %v3049_v44, %s2895_s14  ;;  %v3222_v4 = vpop.permute.xlu1 %1099  ;;  %6958 = vst [vmem:[#allocation36_spill] sm:$0xff] %v3231_v12  ;;  %v3236_v17 = vpop.permute.xlu0 %870  ;;  %6961 = vst [vmem:[#allocation39_spill] sm:$0xff] %v3242_v19  ;;  %v3253_v29 = vmin.f32 %v346_v20, 6.0  ;;  %v353_v45 = vmax.f32 %v274_v36, 0.0  ;;  %v276_v15 = vadd.f32 %v275_v13, %v3063_v52 }
  0xed   :  { %6956 = vst [vmem:[#allocation34_spill] sm:$0xff] %v3222_v4  ;;  %6960 = vst [vmem:[#allocation38_spill] sm:$0xff] %v3236_v17  ;;  %v3260_v37 = vmin.f32 %v348_v30, 6.0  ;;  %v355_v63 = vmax.f32 %v327_v49, 0.0  ;;  %2801 = vset.pattern.permute.xlu1 %v2896_v24  ;;  %2800 = vset.pattern.permute.xlu0 %v2896_v24  ;;  %v329_v36 = vadd.f32 %v328_v23, %v3063_v52  ;;  %v279_v24 = vpop.f32.mrf.mxu0 }
  0xee   :  { %6964 = vst [vmem:[#allocation42_spill] sm:$0xff] %v3253_v29  ;;  %v3271_v56 = vmin.f32 %v353_v45, 6.0  ;;  %v354_v30 = vmax.f32 %v276_v15, 0.0 }
  0xef   :  { %6965 = vst [vmem:[#allocation43_spill] sm:$0xff] %v3260_v37  ;;  %v3281_v8 = vmin.f32 %v355_v63, 6.0  ;;  %v356_v63 = vmax.f32 %v329_v36, 0.0 }
  0xf0   :  { %467 = vrot.lane.b32.xlu1 %v3085_v62, %s2893_s12  ;;  %457 = vrot.lane.b32.xlu0 %v3065_v53, %s2893_s12  ;;  %v3234_v16 = vpop.permute.xlu1 %1107  ;;  %v3251_v27 = vpop.permute.xlu0 %1103  ;;  %6966 = vst [vmem:[#allocation44_spill] sm:$0xff] %v3271_v56  ;;  %v3309_v49 = vmin.f32 %v354_v30, 6.0  ;;  %v280_v30 = vadd.f32 %v279_v24, %v3113_v9 }
  0xf1   :  { %6959 = vst [vmem:[#allocation37_spill] sm:$0xff] %v3234_v16  ;;  %6963 = vst [vmem:[#allocation41_spill] sm:$0xff] %v3251_v27  ;;  %v3319_v52 = vmin.f32 %v356_v63, 6.0  ;;  %v332_v63 = vpop.f32.mrf.mxu1  ;;  %v281_v24 = vpop.f32.mrf.mxu0 }
  0xf2   :  { %6969 = vst [vmem:[#allocation47_spill] sm:$0xff] %v3281_v8  ;;  %6973 = vst [vmem:[#allocation51_spill] sm:$0xff] %v3309_v49  ;;  %v361_v39 = vmax.f32 %v280_v30, 0.0  ;;  %v333_v17 = vadd.f32 %v332_v63, %v3113_v9  ;;  %v282_v1 = vadd.f32 %v281_v24, %v3113_v9 }
  0xf3   :  { %6976 = vst [vmem:[#allocation54_spill] sm:$0xff] %v3319_v52  ;;  %v334_v63 = vpop.f32.mrf.mxu1  ;;  %v283_v24 = vpop.f32.mrf.mxu0 }
  0xf4   :  { %698 = vrot.lane.b32.xlu1 %v3079_v60, %s2894_s13  ;;  %473 = vrot.lane.b32.xlu0 %v3072_v57, %s2893_s12  ;;  %v3249_v26 = vpop.permute.xlu1 %1111  ;;  %v3347_v46 = vmin.f32 %v361_v39, 6.0  ;;  %v363_v16 = vmax.f32 %v333_v17, 0.0  ;;  %v335_v39 = vadd.f32 %v334_v63, %v3113_v9 }
  0xf5   :  { %6962 = vst [vmem:[#allocation40_spill] sm:$0xff] %v3249_v26  ;;  %v336_v9 = vpop.f32.mrf.mxu1 }
  0xf6   :  { %6981 = vst [vmem:[#allocation59_spill] sm:$0xff] %v3347_v46 }
  0xf8   :  { %714 = vrot.lane.b32.xlu1 %v3085_v62, %s2894_s13  ;;  %704 = vrot.lane.b32.xlu0 %v3065_v53, %s2894_s13 }
  0xfc   :  { %1180 = vrot.lane.b32.xlu1 %v3079_v60, %s2895_s14  ;;  %720 = vrot.lane.b32.xlu0 %v3072_v57, %s2894_s13 }
 0x100   :  { %459 = vrot.lane.b32.xlu1 %v3105_v5, %s2893_s12  ;;  %939 = vrot.lane.b32.xlu0 %v3079_v60, %s2892_s11 }
 0x104   :  { %475 = vrot.lane.b32.xlu1 %v3111_v7, %s2893_s12  ;;  %955 = vrot.lane.b32.xlu0 %v3085_v62, %s2892_s11 }
 0x108   :  { %706 = vrot.lane.b32.xlu1 %v3105_v5, %s2894_s13  ;;  %947 = vrot.lane.b32.xlu0 %v3105_v5, %s2892_s11 }
 0x10c   :  { %722 = vrot.lane.b32.xlu1 %v3111_v7, %s2894_s13  ;;  %963 = vrot.lane.b32.xlu0 %v3111_v7, %s2892_s11 }
 0x110   :  { %941 = vrot.lane.b32.xlu1 %v3125_v14, %s2892_s11  ;;  %453 = vrot.lane.b32.xlu0 %v3125_v14, %s2893_s12 }
 0x114   :  { %957 = vrot.lane.b32.xlu1 %v3137_v21, %s2892_s11  ;;  %469 = vrot.lane.b32.xlu0 %v3137_v21, %s2893_s12 }
 0x118   :  { %949 = vrot.lane.b32.xlu1 %v3145_v25, %s2892_s11  ;;  %700 = vrot.lane.b32.xlu0 %v3125_v14, %s2894_s13 }
 0x11c   :  { %965 = vrot.lane.b32.xlu1 %v3152_v28, %s2892_s11  ;;  %716 = vrot.lane.b32.xlu0 %v3137_v21, %s2894_s13 }
 0x120   :  { %455 = vrot.lane.b32.xlu1 %v3161_v38, %s2893_s12  ;;  %1182 = vrot.lane.b32.xlu0 %v3125_v14, %s2895_s14 }
 0x124   :  { %471 = vrot.lane.b32.xlu1 %v3169_v40, %s2893_s12  ;;  %461 = vrot.lane.b32.xlu0 %v3145_v25, %s2893_s12 }
 0x128   :  { %702 = vrot.lane.b32.xlu1 %v3161_v38, %s2894_s13  ;;  %477 = vrot.lane.b32.xlu0 %v3152_v28, %s2893_s12 }
 0x12c   :  { %718 = vrot.lane.b32.xlu1 %v3169_v40, %s2894_s13  ;;  %708 = vrot.lane.b32.xlu0 %v3145_v25, %s2894_s13 }
 0x130   :  { %1184 = vrot.lane.b32.xlu1 %v3161_v38, %s2895_s14  ;;  %724 = vrot.lane.b32.xlu0 %v3152_v28, %s2894_s13 }
 0x134   :  { %463 = vrot.lane.b32.xlu1 %v3201_v58, %s2893_s12  ;;  %943 = vrot.lane.b32.xlu0 %v3161_v38, %s2892_s11 }
 0x138   :  { %479 = vrot.lane.b32.xlu1 %v3207_v59, %s2893_s12  ;;  %959 = vrot.lane.b32.xlu0 %v3169_v40, %s2892_s11 }
 0x13c   :  { %710 = vrot.lane.b32.xlu1 %v3201_v58, %s2894_s13  ;;  %951 = vrot.lane.b32.xlu0 %v3201_v58, %s2892_s11 }
 0x140   :  { %726 = vrot.lane.b32.xlu1 %v3207_v59, %s2894_s13  ;;  %967 = vrot.lane.b32.xlu0 %v3207_v59, %s2892_s11 }
 0x144   :  { %969 = vrot.lane.b32.xlu1 %v3231_v12, %s2892_s11  ;;  %481 = vrot.lane.b32.xlu0 %v3231_v12, %s2893_s12 }
 0x148   :  { %985 = vrot.lane.b32.xlu1 %v3242_v19, %s2892_s11  ;;  %497 = vrot.lane.b32.xlu0 %v3242_v19, %s2893_s12 }
 0x14c   :  { %977 = vrot.lane.b32.xlu1 %v3253_v29, %s2892_s11  ;;  %728 = vrot.lane.b32.xlu0 %v3231_v12, %s2894_s13 }
 0x14e   :  { %v3263_v50 = vpop.permute.xlu1 %937  ;;  %v3265_v51 = vpop.permute.xlu0 %449 }
 0x150   :  { %993 = vrot.lane.b32.xlu1 %v3260_v37, %s2892_s11  ;;  %744 = vrot.lane.b32.xlu0 %v3242_v19, %s2894_s13 }
 0x152   :  { %v3273_v2 = vpop.permute.xlu1 %953  ;;  %v3275_v3 = vpop.permute.xlu0 %465 }
 0x153   :  { %6967 = vst [vmem:[#allocation45_spill] sm:$0xff] %v3273_v2  ;;  %6968 = vst [vmem:[#allocation46_spill] sm:$0xff] %v3275_v3 }
 0x154   :  { %483 = vrot.lane.b32.xlu1 %v3271_v56, %s2893_s12  ;;  %489 = vrot.lane.b32.xlu0 %v3253_v29, %s2893_s12 }
 0x156   :  { %v3283_v10 = vpop.permute.xlu1 %945  ;;  %v3285_v11 = vpop.permute.xlu0 %696 }
 0x157   :  { %6970 = vst [vmem:[#allocation48_spill] sm:$0xff] %v3283_v10  ;;  %v7093_v10 = vmov 7  }
 0x158   :  { %499 = vrot.lane.b32.xlu1 %v3281_v8, %s2893_s12  ;;  %505 = vrot.lane.b32.xlu0 %v3260_v37, %s2893_s12 }
 0x15a   :  { %v3292_v18 = vpop.permute.xlu1 %961  ;;  %v3294_v20 = vpop.permute.xlu0 %712 }
 0x15b   :  { %6971 = vst [vmem:[#allocation49_spill] sm:$0xff] %v3292_v18  ;;  %6972 = vst [vmem:[#allocation50_spill] sm:$0xff] %v3294_v20 }
 0x15c   :  { %730 = vrot.lane.b32.xlu1 %v3271_v56, %s2894_s13  ;;  %736 = vrot.lane.b32.xlu0 %v3253_v29, %s2894_s13 }
 0x15e   :  { %v3301_v43 = vpop.permute.xlu1 %451  ;;  %v3303_v45 = vpop.permute.xlu0 %1178 }
 0x160   :  { %746 = vrot.lane.b32.xlu1 %v3281_v8, %s2894_s13  ;;  %752 = vrot.lane.b32.xlu0 %v3260_v37, %s2894_s13 }
 0x162   :  { %v3311_v13 = vpop.permute.xlu1 %467  ;;  %v3313_v0 = vpop.permute.xlu0 %457 }
 0x163   :  { %6974 = vst [vmem:[#allocation52_spill] sm:$0xff] %v3311_v13  ;;  %6975 = vst [vmem:[#allocation53_spill] sm:$0xff] %v3313_v0  ;;  %v3358_v13 = vmin.f32 %v363_v16, 6.0  ;;  %v284_v16 = vadd.f32 %v283_v24, %v3139_v22 }
 0x164   :  { %491 = vrot.lane.b32.xlu1 %v3309_v49, %s2893_s12  ;;  %971 = vrot.lane.b32.xlu0 %v3271_v56, %s2892_s11 }
 0x165   :  { %6983 = vst [vmem:[#allocation61_spill] sm:$0xff] %v3358_v13 }
 0x166   :  { %v3321_v15 = vpop.permute.xlu1 %698  ;;  %v3323_v23 = vpop.permute.xlu0 %473 }
 0x167   :  { %6977 = vst [vmem:[#allocation55_spill] sm:$0xff] %v3323_v23  ;;  %v364_v23 = vmax.f32 %v335_v39, 0.0 }
 0x168   :  { %507 = vrot.lane.b32.xlu1 %v3319_v52, %s2893_s12  ;;  %987 = vrot.lane.b32.xlu0 %v3281_v8, %s2892_s11 }
 0x169   :  { %v3380_v63 = vmin.f32 %v364_v23, 6.0 }
 0x16a   :  { %v3330_v36 = vpop.permute.xlu1 %714  ;;  %v3332_v26 = vpop.permute.xlu0 %704 }
 0x16b   :  { %6978 = vst [vmem:[#allocation56_spill] sm:$0xff] %v3330_v36  ;;  %6979 = vst [vmem:[#allocation57_spill] sm:$0xff] %v3332_v26 }
 0x16c   :  { %738 = vrot.lane.b32.xlu1 %v3309_v49, %s2894_s13  ;;  %979 = vrot.lane.b32.xlu0 %v3309_v49, %s2892_s11  ;;  %6989 = vst [vmem:[#allocation67_spill] sm:$0xff] %v3380_v63 }
 0x16e   :  { %v3339_v47 = vpop.permute.xlu1 %1180  ;;  %v3341_v61 = vpop.permute.xlu0 %720 }
 0x16f   :  { %6980 = vst [vmem:[#allocation58_spill] sm:$0xff] %v3341_v61  ;;  %v362_v61 = vmax.f32 %v282_v1, 0.0 }
 0x170   :  { %754 = vrot.lane.b32.xlu1 %v3319_v52, %s2894_s13  ;;  %995 = vrot.lane.b32.xlu0 %v3319_v52, %s2892_s11 }
 0x172   :  { %v3350_v36 = vpop.permute.xlu1 %459  ;;  %v3352_v30 = vpop.permute.xlu0 %939 }
 0x173   :  { %6982 = vst [vmem:[#allocation60_spill] sm:$0xff] %v3350_v36  ;;  %v3369_v36 = vmin.f32 %v362_v61, 6.0  ;;  %v337_v61 = vadd.f32 %v336_v9, %v3139_v22 }
 0x174   :  { %973 = vrot.lane.b32.xlu1 %v3347_v46, %s2892_s11  ;;  %485 = vrot.lane.b32.xlu0 %v3347_v46, %s2893_s12 }
 0x175   :  { %6986 = vst [vmem:[#allocation64_spill] sm:$0xff] %v3369_v36 }
 0x176   :  { %v3361_v20 = vpop.permute.xlu1 %475  ;;  %v3363_v17 = vpop.permute.xlu0 %955 }
 0x177   :  { %6984 = vst [vmem:[#allocation62_spill] sm:$0xff] %v3361_v20  ;;  %6985 = vst [vmem:[#allocation63_spill] sm:$0xff] %v3363_v17  ;;  %v369_v17 = vmax.f32 %v284_v16, 0.0 }
 0x178   :  { %989 = vrot.lane.b32.xlu1 %v3358_v13, %s2892_s11  ;;  %501 = vrot.lane.b32.xlu0 %v3358_v13, %s2893_s12 }
 0x179   :  { %v3391_v24 = vmin.f32 %v369_v17, 6.0 }
 0x17a   :  { %v3372_v18 = vpop.permute.xlu1 %706  ;;  %v3374_v1 = vpop.permute.xlu0 %947 }
 0x17b   :  { %6987 = vst [vmem:[#allocation65_spill] sm:$0xff] %v3372_v18  ;;  %6988 = vst [vmem:[#allocation66_spill] sm:$0xff] %v3374_v1  ;;  %v371_v1 = vmax.f32 %v337_v61, 0.0 }
 0x17c   :  { %981 = vrot.lane.b32.xlu1 %v3369_v36, %s2892_s11  ;;  %732 = vrot.lane.b32.xlu0 %v3347_v46, %s2894_s13  ;;  %6992 = vst [vmem:[#allocation70_spill] sm:$0xff] %v3391_v24 }
 0x17d   :  { %v3401_v16 = vmin.f32 %v371_v1, 6.0 }
 0x17e   :  { %v3383_v20 = vpop.permute.xlu1 %722  ;;  %v3385_v39 = vpop.permute.xlu0 %963 }
 0x17f   :  { %6990 = vst [vmem:[#allocation68_spill] sm:$0xff] %v3383_v20  ;;  %6991 = vst [vmem:[#allocation69_spill] sm:$0xff] %v3385_v39  ;;  %v285_v20 = vpop.f32.mrf.mxu0 }
 0x180   :  { %997 = vrot.lane.b32.xlu1 %v3380_v63, %s2892_s11  ;;  %748 = vrot.lane.b32.xlu0 %v3358_v13, %s2894_s13  ;;  %6995 = vst [vmem:[#allocation73_spill] sm:$0xff] %v3401_v16  ;;  %v286_v17 = vadd.f32 %v285_v20, %v3139_v22 }
 0x182   :  { %v3393_v18 = vpop.permute.xlu1 %941  ;;  %v3395_v23 = vpop.permute.xlu0 %453  ;;  %v370_v1 = vmax.f32 %v286_v17, 0.0 }
 0x183   :  { %6993 = vst [vmem:[#allocation71_spill] sm:$0xff] %v3393_v18  ;;  %6994 = vst [vmem:[#allocation72_spill] sm:$0xff] %v3395_v23  ;;  %v338_v23 = vpop.f32.mrf.mxu1 }
 0x184   :  { %487 = vrot.lane.b32.xlu1 %v3391_v24, %s2893_s12  ;;  %493 = vrot.lane.b32.xlu0 %v3369_v36, %s2893_s12  ;;  %v3429_v20 = vmin.f32 %v370_v1, 6.0 }
 0x186   :  { %v3403_v9 = vpop.permute.xlu1 %957  ;;  %v3405_v39 = vpop.permute.xlu0 %469  ;;  %7002 = vst [vmem:[#allocation80_spill] sm:$0xff] %v3429_v20 }
 0x187   :  { %6996 = vst [vmem:[#allocation74_spill] sm:$0xff] %v3403_v9  ;;  %6997 = vst [vmem:[#allocation75_spill] sm:$0xff] %v3405_v39  ;;  %v339_v9 = vadd.f32 %v338_v23, %v3139_v22 }
 0x188   :  { %503 = vrot.lane.b32.xlu1 %v3401_v16, %s2893_s12  ;;  %509 = vrot.lane.b32.xlu0 %v3380_v63, %s2893_s12 }
 0x18a   :  { %v3412_v61 = vpop.permute.xlu1 %949  ;;  %v3414_v18 = vpop.permute.xlu0 %700 }
 0x18b   :  { %6998 = vst [vmem:[#allocation76_spill] sm:$0xff] %v3412_v61  ;;  %6999 = vst [vmem:[#allocation77_spill] sm:$0xff] %v3414_v18  ;;  %v372_v18 = vmax.f32 %v339_v9, 0.0 }
 0x18c   :  { %734 = vrot.lane.b32.xlu1 %v3391_v24, %s2894_s13  ;;  %740 = vrot.lane.b32.xlu0 %v3369_v36, %s2894_s13 }
 0x18d   :  { %v3439_v22 = vmin.f32 %v372_v18, 6.0 }
 0x18e   :  { %v3421_v39 = vpop.permute.xlu1 %965  ;;  %v3423_v2 = vpop.permute.xlu0 %716 }
 0x18f   :  { %7000 = vst [vmem:[#allocation78_spill] sm:$0xff] %v3421_v39  ;;  %7001 = vst [vmem:[#allocation79_spill] sm:$0xff] %v3423_v2 }
 0x190   :  { %750 = vrot.lane.b32.xlu1 %v3401_v16, %s2894_s13  ;;  %756 = vrot.lane.b32.xlu0 %v3380_v63, %s2894_s13  ;;  %7005 = vst [vmem:[#allocation83_spill] sm:$0xff] %v3439_v22 }
 0x192   :  { %v3431_v61 = vpop.permute.xlu1 %455  ;;  %v3433_v26 = vpop.permute.xlu0 %1182 }
 0x193   :  { %7003 = vst [vmem:[#allocation81_spill] sm:$0xff] %v3431_v61  ;;  %7004 = vst [vmem:[#allocation82_spill] sm:$0xff] %v3433_v26 }
 0x194   :  { %495 = vrot.lane.b32.xlu1 %v3429_v20, %s2893_s12  ;;  %975 = vrot.lane.b32.xlu0 %v3391_v24, %s2892_s11 }
 0x196   :  { %v3441_v23 = vpop.permute.xlu1 %471  ;;  %v3443_v17 = vpop.permute.xlu0 %461 }
 0x197   :  { %7006 = vst [vmem:[#allocation84_spill] sm:$0xff] %v3441_v23  ;;  %7007 = vst [vmem:[#allocation85_spill] sm:$0xff] %v3443_v17 }
 0x198   :  { %511 = vrot.lane.b32.xlu1 %v3439_v22, %s2893_s12  ;;  %991 = vrot.lane.b32.xlu0 %v3401_v16, %s2892_s11 }
 0x19a   :  { %v3449_v9 = vpop.permute.xlu1 %702  ;;  %v3451_v1 = vpop.permute.xlu0 %477 }
 0x19b   :  { %7008 = vst [vmem:[#allocation86_spill] sm:$0xff] %v3449_v9  ;;  %7009 = vst [vmem:[#allocation87_spill] sm:$0xff] %v3451_v1  ;;  %v3727_v1 = vld [vmem:[%s6528_s1 + $0x10] sm:$0xff] }
 0x19c   :  { %742 = vrot.lane.b32.xlu1 %v3429_v20, %s2894_s13  ;;  %983 = vrot.lane.b32.xlu0 %v3429_v20, %s2892_s11  ;;  %7076 = vst [vmem:[#allocation154_spill] sm:$0xff] %v3727_v1 }
 0x19e   :  { %v3457_v18 = vpop.permute.xlu1 %718  ;;  %v3459_v26 = vpop.permute.xlu0 %708 }
 0x19f   :  { %7010 = vst [vmem:[#allocation88_spill] sm:$0xff] %v3457_v18  ;;  %7011 = vst [vmem:[#allocation89_spill] sm:$0xff] %v3459_v26 }
 0x1a0   :  { %758 = vrot.lane.b32.xlu1 %v3439_v22, %s2894_s13  ;;  %999 = vrot.lane.b32.xlu0 %v3439_v22, %s2892_s11 }
 0x1a2   :  { %v3465_v23 = vpop.permute.xlu1 %1184  ;;  %v3467_v9 = vpop.permute.xlu0 %724 }
 0x1a3   :  { %7012 = vst [vmem:[#allocation90_spill] sm:$0xff] %v3465_v23  ;;  %7013 = vst [vmem:[#allocation91_spill] sm:$0xff] %v3467_v9 }
 0x1a4   :  { %1188 = vrot.lane.b32.xlu1 %v3105_v5, %s2895_s14  ;;  %1186 = vrot.lane.b32.xlu0 %v3065_v53, %s2895_s14 }
 0x1a6   :  { %v3473_v61 = vpop.permute.xlu1 %463  ;;  %v3475_v18 = vpop.permute.xlu0 %943 }
 0x1a7   :  { %7014 = vst [vmem:[#allocation92_spill] sm:$0xff] %v3473_v61  ;;  %7015 = vst [vmem:[#allocation93_spill] sm:$0xff] %v3475_v18 }
 0x1a8   :  { %1192 = vrot.lane.b32.xlu1 %v3201_v58, %s2895_s14  ;;  %1190 = vrot.lane.b32.xlu0 %v3145_v25, %s2895_s14 }
 0x1aa   :  { %v3481_v39 = vpop.permute.xlu1 %479  ;;  %v3483_v23 = vpop.permute.xlu0 %959 }
 0x1ab   :  { %7016 = vst [vmem:[#allocation94_spill] sm:$0xff] %v3481_v39  ;;  %7017 = vst [vmem:[#allocation95_spill] sm:$0xff] %v3483_v23 }
 0x1ac   :  { %1196 = vrot.lane.b32.xlu1 %v3085_v62, %s2895_s14  ;;  %1194 = vrot.lane.b32.xlu0 %v3056_v48, %s2895_s14 }
 0x1ae   :  { %v3489_v9 = vpop.permute.xlu1 %710  ;;  %v3491_v61 = vpop.permute.xlu0 %951 }
 0x1af   :  { %7018 = vst [vmem:[#allocation96_spill] sm:$0xff] %v3489_v9  ;;  %7019 = vst [vmem:[#allocation97_spill] sm:$0xff] %v3491_v61 }
 0x1b0   :  { %1200 = vrot.lane.b32.xlu1 %v3169_v40, %s2895_s14  ;;  %1198 = vrot.lane.b32.xlu0 %v3137_v21, %s2895_s14 }
 0x1b2   :  { %v3497_v18 = vpop.permute.xlu1 %726  ;;  %v3499_v39 = vpop.permute.xlu0 %967 }
 0x1b3   :  { %7020 = vst [vmem:[#allocation98_spill] sm:$0xff] %v3497_v18  ;;  %7021 = vst [vmem:[#allocation99_spill] sm:$0xff] %v3499_v39 }
 0x1b4   :  { %1204 = vrot.lane.b32.xlu1 %v3111_v7, %s2895_s14  ;;  %1202 = vrot.lane.b32.xlu0 %v3072_v57, %s2895_s14 }
 0x1b6   :  { %v3505_v23 = vpop.permute.xlu1 %969  ;;  %v3507_v9 = vpop.permute.xlu0 %481 }
 0x1b7   :  { %7022 = vst [vmem:[#allocation100_spill] sm:$0xff] %v3505_v23  ;;  %7023 = vst [vmem:[#allocation101_spill] sm:$0xff] %v3507_v9 }
 0x1b8   :  { %1208 = vrot.lane.b32.xlu1 %v3207_v59, %s2895_s14  ;;  %1206 = vrot.lane.b32.xlu0 %v3152_v28, %s2895_s14 }
 0x1ba   :  { %v3513_v61 = vpop.permute.xlu1 %985  ;;  %v3515_v18 = vpop.permute.xlu0 %497 }
 0x1bb   :  { %7024 = vst [vmem:[#allocation102_spill] sm:$0xff] %v3513_v61  ;;  %7025 = vst [vmem:[#allocation103_spill] sm:$0xff] %v3515_v18 }
 0x1bc   :  { %1212 = vrot.lane.b32.xlu1 %v3271_v56, %s2895_s14  ;;  %1210 = vrot.lane.b32.xlu0 %v3231_v12, %s2895_s14 }
 0x1be   :  { %v3521_v39 = vpop.permute.xlu1 %977  ;;  %v3523_v23 = vpop.permute.xlu0 %728 }
 0x1bf   :  { %7026 = vst [vmem:[#allocation104_spill] sm:$0xff] %v3521_v39  ;;  %7027 = vst [vmem:[#allocation105_spill] sm:$0xff] %v3523_v23 }
 0x1c0   :  { %1216 = vrot.lane.b32.xlu1 %v3391_v24, %s2895_s14  ;;  %1214 = vrot.lane.b32.xlu0 %v3347_v46, %s2895_s14 }
 0x1c2   :  { %v3529_v9 = vpop.permute.xlu1 %993  ;;  %v3531_v61 = vpop.permute.xlu0 %744 }
 0x1c3   :  { %7028 = vst [vmem:[#allocation106_spill] sm:$0xff] %v3529_v9  ;;  %7029 = vst [vmem:[#allocation107_spill] sm:$0xff] %v3531_v61 }
 0x1c4   :  { %1220 = vrot.lane.b32.xlu1 %v3309_v49, %s2895_s14  ;;  %1218 = vrot.lane.b32.xlu0 %v3253_v29, %s2895_s14  ;;  %v6620_v49 = vmov 5  }
 0x1c6   :  { %v3537_v18 = vpop.permute.xlu1 %483  ;;  %v3539_v39 = vpop.permute.xlu0 %489 }
 0x1c7   :  { %7030 = vst [vmem:[#allocation108_spill] sm:$0xff] %v3537_v18  ;;  %7031 = vst [vmem:[#allocation109_spill] sm:$0xff] %v3539_v39 }
 0x1c8   :  { %1224 = vrot.lane.b32.xlu1 %v3429_v20, %s2895_s14  ;;  %1222 = vrot.lane.b32.xlu0 %v3369_v36, %s2895_s14 }
 0x1ca   :  { %v3545_v23 = vpop.permute.xlu1 %499  ;;  %v3547_v26 = vpop.permute.xlu0 %505 }
 0x1cb   :  { %7032 = vst [vmem:[#allocation110_spill] sm:$0xff] %v3545_v23  ;;  %7033 = vst [vmem:[#allocation111_spill] sm:$0xff] %v3547_v26 }
 0x1cc   :  { %1228 = vrot.lane.b32.xlu1 %v3281_v8, %s2895_s14  ;;  %1226 = vrot.lane.b32.xlu0 %v3242_v19, %s2895_s14 }
 0x1ce   :  { %v3553_v61 = vpop.permute.xlu1 %730  ;;  %v3555_v18 = vpop.permute.xlu0 %736 }
 0x1cf   :  { %7034 = vst [vmem:[#allocation112_spill] sm:$0xff] %v3553_v61  ;;  %7035 = vst [vmem:[#allocation113_spill] sm:$0xff] %v3555_v18 }
 0x1d0   :  { %1232 = vrot.lane.b32.xlu1 %v3401_v16, %s2895_s14  ;;  %1230 = vrot.lane.b32.xlu0 %v3358_v13, %s2895_s14 }
 0x1d2   :  { %v3561_v39 = vpop.permute.xlu1 %746  ;;  %v3563_v23 = vpop.permute.xlu0 %752 }
 0x1d3   :  { %7036 = vst [vmem:[#allocation114_spill] sm:$0xff] %v3561_v39  ;;  %7037 = vst [vmem:[#allocation115_spill] sm:$0xff] %v3563_v23 }
 0x1d4   :  { %1236 = vrot.lane.b32.xlu1 %v3319_v52, %s2895_s14  ;;  %1234 = vrot.lane.b32.xlu0 %v3260_v37, %s2895_s14  ;;  %v2897_v52 = vmov 4  }
 0x1d6   :  { %v3569_v19 = vpop.permute.xlu1 %491  ;;  %v3571_v61 = vpop.permute.xlu0 %971 }
 0x1d7   :  { %7038 = vst [vmem:[#allocation116_spill] sm:$0xff] %v3569_v19  ;;  %7039 = vst [vmem:[#allocation117_spill] sm:$0xff] %v3571_v61 }
 0x1d8   :  { %1240 = vrot.lane.b32.xlu1 %v3439_v22, %s2895_s14  ;;  %1238 = vrot.lane.b32.xlu0 %v3380_v63, %s2895_s14  ;;  %v6643_v22 = vmov 6  }
 0x1da   :  { %v3577_v18 = vpop.permute.xlu1 %507  ;;  %v3579_v39 = vpop.permute.xlu0 %987 }
 0x1db   :  { %7040 = vst [vmem:[#allocation118_spill] sm:$0xff] %v3577_v18  ;;  %7041 = vst [vmem:[#allocation119_spill] sm:$0xff] %v3579_v39 }
 0x1dc   :  { %1344 = vperm.xlu1 %2801, %v3013_v32   ;;  %1340 = vperm.xlu0 %2800, %v3008_v31  }
 0x1de   :  { %v3583_v29 = vpop.permute.xlu1 %738  ;;  %v3585_v37 = vpop.permute.xlu0 %979 }
 0x1df   :  { %7042 = vst [vmem:[#allocation120_spill] sm:$0xff] %v3583_v29  ;;  %7043 = vst [vmem:[#allocation121_spill] sm:$0xff] %v3585_v37 }
 0x1e0   :  { %1348 = vperm.xlu1 %2801, %v3020_v33   ;;  %1352 = vperm.xlu0 %2800, %v3028_v34  }
 0x1e2   :  { %v3589_v61 = vpop.permute.xlu1 %754  ;;  %v3591_v19 = vpop.permute.xlu0 %995 }
 0x1e3   :  { %7044 = vst [vmem:[#allocation122_spill] sm:$0xff] %v3589_v61  ;;  %7045 = vst [vmem:[#allocation123_spill] sm:$0xff] %v3591_v19 }
 0x1e4   :  { %2802 = vset.pattern.permute.xlu1 %v2897_v52  ;;  %2803 = vset.pattern.permute.xlu0 %v2897_v52 }
 0x1e5   :  { %1420 = vperm.xlu1 %2802, %v3008_v31   ;;  %1424 = vperm.xlu0 %2803, %v3013_v32  }
 0x1e6   :  { %v3595_v39 = vpop.permute.xlu1 %973  ;;  %v3597_v29 = vpop.permute.xlu0 %485 }
 0x1e7   :  { %7046 = vst [vmem:[#allocation124_spill] sm:$0xff] %v3595_v39  ;;  %7047 = vst [vmem:[#allocation125_spill] sm:$0xff] %v3597_v29 }
 0x1e9   :  { %1428 = vperm.xlu1 %2802, %v3020_v33   ;;  %1499 = vrot.lane.b32.xlu0 %v3049_v44, %s2898_s15 }
 0x1ea   :  { %v3602_v37 = vpop.permute.xlu1 %989  ;;  %v3604_v8 = vpop.permute.xlu0 %501  ;;  %2805 = vset.pattern.permute.xlu0 %v6620_v49 }
 0x1eb   :  { %7048 = vst [vmem:[#allocation126_spill] sm:$0xff] %v3602_v37  ;;  %7049 = vst [vmem:[#allocation127_spill] sm:$0xff] %v3604_v8 }
 0x1ed   :  { %1432 = vperm.xlu1 %2802, %v3028_v34   ;;  %1503 = vrot.lane.b32.xlu0 %v3125_v14, %s2898_s15 }
 0x1ee   :  { %v3610_v52 = vpop.permute.xlu1 %981  ;;  %v3612_v39 = vpop.permute.xlu0 %732 }
 0x1ef   :  { %7050 = vst [vmem:[#allocation128_spill] sm:$0xff] %v3610_v52  ;;  %7051 = vst [vmem:[#allocation129_spill] sm:$0xff] %v3612_v39 }
 0x1f1   :  { %1501 = vrot.lane.b32.xlu1 %v3079_v60, %s2898_s15  ;;  %1507 = vrot.lane.b32.xlu0 %v3065_v53, %s2898_s15 }
 0x1f2   :  { %v3618_v37 = vpop.permute.xlu1 %997  ;;  %2804 = vset.pattern.permute.xlu1 %v6620_v49  ;;  %v3621_v8 = vpop.permute.xlu0 %748 }
 0x1f3   :  { %7052 = vst [vmem:[#allocation130_spill] sm:$0xff] %v3618_v37  ;;  %7053 = vst [vmem:[#allocation131_spill] sm:$0xff] %v3621_v8 }
 0x1f5   :  { %1505 = vrot.lane.b32.xlu1 %v3161_v38, %s2898_s15  ;;  %1511 = vrot.lane.b32.xlu0 %v3145_v25, %s2898_s15 }
 0x1f6   :  { %v3627_v52 = vpop.permute.xlu1 %487  ;;  %v3629_v39 = vpop.permute.xlu0 %493 }
 0x1f7   :  { %7054 = vst [vmem:[#allocation132_spill] sm:$0xff] %v3627_v52  ;;  %7055 = vst [vmem:[#allocation133_spill] sm:$0xff] %v3629_v39 }
 0x1f9   :  { %1509 = vrot.lane.b32.xlu1 %v3105_v5, %s2898_s15  ;;  %1515 = vrot.lane.b32.xlu0 %v3056_v48, %s2898_s15 }
 0x1fa   :  { %v3635_v37 = vpop.permute.xlu1 %503  ;;  %v3637_v49 = vpop.permute.xlu0 %509 }
 0x1fb   :  { %7056 = vst [vmem:[#allocation134_spill] sm:$0xff] %v3635_v37  ;;  %7057 = vst [vmem:[#allocation135_spill] sm:$0xff] %v3637_v49 }
 0x1fd   :  { %1513 = vrot.lane.b32.xlu1 %v3201_v58, %s2898_s15  ;;  %1519 = vrot.lane.b32.xlu0 %v3137_v21, %s2898_s15 }
 0x1fe   :  { %v3643_v8 = vpop.permute.xlu1 %734  ;;  %v3645_v52 = vpop.permute.xlu0 %740 }
 0x1ff   :  { %7058 = vst [vmem:[#allocation136_spill] sm:$0xff] %v3643_v8  ;;  %7059 = vst [vmem:[#allocation137_spill] sm:$0xff] %v3645_v52  ;;  %v513_v52 = vlaneseq }
 0x201   :  { %1517 = vrot.lane.b32.xlu1 %v3085_v62, %s2898_s15  ;;  %1523 = vrot.lane.b32.xlu0 %v3072_v57, %s2898_s15 }
 0x202   :  { %v3651_v39 = vpop.permute.xlu1 %750  ;;  %v3653_v37 = vpop.permute.xlu0 %756 }
 0x203   :  { %7060 = vst [vmem:[#allocation138_spill] sm:$0xff] %v3651_v39  ;;  %7061 = vst [vmem:[#allocation139_spill] sm:$0xff] %v3653_v37  ;;  %v3671_v37 = vshrl.u32 %v513_v52, 7 }
 0x205   :  { %1521 = vrot.lane.b32.xlu1 %v3169_v40, %s2898_s15  ;;  %1527 = vrot.lane.b32.xlu0 %v3152_v28, %s2898_s15  ;;  %7066 = vst [vmem:[#allocation144_spill] sm:$0xff] %v3671_v37  ;;  %v3681_v16 = vsub.s32 3, %v3671_v37 }
 0x206   :  { %v3659_v49 = vpop.permute.xlu1 %495  ;;  %v3661_v8 = vpop.permute.xlu0 %975 }
 0x207   :  { %7062 = vst [vmem:[#allocation140_spill] sm:$0xff] %v3659_v49  ;;  %7063 = vst [vmem:[#allocation141_spill] sm:$0xff] %v3661_v8 }
 0x209   :  { %1525 = vrot.lane.b32.xlu1 %v3111_v7, %s2898_s15  ;;  %1673 = vperm.xlu0 %2805, %v3028_v34  }
 0x20a   :  { %v3666_v29 = vpop.permute.xlu1 %511  ;;  %v3668_v39 = vpop.permute.xlu0 %991 }
 0x20b   :  { %7064 = vst [vmem:[#allocation142_spill] sm:$0xff] %v3666_v29  ;;  %7065 = vst [vmem:[#allocation143_spill] sm:$0xff] %v3668_v39  ;;  %v3685_v39 = vand.u32 127, %v513_v52 }
 0x20d   :  { %1669 = vperm.xlu1 %2804, %v3020_v33   ;;  %1537 = vrot.lane.b32.xlu0 %v3391_v24, %s2898_s15  ;;  %vm1242_vm2 = vcmp.lt.s32.totalorder %v3685_v39, 1  ;;  %vm515_vm3 = vcmp.lt.s32.totalorder %v3685_v39, 17  ;;  %vm760_vm4 = vcmp.lt.s32.totalorder %v3685_v39, 16  ;;  %vm1001_vm5 = vcmp.lt.s32.totalorder %v3685_v39, 15 }
 0x20e   :  { %v3675_v49 = vpop.permute.xlu1 %742  ;;  %v3677_v8 = vpop.permute.xlu0 %983  ;;  %2807 = vset.pattern.permute.xlu0 %v6643_v22  ;;  %vm1563_vm6 = vcmp.lt.s32.totalorder %v3685_v39, 127  ;;  %vm1804_vm7 = vcmp.lt.s32.totalorder %v3685_v39, 113  ;;  %vm2045_vm8 = vcmp.lt.s32.totalorder %v3685_v39, 112  ;;  %vm2286_vm9 = vcmp.lt.s32.totalorder %v3685_v39, 111 }
 0x20f   :  { %7067 = vst [vmem:[#allocation145_spill] sm:$0xff] %v3675_v49  ;;  %7068 = vst [vmem:[#allocation146_spill] sm:$0xff] %v3677_v8  ;;  %v3694_v8 = vld [vmem:[%s6528_s1 + $0x8] sm:$0xff] }
 0x210   :  { %7070 = vst [vmem:[#allocation148_spill] sm:$0xff] %v3694_v8  ;;  %v3701_v20 = vrot.slane %v3694_v8, %v3681_v16 }
 0x211   :  { %1529 = vrot.lane.b32.xlu1 %v3207_v59, %s2898_s15  ;;  %1914 = vperm.xlu0 %2807, %v3028_v34  }
 0x212   :  { %v3688_v29 = vpop.permute.xlu1 %758  ;;  %2806 = vset.pattern.permute.xlu1 %v6643_v22  ;;  %v3696_v49 = vpop.permute.xlu0 %999  ;;  %7072 = vst [vmem:[#allocation150_spill] sm:$0xff] %v3701_v20 }
 0x213   :  { %7069 = vst [vmem:[#allocation147_spill] sm:$0xff] %v3688_v29  ;;  %7071 = vst [vmem:[#allocation149_spill] sm:$0xff] %v3696_v49 }
 0x215   :  { %1535 = vrot.lane.b32.xlu1 %v3347_v46, %s2898_s15  ;;  %1752 = vrot.lane.b32.xlu0 %v3145_v25, %s2901_s18 }
 0x216   :  { %v1189_v34 = vpop.permute.xlu1 %1188  ;;  %v1187_v22 = vpop.permute.xlu0 %1186 }
 0x217   :  { %v1268_v52 = vsel %vm1242_vm2, %v3339_v47, %v1189_v34  ;;  %v1267_v29 = vsel %vm1242_vm2, %v3303_v45, %v1187_v22 }
 0x218   :  { %v3711_v49 = vmul.f32 %v3701_v20, %v1268_v52  ;;  %v3717_v60 = vmul.f32 %v3701_v20, %v1267_v29  ;;  %v7079_v29 = vmov 5  }
 0x219   :  { %1910 = vperm.xlu1 %2806, %v3020_v33   ;;  %1760 = vrot.lane.b32.xlu0 %v3137_v21, %s2901_s18 }
 0x21a   :  { %7073 = vst [vmem:[#allocation151_spill] sm:$0xff] %v3711_v49  ;;  %7074 = vst [vmem:[#allocation152_spill] sm:$0xff] %v3717_v60  ;;  %v3722_v2 = vpop.permute.xlu1 %1192  ;;  %v3729_v52 = vpop.permute.xlu0 %1190  ;;  %v3733_v49 = vrot.slane %v3727_v1, %v3681_v16 }
 0x21b   :  { %7075 = vst [vmem:[#allocation153_spill] sm:$0xff] %v3722_v2  ;;  %7077 = vst [vmem:[#allocation155_spill] sm:$0xff] %v3729_v52 }
 0x21c   :  { %7078 = vst [vmem:[#allocation156_spill] sm:$0xff] %v3733_v49 }
 0x21d   :  { %2808 = vset.pattern.permute.xlu1 %v7079_v29  ;;  %1768 = vrot.lane.b32.xlu0 %v3152_v28, %s2901_s18 }
 0x21e   :  { %1661 = vperm.xlu1 %2808, %v3008_v31   ;;  %v1197_v33 = vpop.permute.xlu1 %1196  ;;  %v1195_v2 = vpop.permute.xlu0 %1194 }
 0x21f   :  { %v1264_v20 = vsel %vm1242_vm2, %v1189_v34, %v1197_v33  ;;  %v1263_v52 = vsel %vm1242_vm2, %v1187_v22, %v1195_v2  ;;  %v3757_v34 = vld [vmem:[%s6528_s1 + $0x18] sm:$0xff] }
 0x220   :  { %v3742_v60 = vmul.f32 %v3733_v49, %v1264_v20  ;;  %v3747_v17 = vmul.f32 %v3733_v49, %v1263_v52  ;;  %7083 = vst [vmem:[#allocation160_spill] sm:$0xff] %v3757_v34  ;;  %v3763_v22 = vrot.slane %v3757_v34, %v3681_v16 }
 0x221   :  { %1776 = vrot.lane.b32.xlu0 %v3347_v46, %s2901_s18 }
 0x222   :  { %7080 = vst [vmem:[#allocation157_spill] sm:$0xff] %v3742_v60  ;;  %7081 = vst [vmem:[#allocation158_spill] sm:$0xff] %v3747_v17  ;;  %1665 = vperm.xlu1 %2808, %v3013_v32   ;;  %v3752_v31 = vpop.permute.xlu1 %1200  ;;  %v3759_v20 = vpop.permute.xlu0 %1198 }
 0x223   :  { %7082 = vst [vmem:[#allocation159_spill] sm:$0xff] %v3752_v31  ;;  %7084 = vst [vmem:[#allocation161_spill] sm:$0xff] %v3759_v20  ;;  %v6659_v31 = vmov 7  }
 0x224   :  { %7085 = vst [vmem:[#allocation162_spill] sm:$0xff] %v3763_v22 }
 0x225   :  { %1746 = vrot.lane.b32.xlu0 %v3161_v38, %s2901_s18 }
 0x226   :  { %1754 = vrot.lane.b32.xlu1 %v3201_v58, %s2901_s18  ;;  %v1205_v52 = vpop.permute.xlu1 %1204  ;;  %v1203_v49 = vpop.permute.xlu0 %1202 }
 0x227   :  { %v1260_v29 = vsel %vm1242_vm2, %v1197_v33, %v1205_v52  ;;  %2809 = vset.pattern.permute.xlu1 %v6659_v31  ;;  %v1259_v60 = vsel %vm1242_vm2, %v1195_v2, %v1203_v49  ;;  %v3789_v31 = vld [vmem:[%s6528_s1 + $0x20] sm:$0xff] }
 0x228   :  { %v3773_v20 = vmul.f32 %v3763_v22, %v1260_v29  ;;  %v3778_v17 = vmul.f32 %v3763_v22, %v1259_v60  ;;  %7089 = vst [vmem:[#allocation166_spill] sm:$0xff] %v3789_v31  ;;  %v1294_v2 = vrot.slane %v3789_v31, %v3681_v16  ;;  %v3812_v31 = vld [vmem:[%s6528_s1 + $0x28] sm:$0xff] }
 0x229   :  { %1533 = vrot.lane.b32.xlu0 %v3271_v56, %s2898_s15  ;;  %7094 = vst [vmem:[#allocation170_spill] sm:$0xff] %v3812_v31 }
 0x22a   :  { %7086 = vst [vmem:[#allocation163_spill] sm:$0xff] %v3773_v20  ;;  %7087 = vst [vmem:[#allocation164_spill] sm:$0xff] %v3778_v17  ;;  %1762 = vrot.lane.b32.xlu1 %v3169_v40, %s2901_s18  ;;  %v3784_v33 = vpop.permute.xlu1 %1208  ;;  %v3791_v29 = vpop.permute.xlu0 %1206 }
 0x22b   :  { %7088 = vst [vmem:[#allocation165_spill] sm:$0xff] %v3784_v33  ;;  %7090 = vst [vmem:[#allocation167_spill] sm:$0xff] %v3791_v29 }
 0x22d   :  { %1906 = vperm.xlu0 %2807, %v3013_v32  }
 0x22e   :  { %1770 = vrot.lane.b32.xlu1 %v3207_v59, %s2901_s18  ;;  %v1213_v60 = vpop.permute.xlu1 %1212  ;;  %v1211_v17 = vpop.permute.xlu0 %1210 }
 0x22f   :  { %v1256_v22 = vsel %vm1242_vm2, %v1205_v52, %v1213_v60  ;;  %v1255_v63 = vsel %vm1242_vm2, %v1203_v49, %v1211_v17  ;;  %v3820_v49 = vld [vmem:[%s6531_s4 + $0x10] sm:$0xff] }
 0x230   :  { %v3800_v20 = vmul.f32 %v1294_v2, %v1256_v22  ;;  %v3804_v13 = vmul.f32 %v1294_v2, %v1255_v63 }
 0x231   :  { %2811 = vset.pattern.permute.xlu0 %v7093_v10 }
 0x232   :  { %7091 = vst [vmem:[#allocation168_spill] sm:$0xff] %v3800_v20  ;;  %7092 = vst [vmem:[#allocation169_spill] sm:$0xff] %v3804_v13  ;;  %1778 = vrot.lane.b32.xlu1 %v3391_v24, %s2901_s18  ;;  %v1217_v32 = vpop.permute.xlu1 %1216  ;;  %2151 = vperm.xlu0 %2811, %v3820_v49   ;;  %v1215_v63 = vpop.permute.xlu0 %1214  ;;  %v1298_v20 = vrot.slane %v3812_v31, %v3681_v16 }
 0x233   :  { %v1258_v22 = vsel %vm1242_vm2, %v3784_v33, %v1217_v32  ;;  %v1257_v13 = vsel %vm1242_vm2, %v3791_v29, %v1215_v63  ;;  %v3835_v33 = vld [vmem:[%s6531_s4 + $0x18] sm:$0xff] }
 0x234   :  { %v3823_v52 = vmul.f32 %v1294_v2, %v1258_v22  ;;  %v3830_v0 = vmul.f32 %v1294_v2, %v1257_v13 }
 0x236   :  { %7095 = vst [vmem:[#allocation171_spill] sm:$0xff] %v3823_v52  ;;  %7096 = vst [vmem:[#allocation172_spill] sm:$0xff] %v3830_v0  ;;  %2155 = vperm.xlu1 %2809, %v3835_v33   ;;  %v1221_v3 = vpop.permute.xlu1 %1220  ;;  %2001 = vrot.lane.b32.xlu0 %v3137_v21, %s2903_s29  ;;  %v1219_v52 = vpop.permute.xlu0 %1218 }
 0x237   :  { %v1252_v22 = vsel %vm1242_vm2, %v1213_v60, %v1221_v3  ;;  %v1251_v13 = vsel %vm1242_vm2, %v1211_v17, %v1219_v52  ;;  %v3853_v60 = vld [vmem:[%s6528_s1 + $0x30] sm:$0xff] }
 0x238   :  { %v3842_v29 = vmul.f32 %v1298_v20, %v1252_v22  ;;  %v3846_v2 = vmul.f32 %v1298_v20, %v1251_v13  ;;  %7099 = vst [vmem:[#allocation175_spill] sm:$0xff] %v3853_v60 }
 0x23a   :  { %7097 = vst [vmem:[#allocation173_spill] sm:$0xff] %v3842_v29  ;;  %7098 = vst [vmem:[#allocation174_spill] sm:$0xff] %v3846_v2  ;;  %1744 = vrot.lane.b32.xlu1 %v3125_v14, %s2901_s18  ;;  %v1225_v0 = vpop.permute.xlu1 %1224  ;;  %2009 = vrot.lane.b32.xlu0 %v3152_v28, %s2903_s29  ;;  %v1223_v22 = vpop.permute.xlu0 %1222  ;;  %v7100_v29 = vmov 6   ;;  %v1302_v2 = vrot.slane %v3853_v60, %v3681_v16 }
 0x23b   :  { %v1254_v31 = vsel %vm1242_vm2, %v1217_v32, %v1225_v0  ;;  %2810 = vset.pattern.permute.xlu1 %v7100_v29  ;;  %v1253_v13 = vsel %vm1242_vm2, %v1215_v63, %v1223_v22 }
 0x23c   :  { %v3860_v17 = vmul.f32 %v1298_v20, %v1254_v31  ;;  %v3866_v36 = vmul.f32 %v1298_v20, %v1253_v13  ;;  %v3883_v20 = vld [vmem:[%s6528_s1] sm:$0xff] }
 0x23e   :  { %7101 = vst [vmem:[#allocation176_spill] sm:$0xff] %v3860_v17  ;;  %7102 = vst [vmem:[#allocation177_spill] sm:$0xff] %v3866_v36  ;;  %1531 = vrot.lane.b32.xlu1 %v3231_v12, %s2898_s15  ;;  %v1229_v32 = vpop.permute.xlu1 %1228  ;;  %2017 = vrot.lane.b32.xlu0 %v3347_v46, %s2903_s29  ;;  %v1227_v31 = vpop.permute.xlu0 %1226 }
 0x23f   :  { %v1248_v34 = vsel %vm1242_vm2, %v1221_v3, %v1229_v32  ;;  %v1247_v63 = vsel %vm1242_vm2, %v1219_v52, %v1227_v31  ;;  %v3888_v3 = vld [vmem:[%s6531_s4] sm:$0xff]  ;;  %v3897_v52 = vld [vmem:[%s6528_s1 + $0x38] sm:$0xff] }
 0x240   :  { %v3874_v29 = vmul.f32 %v1302_v2, %v1248_v34  ;;  %v3878_v17 = vmul.f32 %v1302_v2, %v1247_v63  ;;  %v3892_v34 = vsub.s32 0, %v3671_v37  ;;  %7105 = vst [vmem:[#allocation180_spill] sm:$0xff] %v3897_v52  ;;  %v1306_v1 = vrot.slane %v3897_v52, %v3681_v16 }
 0x242   :  { %7103 = vst [vmem:[#allocation178_spill] sm:$0xff] %v3874_v29  ;;  %7104 = vst [vmem:[#allocation179_spill] sm:$0xff] %v3878_v17  ;;  %1902 = vperm.xlu1 %2810, %v3888_v3   ;;  %v1233_v13 = vpop.permute.xlu1 %1232  ;;  %1987 = vrot.lane.b32.xlu0 %v3161_v38, %s2903_s29  ;;  %v1231_v17 = vpop.permute.xlu0 %1230  ;;  %v3905_v29 = vrot.slane %v3883_v20, %v3681_v16  ;;  %v3921_v38 = vrot.slane %v3883_v20, %v3892_v34 }
 0x243   :  { %v1250_v63 = vsel %vm1242_vm2, %v1225_v0, %v1233_v13  ;;  %v1249_v60 = vsel %vm1242_vm2, %v1223_v22, %v1231_v17  ;;  %v3917_v0 = vsub.s32 1, %v3671_v37 }
 0x244   :  { %7106 = vst [vmem:[#allocation181_spill] sm:$0xff] %v3905_v29  ;;  %v3907_v36 = vmul.f32 %v1302_v2, %v1250_v63  ;;  %v3914_v8 = vmul.f32 %v1302_v2, %v1249_v60  ;;  %7109 = vst [vmem:[#allocation184_spill] sm:$0xff] %v3921_v38  ;;  %v544_v63 = vsel %vm515_vm3, %v3547_v26, %v3265_v51 }
 0x245   :  { %v545_v2 = vsel %vm515_vm3, %v3577_v18, %v3301_v43 }
 0x246   :  { %7107 = vst [vmem:[#allocation182_spill] sm:$0xff] %v3907_v36  ;;  %7108 = vst [vmem:[#allocation183_spill] sm:$0xff] %v3914_v8  ;;  %1993 = vrot.lane.b32.xlu1 %v3145_v25, %s2903_s29  ;;  %v1237_v16 = vpop.permute.xlu1 %1236  ;;  %1750 = vrot.lane.b32.xlu0 %v3105_v5, %s2901_s18  ;;  %v1235_v26 = vpop.permute.xlu0 %1234  ;;  %v6692_v36 = vmov 8   ;;  %v7176_v5 = vld [vmem:[#allocation65_spill] sm:$0xff] }
 0x247   :  { %v1244_v60 = vsel %vm1242_vm2, %v1229_v32, %v1237_v16  ;;  %v1272_v22 = vsel %vm1242_vm2, %v1237_v16, %v3339_v47  ;;  %2812 = vset.pattern.permute.xlu1 %v6692_v36  ;;  %v1243_v18 = vsel %vm1242_vm2, %v1227_v31, %v1235_v26  ;;  %v1271_v32 = vsel %vm1242_vm2, %v1235_v26, %v3303_v45 }
 0x248   :  { %v1315_v8 = vmul.f32 %v3905_v29, %v1272_v22  ;;  %v3943_v52 = vmul.f32 %v1306_v1, %v1244_v60  ;;  %v3952_v47 = vrot.slane %v3883_v20, %v3917_v0  ;;  %v790_v16 = vsel %vm760_vm4, %v3589_v61, %v3321_v15 }
 0x249   :  { %v1307_v22 = vmul.f32 %v3905_v29, %v1271_v32  ;;  %v3959_v60 = vmul.f32 %v1306_v1, %v1243_v18  ;;  %v789_v31 = vsel %vm760_vm4, %v3563_v23, %v3285_v11  ;;  %v588_v26 = vmul.f32 %v3921_v38, %v545_v2 }
 0x24a   :  { %7110 = vst [vmem:[#allocation185_spill] sm:$0xff] %v3943_v52  ;;  %7111 = vst [vmem:[#allocation186_spill] sm:$0xff] %v3952_v47  ;;  %1995 = vrot.lane.b32.xlu1 %v3201_v58, %s2903_s29  ;;  %v3968_v45 = vpop.permute.xlu1 %1240  ;;  %v580_v36 = vmul.f32 %v3921_v38, %v544_v63  ;;  %1758 = vrot.lane.b32.xlu0 %v3085_v62, %s2901_s18  ;;  %v3976_v18 = vpop.permute.xlu0 %1238  ;;  %v3985_v61 = vsub.s32 2, %v3671_v37  ;;  %v825_v63 = vmul.f32 %v3952_v47, %v789_v31 }
 0x24b   :  { %7112 = vst [vmem:[#allocation187_spill] sm:$0xff] %v3959_v60  ;;  %7113 = vst [vmem:[#allocation188_spill] sm:$0xff] %v3968_v45  ;;  %v1246_v32 = vsel %vm1242_vm2, %v1233_v13, %v3968_v45  ;;  %v833_v60 = vmul.f32 %v3952_v47, %v790_v16  ;;  %v1245_v2 = vsel %vm1242_vm2, %v1231_v17, %v3976_v18  ;;  %v7142_v47 = vld [vmem:[#allocation46_spill] sm:$0xff] }
 0x24c   :  { %7114 = vst [vmem:[#allocation189_spill] sm:$0xff] %v3976_v18  ;;  %v3979_v52 = vmul.f32 %v1306_v1, %v1246_v32  ;;  %v3988_v23 = vmul.f32 %v1306_v1, %v1245_v2  ;;  %v640_v13 = vmul.f32 %v3177_v42, %v588_v26  ;;  %v3996_v16 = vrot.slane %v3883_v20, %v3985_v61 }
 0x24d   :  { %v632_v17 = vmul.f32 %v3199_v55, %v580_v36  ;;  %v1031_v31 = vsel %vm1001_vm5, %v3591_v19, %v3352_v30  ;;  %v1030_v1 = vsel %vm1001_vm5, %v3529_v9, %v3263_v50  ;;  %v881_v26 = vmul.f32 %v3197_v54, %v833_v60 }
 0x24e   :  { %7115 = vst [vmem:[#allocation190_spill] sm:$0xff] %v3979_v52  ;;  %7116 = vst [vmem:[#allocation191_spill] sm:$0xff] %v3988_v23  ;;  %2003 = vrot.lane.b32.xlu1 %v3169_v40, %s2903_s29  ;;  %1766 = vrot.lane.b32.xlu0 %v3111_v7, %s2901_s18  ;;  %v873_v32 = vmul.f32 %v3224_v6, %v825_v63  ;;  %v672_v2 = vadd.f32 %v640_v13, %v3155_v35  ;;  %v4026_v13 = vld [vmem:[%s6531_s4 + $0x8] sm:$0xff]  ;;  %s2905_s4 = smov 111  }
 0x24f   :  { %7117 = vst [vmem:[#allocation192_spill] sm:$0xff] %v3996_v16  ;;  %v1074_v36 = vmul.f32 %v3996_v16, %v1031_v31  ;;  %v1066_v19 = vmul.f32 %v3996_v16, %v1030_v1  ;;  %v664_v52 = vadd.f32 %v632_v17, %v3175_v41  ;;  %7118 = vst [vmem:[#allocation193_spill] sm:$0xff] %v4026_v13 }
 0x250   :  { %v913_v23 = vadd.f32 %v881_v26, %v672_v2  ;;  %v7122_v2 = vmov 8  }
 0x251   :  { %v905_v9 = vadd.f32 %v873_v32, %v664_v52  ;;  %v1122_v60 = vmul.f32 %v3251_v27, %v1074_v36  ;;  %v1114_v63 = vmul.f32 %v3222_v4, %v1066_v19 }
 0x252   :  { %2011 = vrot.lane.b32.xlu1 %v3207_v59, %s2903_s29  ;;  %1774 = vrot.lane.b32.xlu0 %v3271_v56, %s2901_s18 }
 0x253   :  { %v1154_v31 = vadd.f32 %v1122_v60, %v913_v23  ;;  %v1146_v26 = vadd.f32 %v1114_v63, %v905_v9 }
 0x256   :  { %2019 = vrot.lane.b32.xlu1 %v3391_v24, %s2903_s29  ;;  %2147 = vperm.xlu0 %2811, %v4026_v13   ;;  %v7144_v13 = vld [vmem:[#allocation166_spill] sm:$0xff] }
 0x257   :  { %v4029_v17 = vpop.permute.xlu1 %1344  ;;  %v4031_v1 = vpop.permute.xlu0 %1340  ;;  %v4140_v56 = vrot.slane %v7144_v13, %v3985_v61  ;;  %v4144_v7 = vrot.slane %v7144_v13, %v3892_v34 }
 0x258   :  { %7119 = vst [vmem:[#allocation194_spill] sm:$0xff] %v4029_v17  ;;  %7120 = vst [vmem:[#allocation195_spill] sm:$0xff] %v4031_v1  ;;  %v1363_v52 = vmul.f32 %v4029_v17, %v1315_v8  ;;  %v1355_v32 = vmul.f32 %v4031_v1, %v1307_v22 }
 0x259   :  { %7145 = vst [vmem:[#allocation46_spill] sm:$0xff] %v4140_v56 }
 0x25a   :  { %2396 = vperm.xlu1 %2812, %v3835_v33   ;;  %v4036_v19 = vadd.f32 %v1363_v52, %v1154_v31  ;;  %2814 = vset.pattern.permute.xlu0 %v7122_v2  ;;  %v4041_v29 = vadd.f32 %v1355_v32, %v1146_v26  ;;  %v7135_v26 = vld [vmem:[#allocation148_spill] sm:$0xff] }
 0x25b   :  { %v4039_v36 = vpop.permute.xlu1 %1348  ;;  %2392 = vperm.xlu0 %2814, %v3820_v49   ;;  %v4044_v23 = vpop.permute.xlu0 %1352  ;;  %v4090_v32 = vrot.slane %v7135_v26, %v3985_v61 }
 0x25c   :  { %7121 = vst [vmem:[#allocation196_spill] sm:$0xff] %v4036_v19  ;;  %7123 = vst [vmem:[#allocation197_spill] sm:$0xff] %v4039_v36 }
 0x25d   :  { %7124 = vst [vmem:[#allocation198_spill] sm:$0xff] %v4041_v29  ;;  %7125 = vst [vmem:[#allocation199_spill] sm:$0xff] %v4044_v23  ;;  %v4118_v23 = vrot.slane %v7135_v26, %v3917_v0  ;;  %v7149_v29 = vld [vmem:[#allocation175_spill] sm:$0xff] }
 0x25e   :  { %1985 = vrot.lane.b32.xlu1 %v3125_v14, %s2903_s29 }
 0x25f   :  { %2813 = vset.pattern.permute.xlu1 %v7093_v10  ;;  %2242 = vrot.lane.b32.xlu0 %v3137_v21, %s2905_s4 }
 0x260   :  { %v4051_v8 = vpop.permute.xlu1 %1420  ;;  %v4053_v9 = vpop.permute.xlu0 %1424 }
 0x261   :  { %7126 = vst [vmem:[#allocation200_spill] sm:$0xff] %v4051_v8  ;;  %7127 = vst [vmem:[#allocation201_spill] sm:$0xff] %v4053_v9  ;;  %v7163_v9 = vld [vmem:[#allocation55_spill] sm:$0xff] }
 0x262   :  { %1748 = vrot.lane.b32.xlu1 %v3065_v53, %s2901_s18 }
 0x263   :  { %2250 = vrot.lane.b32.xlu0 %v3152_v28, %s2905_s4 }
 0x264   :  { %v4059_v33 = vpop.permute.xlu1 %1428  ;;  %v4061_v49 = vpop.permute.xlu0 %1499 }
 0x265   :  { %7128 = vst [vmem:[#allocation202_spill] sm:$0xff] %v4059_v33  ;;  %7129 = vst [vmem:[#allocation203_spill] sm:$0xff] %v4061_v49 }
 0x266   :  { %1756 = vrot.lane.b32.xlu1 %v3056_v48, %s2901_s18 }
 0x267   :  { %2258 = vrot.lane.b32.xlu0 %v3347_v46, %s2905_s4  ;;  %v7138_v46 = vld [vmem:[#allocation160_spill] sm:$0xff] }
 0x268   :  { %v4067_v10 = vpop.permute.xlu1 %1432  ;;  %v4069_v22 = vpop.permute.xlu0 %1503  ;;  %v4098_v21 = vrot.slane %v7138_v46, %v3985_v61  ;;  %v4114_v28 = vrot.slane %v7138_v46, %v3892_v34  ;;  %v4126_v45 = vrot.slane %v7138_v46, %v3917_v0  ;;  %v7147_v46 = vld [vmem:[#allocation170_spill] sm:$0xff] }
 0x269   :  { %7130 = vst [vmem:[#allocation204_spill] sm:$0xff] %v4067_v10  ;;  %7131 = vst [vmem:[#allocation205_spill] sm:$0xff] %v4069_v22  ;;  %v7136_v22 = vld [vmem:[#allocation154_spill] sm:$0xff]  ;;  %v4150_v19 = vrot.slane %v7147_v46, %v3985_v61 }
 0x26a   :  { %1764 = vrot.lane.b32.xlu1 %v3072_v57, %s2901_s18  ;;  %v4094_v10 = vrot.slane %v7136_v22, %v3985_v61  ;;  %7139 = vst [vmem:[#allocation154_spill] sm:$0xff] %v4098_v21  ;;  %v4122_v36 = vrot.slane %v7136_v22, %v3917_v0 }
 0x26b   :  { %1740 = vrot.lane.b32.xlu0 %v3049_v44, %s2901_s18  ;;  %7148 = vst [vmem:[#allocation166_spill] sm:$0xff] %v4150_v19  ;;  %v7155_v19 = vld [vmem:[#allocation57_spill] sm:$0xff] }
 0x26c   :  { %v4075_v60 = vpop.permute.xlu1 %1501  ;;  %v4077_v63 = vpop.permute.xlu0 %1507  ;;  %7137 = vst [vmem:[#allocation148_spill] sm:$0xff] %v4094_v10 }
 0x26d   :  { %7132 = vst [vmem:[#allocation206_spill] sm:$0xff] %v4075_v60  ;;  %v4154_v60 = vrot.slane %v7149_v29, %v3985_v61 }
 0x26e   :  { %1772 = vrot.lane.b32.xlu1 %v3231_v12, %s2901_s18 }
 0x26f   :  { %2226 = vrot.lane.b32.xlu0 %v3125_v14, %s2905_s4  ;;  %v4102_v14 = vrot.slane %v7135_v26, %v3892_v34  ;;  %7150 = vst [vmem:[#allocation170_spill] sm:$0xff] %v4154_v60  ;;  %v785_v60 = vsel %vm760_vm4, %v3285_v11, %v7155_v19 }
 0x270   :  { %v4083_v31 = vpop.permute.xlu1 %1505  ;;  %v4085_v52 = vpop.permute.xlu0 %1511 }
 0x271   :  { %7133 = vst [vmem:[#allocation207_spill] sm:$0xff] %v4083_v31  ;;  %7134 = vst [vmem:[#allocation208_spill] sm:$0xff] %v4085_v52  ;;  %v4106_v31 = vrot.slane %v7136_v22, %v3892_v34  ;;  %v7140_v52 = vld [vmem:[#allocation64_spill] sm:$0xff] }
 0x272   :  { %2143 = vperm.xlu1 %2813, %v3888_v3  }
 0x273   :  { %1543 = vrot.lane.b32.xlu0 %v7140_v52, %s2898_s15  ;;  %v7143_v52 = vld [vmem:[#allocation53_spill] sm:$0xff] }
 0x274   :  { %v4110_v33 = vpop.permute.xlu1 %1509  ;;  %v4128_v18 = vpop.permute.xlu0 %1515  ;;  %v536_v16 = vsel %vm515_vm3, %v7143_v52, %v7142_v47  ;;  %v540_v38 = vsel %vm515_vm3, %v3265_v51, %v7143_v52  ;;  %7146 = vst [vmem:[#allocation53_spill] sm:$0xff] %v4144_v7  ;;  %v4158_v51 = vrot.slane %v7144_v13, %v3917_v0  ;;  %v7152_v52 = vld [vmem:[#allocation180_spill] sm:$0xff]  ;;  %v4175_v13 = vrot.slane %v7147_v46, %v3892_v34 }
 0x275   :  { %7141 = vst [vmem:[#allocation209_spill] sm:$0xff] %v4110_v33  ;;  %v4162_v56 = vrot.slane %v7152_v52, %v3985_v61  ;;  %v7154_v7 = vld [vmem:[#allocation48_spill] sm:$0xff]  ;;  %v4179_v61 = vrot.slane %v7149_v29, %v3892_v34  ;;  %v7161_v33 = vld [vmem:[#allocation49_spill] sm:$0xff]  ;;  %v582_v62 = vmul.f32 %v4106_v31, %v536_v16 }
 0x276   :  { %2234 = vrot.lane.b32.xlu1 %v3145_v25, %s2905_s4  ;;  %7151 = vst [vmem:[#allocation175_spill] sm:$0xff] %v4158_v51  ;;  %v1026_v25 = vsel %vm1001_vm5, %v3263_v50, %v7154_v7  ;;  %7156 = vst [vmem:[#allocation48_spill] sm:$0xff] %v4175_v13  ;;  %v7160_v51 = vld [vmem:[#allocation45_spill] sm:$0xff]  ;;  %v581_v13 = vmul.f32 %v4102_v14, %v540_v38  ;;  %v4211_v38 = vrot.slane %v7149_v29, %v3917_v0 }
 0x277   :  { %7153 = vst [vmem:[#allocation180_spill] sm:$0xff] %v4162_v56  ;;  %2815 = vset.pattern.permute.xlu1 %v7122_v2  ;;  %7157 = vst [vmem:[#allocation57_spill] sm:$0xff] %v4179_v61  ;;  %v7158_v2 = vld [vmem:[#allocation61_spill] sm:$0xff]  ;;  %v1022_v50 = vsel %vm1001_vm5, %v7154_v7, %v7160_v51  ;;  %v1018_v11 = vsel %vm1001_vm5, %v7160_v51, %v7161_v33  ;;  %v4207_v7 = vrot.slane %v7147_v46, %v3917_v0  ;;  %v7167_v51 = vld [vmem:[#allocation50_spill] sm:$0xff] }
 0x278   :  { %1551 = vrot.lane.b32.xlu0 %v7158_v2, %s2898_s15  ;;  %v4183_v56 = vpop.permute.xlu1 %1513  ;;  %v4195_v61 = vpop.permute.xlu0 %1519  ;;  %v4203_v2 = vrot.slane %v7152_v52, %v3892_v34  ;;  %7166 = vst [vmem:[#allocation213_spill] sm:$0xff] %v4211_v38  ;;  %v1067_v16 = vmul.f32 %v4090_v32, %v1026_v25  ;;  %v826_v34 = vmul.f32 %v4118_v23, %v785_v60  ;;  %v7168_v33 = vld [vmem:[#allocation60_spill] sm:$0xff]  ;;  %v7171_v60 = vld [vmem:[#allocation67_spill] sm:$0xff] }
 0x279   :  { %7159 = vst [vmem:[#allocation210_spill] sm:$0xff] %v4183_v56  ;;  %7162 = vst [vmem:[#allocation45_spill] sm:$0xff] %v4195_v61  ;;  %v532_v56 = vsel %vm515_vm3, %v7142_v47, %v7163_v9  ;;  %v781_v47 = vsel %vm760_vm4, %v7155_v19, %v7167_v51  ;;  %v541_v46 = vsel %vm515_vm3, %v3301_v43, %v7168_v33  ;;  %v7169_v61 = vld [vmem:[#allocation58_spill] sm:$0xff] }
 0x27a   :  { %7164 = vst [vmem:[#allocation211_spill] sm:$0xff] %v4203_v2  ;;  %7165 = vst [vmem:[#allocation212_spill] sm:$0xff] %v4207_v7  ;;  %2236 = vrot.lane.b32.xlu1 %v3201_v58, %s2905_s4  ;;  %v1068_v29 = vmul.f32 %v4094_v10, %v1022_v50  ;;  %v1069_v9 = vmul.f32 %v4098_v21, %v1018_v11  ;;  %v777_v25 = vsel %vm760_vm4, %v7167_v51, %v7169_v61  ;;  %v7170_v58 = vld [vmem:[#allocation52_spill] sm:$0xff]  ;;  %v7173_v2 = vld [vmem:[#allocation62_spill] sm:$0xff] }
 0x27b   :  { %v537_v19 = vsel %vm515_vm3, %v7168_v33, %v7170_v58  ;;  %v633_v43 = vmul.f32 %v3199_v55, %v581_v13  ;;  %v634_v50 = vmul.f32 %v3199_v55, %v582_v62  ;;  %v583_v11 = vmul.f32 %v4114_v28, %v532_v56 }
 0x27c   :  { %1559 = vrot.lane.b32.xlu0 %v7171_v60, %s2898_s15  ;;  %v4237_v38 = vpop.permute.xlu1 %1517  ;;  %v533_v51 = vsel %vm515_vm3, %v7170_v58, %v7173_v2  ;;  %v4246_v61 = vpop.permute.xlu0 %1523  ;;  %v827_v33 = vmul.f32 %v4122_v36, %v781_v47  ;;  %v589_v7 = vmul.f32 %v4102_v14, %v541_v46  ;;  %v7175_v60 = vld [vmem:[#allocation56_spill] sm:$0xff]  ;;  %v786_v62 = vsel %vm760_vm4, %v3321_v15, %v7176_v5 }
 0x27d   :  { %7172 = vst [vmem:[#allocation50_spill] sm:$0xff] %v4237_v38  ;;  %7174 = vst [vmem:[#allocation60_spill] sm:$0xff] %v4246_v61  ;;  %v782_v13 = vsel %vm760_vm4, %v7176_v5, %v7175_v60  ;;  %v874_v58 = vmul.f32 %v3224_v6, %v826_v34  ;;  %v828_v56 = vmul.f32 %v4126_v45, %v777_v25  ;;  %v7177_v46 = vld [vmem:[#allocation68_spill] sm:$0xff] }
 0x27e   :  { %2244 = vrot.lane.b32.xlu1 %v3169_v40, %s2905_s4  ;;  %v590_v47 = vmul.f32 %v4106_v31, %v537_v19  ;;  %v778_v2 = vsel %vm760_vm4, %v7175_v60, %v7177_v46  ;;  %v1115_v38 = vmul.f32 %v3222_v4, %v1067_v16  ;;  %v1116_v17 = vmul.f32 %v3222_v4, %v1068_v29 }
 0x27f   :  { %v591_v5 = vmul.f32 %v4114_v28, %v533_v51  ;;  %v4272_v15 = vrot.slane %v7152_v52, %v3917_v0  ;;  %v4279_v25 = vmul.f32 %v3222_v4, %v1069_v9  ;;  %v665_v19 = vadd.f32 %v633_v43, %v3175_v41 }
 0x280   :  { %1989 = vrot.lane.b32.xlu0 %v3065_v53, %s2903_s29  ;;  %v4276_v34 = vpop.permute.xlu1 %1521  ;;  %v834_v16 = vmul.f32 %v4118_v23, %v786_v62  ;;  %v835_v29 = vmul.f32 %v4122_v36, %v782_v13  ;;  %v4284_v60 = vpop.permute.xlu0 %1527  ;;  %v635_v51 = vmul.f32 %v3199_v55, %v583_v11  ;;  %v875_v0 = vmul.f32 %v3224_v6, %v827_v33  ;;  %v7182_v11 = vld [vmem:[#allocation66_spill] sm:$0xff] }
 0x281   :  { %7178 = vst [vmem:[#allocation52_spill] sm:$0xff] %v4272_v15  ;;  %7179 = vst [vmem:[#allocation56_spill] sm:$0xff] %v4276_v34  ;;  %v641_v52 = vmul.f32 %v3177_v42, %v589_v7  ;;  %v836_v46 = vmul.f32 %v4126_v45, %v778_v2  ;;  %v666_v9 = vadd.f32 %v634_v50, %v3175_v41  ;;  %v7183_v7 = vld [vmem:[#allocation69_spill] sm:$0xff]  ;;  %v7228_v15 = vmov 0  }
 0x282   :  { %7180 = vst [vmem:[#allocation65_spill] sm:$0xff] %v4284_v60  ;;  %2252 = vrot.lane.b32.xlu1 %v3207_v59, %s2905_s4  ;;  %v906_v43 = vadd.f32 %v874_v58, %v665_v19  ;;  %v876_v62 = vmul.f32 %v3224_v6, %v828_v56  ;;  %v642_v13 = vmul.f32 %v3177_v42, %v590_v47  ;;  %v7181_v60 = vld [vmem:[#allocation63_spill] sm:$0xff]  ;;  %v7186_v19 = vld [vmem:[#allocation85_spill] sm:$0xff] }
 0x283   :  { %v643_v4 = vmul.f32 %v3177_v42, %v591_v5  ;;  %v1023_v33 = vsel %vm1001_vm5, %v7182_v11, %v7181_v60  ;;  %v1027_v2 = vsel %vm1001_vm5, %v3352_v30, %v7182_v11  ;;  %v1019_v50 = vsel %vm1001_vm5, %v7181_v60, %v7183_v7  ;;  %v7185_v5 = vld [vmem:[#allocation75_spill] sm:$0xff]  ;;  %v7187_v30 = vld [vmem:[#allocation72_spill] sm:$0xff] }
 0x284   :  { %1997 = vrot.lane.b32.xlu0 %v3056_v48, %s2903_s29  ;;  %v4310_v58 = vpop.permute.xlu1 %1525  ;;  %v882_v56 = vmul.f32 %v3197_v54, %v834_v16  ;;  %v883_v47 = vmul.f32 %v3197_v54, %v835_v29  ;;  %v538_v42 = vsel %vm515_vm3, %v7186_v19, %v7185_v5  ;;  %v542_v11 = vsel %vm515_vm3, %v7187_v30, %v7186_v19  ;;  %v4322_v60 = vpop.permute.xlu0 %1673 }
 0x285   :  { %7184 = vst [vmem:[#allocation63_spill] sm:$0xff] %v4310_v58  ;;  %7188 = vst [vmem:[#allocation66_spill] sm:$0xff] %v4322_v60  ;;  %v667_v7 = vadd.f32 %v635_v51, %v3175_v41  ;;  %v907_v6 = vadd.f32 %v875_v0, %v666_v9  ;;  %v673_v55 = vadd.f32 %v641_v52, %v3155_v35  ;;  %v7205_v60 = vld [vmem:[#allocation21_spill] sm:$0xff] }
 0x286   :  { %v884_v16 = vmul.f32 %v3197_v54, %v836_v46  ;;  %2260 = vrot.lane.b32.xlu1 %v3391_v24, %s2905_s4  ;;  %v674_v29 = vadd.f32 %v642_v13, %v3155_v35  ;;  %v1075_v59 = vmul.f32 %v4090_v32, %v1027_v2  ;;  %v1076_v40 = vmul.f32 %v4094_v10, %v1023_v33  ;;  %v7190_v54 = vld [vmem:[#allocation76_spill] sm:$0xff]  ;;  %v7191_v33 = vld [vmem:[#allocation71_spill] sm:$0xff] }
 0x287   :  { %v1077_v19 = vmul.f32 %v4098_v21, %v1019_v50  ;;  %v4333_v34 = vadd.f32 %v1115_v38, %v906_v43  ;;  %v675_v51 = vadd.f32 %v643_v4, %v3155_v35  ;;  %v597_v0 = vmul.f32 %v4102_v14, %v542_v11  ;;  %v7193_v50 = vld [vmem:[#allocation87_spill] sm:$0xff]  ;;  %v7195_v35 = vld [vmem:[#allocation89_spill] sm:$0xff] }
 0x288   :  { %v598_v52 = vmul.f32 %v4106_v31, %v538_v42  ;;  %2005 = vrot.lane.b32.xlu0 %v3072_v57, %s2903_s29  ;;  %v4340_v46 = vpop.permute.xlu1 %1669  ;;  %v908_v9 = vadd.f32 %v876_v62, %v667_v7  ;;  %v914_v13 = vadd.f32 %v882_v56, %v673_v55  ;;  %v915_v2 = vadd.f32 %v883_v47, %v674_v29  ;;  %v4346_v43 = vpop.permute.xlu0 %1537  ;;  %v7194_v11 = vld [vmem:[#allocation79_spill] sm:$0xff]  ;;  %v7196_v55 = vld [vmem:[#allocation77_spill] sm:$0xff]  ;;  %v7197_v56 = vld [vmem:[#allocation12_spill] sm:$0xff] }
 0x289   :  { %7189 = vst [vmem:[#allocation75_spill] sm:$0xff] %v4340_v46  ;;  %v1028_v38 = vsel %vm1001_vm5, %v7191_v33, %v7190_v54  ;;  %7192 = vst [vmem:[#allocation85_spill] sm:$0xff] %v4346_v43  ;;  %v916_v4 = vadd.f32 %v884_v16, %v675_v51  ;;  %v534_v42 = vsel %vm515_vm3, %v7185_v5, %v7193_v50  ;;  %v7198_v51 = vld [vmem:[#allocation74_spill] sm:$0xff]  ;;  %v7199_v46 = vld [vmem:[#allocation33_spill] sm:$0xff] }
 0x28a   :  { %v783_v62 = vsel %vm760_vm4, %v7195_v35, %v7194_v11  ;;  %v787_v7 = vsel %vm760_vm4, %v7196_v55, %v7195_v35  ;;  %1742 = vrot.lane.b32.xlu1 %v7197_v56, %s2901_s18  ;;  %v4362_v47 = vadd.f32 %v1116_v17, %v907_v6  ;;  %v1123_v16 = vmul.f32 %v3251_v27, %v1075_v59  ;;  %v7201_v59 = vld [vmem:[#allocation78_spill] sm:$0xff]  ;;  %v7230_v55 = vld [vmem:[#allocation73_spill] sm:$0xff]  ;;  %v7231_v33 = vld [vmem:[#allocation151_spill] sm:$0xff] }
 0x28b   :  { %v1124_v29 = vmul.f32 %v3251_v27, %v1076_v40  ;;  %v1125_v5 = vmul.f32 %v3251_v27, %v1077_v19  ;;  %v1024_v41 = vsel %vm1001_vm5, %v7190_v54, %v7198_v51  ;;  %v1083_v24 = vmul.f32 %v4090_v32, %v1028_v38 }
 0x28c   :  { %v649_v35 = vmul.f32 %v7199_v46, %v597_v0  ;;  %v650_v43 = vmul.f32 %v7199_v46, %v598_v52  ;;  %2013 = vrot.lane.b32.xlu0 %v3231_v12, %s2903_s29  ;;  %v4376_v6 = vpop.permute.xlu1 %1529  ;;  %v1020_v40 = vsel %vm1001_vm5, %v7198_v51, %v7201_v59  ;;  %v599_v17 = vmul.f32 %v4114_v28, %v534_v42  ;;  %v4385_v38 = vpop.permute.xlu0 %1914  ;;  %v7207_v51 = vld [vmem:[#allocation92_spill] sm:$0xff]  ;;  %v7238_v59 = vld [vmem:[#allocation206_spill] sm:$0xff] }
 0x28d   :  { %7200 = vst [vmem:[#allocation76_spill] sm:$0xff] %v4376_v6  ;;  %v842_v54 = vmul.f32 %v4118_v23, %v787_v7  ;;  %v843_v19 = vmul.f32 %v4122_v36, %v783_v62  ;;  %7202 = vst [vmem:[#allocation87_spill] sm:$0xff] %v4385_v38  ;;  %v4388_v0 = vadd.f32 %v4279_v25, %v908_v9  ;;  %v7206_v7 = vld [vmem:[#allocation91_spill] sm:$0xff]  ;;  %v7208_v25 = vld [vmem:[#allocation81_spill] sm:$0xff] }
 0x28e   :  { %v4390_v52 = vadd.f32 %v1123_v16, %v914_v13  ;;  %v4392_v27 = vadd.f32 %v1124_v29, %v915_v2  ;;  %v4394_v6 = vadd.f32 %v1125_v5, %v916_v4  ;;  %2228 = vrot.lane.b32.xlu1 %v7205_v60, %s2905_s4  ;;  %v4399_v42 = vmul.f32 %v4094_v10, %v1024_v41  ;;  %v7210_v2 = vld [vmem:[#allocation37_spill] sm:$0xff]  ;;  %v7212_v41 = vld [vmem:[#allocation26_spill] sm:$0xff]  ;;  %v7214_v60 = vld [vmem:[#allocation32_spill] sm:$0xff] }
 0x28f   :  { %7203 = vst [vmem:[#allocation79_spill] sm:$0xff] %v4388_v0  ;;  %v779_v62 = vsel %vm760_vm4, %v7194_v11, %v7206_v7  ;;  %v543_v9 = vsel %vm515_vm3, %v7208_v25, %v7207_v51  ;;  %v4410_v13 = vsub.s32 5, %v3671_v37  ;;  %v4413_v4 = vmul.f32 %v7210_v2, %v1083_v24  ;;  %v7219_v37 = vld [vmem:[#allocation94_spill] sm:$0xff]  ;;  %v7221_v0 = vld [vmem:[#allocation96_spill] sm:$0xff] }
 0x290   :  { %7204 = vst [vmem:[#allocation89_spill] sm:$0xff] %v4394_v6  ;;  %v4416_v16 = vmul.f32 %v4098_v21, %v1020_v40  ;;  %v4419_v29 = vadd.f32 %v649_v35, %v7212_v41  ;;  %v4422_v5 = vadd.f32 %v650_v43, %v7212_v41  ;;  %2384 = vperm.xlu0 %2814, %v3888_v3   ;;  %v4425_v11 = vpop.permute.xlu1 %1535  ;;  %v4437_v35 = vpop.permute.xlu0 %1752  ;;  %v7216_v40 = vld [vmem:[#allocation84_spill] sm:$0xff]  ;;  %v7242_v6 = vld [vmem:[#allocation198_spill] sm:$0xff] }
 0x291   :  { %7209 = vst [vmem:[#allocation12_spill] sm:$0xff] %v4410_v13  ;;  %7211 = vst [vmem:[#allocation74_spill] sm:$0xff] %v4413_v4  ;;  %v4428_v38 = vmul.f32 %v7199_v46, %v599_v17  ;;  %v4431_v12 = vmul.f32 %v7214_v60, %v842_v54  ;;  %v4434_v24 = vmul.f32 %v7214_v60, %v843_v19  ;;  %v7217_v54 = vld [vmem:[#allocation80_spill] sm:$0xff]  ;;  %v7236_v46 = vld [vmem:[#allocation13_spill] sm:$0xff] }
 0x292   :  { %7213 = vst [vmem:[#allocation92_spill] sm:$0xff] %v4425_v11  ;;  %7215 = vst [vmem:[#allocation37_spill] sm:$0xff] %v4437_v35  ;;  %v4440_v43 = vmul.f32 %v4126_v45, %v779_v62  ;;  %v539_v3 = vsel %vm515_vm3, %v7207_v51, %v7216_v40  ;;  %v4447_v17 = vmul.f32 %v4102_v14, %v543_v9  ;;  %1545 = vrot.lane.b32.xlu1 %v7217_v54, %s2898_s15  ;;  %v7218_v19 = vld [vmem:[#allocation152_spill] sm:$0xff]  ;;  %v7223_v9 = vld [vmem:[#allocation158_spill] sm:$0xff] }
 0x293   :  { %v1356_v11 = vmul.f32 %v4031_v1, %v7218_v19  ;;  %v4457_v62 = vsel %vm515_vm3, %v7216_v40, %v7219_v37  ;;  %v7220_v35 = vld [vmem:[#allocation88_spill] sm:$0xff]  ;;  %v4467_v14 = vrot.slane %v3883_v20, %v4410_v13  ;;  %v1357_v57 = vmul.f32 %v4031_v1, %v7223_v9 }
 0x294   :  { %v4463_v51 = vsel %vm760_vm4, %v7221_v0, %v7220_v35  ;;  %v1588_v19 = vsel %vm1563_vm6, %v4061_v49, %v4077_v63  ;;  %v4477_v40 = vrot.slane %v7135_v26, %v4410_v13  ;;  %v4481_v25 = vrot.slane %v7136_v22, %v4410_v13  ;;  %1983 = vrot.lane.b32.xlu0 %v7197_v56, %s2903_s29  ;;  %v4485_v20 = vpop.permute.xlu1 %1910  ;;  %v4497_v22 = vpop.permute.xlu0 %1760 }
 0x295   :  { %7222 = vst [vmem:[#allocation26_spill] sm:$0xff] %v4467_v14  ;;  %7226 = vst [vmem:[#allocation152_spill] sm:$0xff] %v4485_v20  ;;  %v1436_v9 = vmul.f32 %v4051_v8, %v3065_v53  ;;  %v1584_v49 = vsel %vm1563_vm6, %v4077_v63, %v4128_v18  ;;  %v1580_v26 = vsel %vm1563_vm6, %v4128_v18, %v4246_v61  ;;  %2817 = vset.pattern.permute.xlu0 %v7228_v15  ;;  %v7229_v53 = vld [vmem:[#allocation86_spill] sm:$0xff]  ;;  %v7235_v15 = vld [vmem:[#allocation201_spill] sm:$0xff] }
 0x296   :  { %7224 = vst [vmem:[#allocation32_spill] sm:$0xff] %v4477_v40  ;;  %7225 = vst [vmem:[#allocation84_spill] sm:$0xff] %v4481_v25  ;;  %v1437_v1 = vmul.f32 %v4051_v8, %v3056_v48  ;;  %v1435_v20 = vmul.f32 %v4051_v8, %v3049_v44  ;;  %v788_v63 = vsel %vm760_vm4, %v7229_v53, %v7221_v0  ;;  %1553 = vrot.lane.b32.xlu1 %v7230_v55, %s2898_s15  ;;  %v7232_v18 = vld [vmem:[#allocation194_spill] sm:$0xff]  ;;  %v7237_v53 = vld [vmem:[#allocation209_spill] sm:$0xff] }
 0x297   :  { %7227 = vst [vmem:[#allocation88_spill] sm:$0xff] %v4497_v22  ;;  %v1364_v61 = vmul.f32 %v7232_v18, %v7231_v33  ;;  %v7233_v22 = vld [vmem:[#allocation157_spill] sm:$0xff]  ;;  %v1388_v48 = vadd.f32 %v1356_v11, %v4333_v34  ;;  %v1628_v8 = vmul.f32 %v4467_v14, %v1588_v19  ;;  %v7234_v44 = vld [vmem:[#allocation14_spill] sm:$0xff]  ;;  %v1445_v4 = vmul.f32 %v7235_v15, %v7236_v46 }
 0x298   :  { %v1365_v30 = vmul.f32 %v7232_v18, %v7233_v22  ;;  %v1444_v37 = vmul.f32 %v7235_v15, %v7234_v44  ;;  %v1389_v0 = vadd.f32 %v1357_v57, %v4362_v47  ;;  %v1589_v33 = vsel %vm1563_vm6, %v7238_v59, %v7237_v53  ;;  %v7239_v22 = vld [vmem:[#allocation50_spill] sm:$0xff]  ;;  %1786 = vrot.lane.b32.xlu0 %v7217_v54, %s2901_s18  ;;  %v4537_v47 = vpop.permute.xlu0 %1768 }
 0x299   :  { %v1629_v21 = vmul.f32 %v4477_v40, %v1584_v49  ;;  %v1585_v34 = vsel %vm1563_vm6, %v7237_v53, %v7239_v22  ;;  %v1630_v11 = vmul.f32 %v4481_v25, %v1580_v26  ;;  %v1581_v57 = vsel %vm1563_vm6, %v7239_v22, %v4310_v58  ;;  %7240 = vst [vmem:[#allocation96_spill] sm:$0xff] %v4537_v47  ;;  %v4539_v19 = vpop.permute.xlu1 %1661  ;;  %v7243_v53 = vld [vmem:[#allocation83_spill] sm:$0xff] }
 0x29a   :  { %7241 = vst [vmem:[#allocation158_spill] sm:$0xff] %v4539_v19  ;;  %v1468_v49 = vadd.f32 %v1436_v9, %v1388_v48  ;;  %v1469_v59 = vadd.f32 %v1437_v1, %v1389_v0  ;;  %v1467_v7 = vadd.f32 %v1435_v20, %v7242_v6  ;;  %1561 = vrot.lane.b32.xlu1 %v7243_v53, %s2898_s15 }
 0x29b   :  { %v1677_v26 = vmul.f32 %v4539_v19, %v1629_v21  ;;  %v1678_v54 = vmul.f32 %v4539_v19, %v1630_v11  ;;  %v1676_v10 = vmul.f32 %v4539_v19, %v1628_v8  ;;  %v1443_v22 = vmul.f32 %v7235_v15, %v7197_v56 }
 0x29c   :  { %v1636_v47 = vmul.f32 %v4467_v14, %v1589_v33  ;;  %v1637_v58 = vmul.f32 %v4477_v40, %v1585_v34  ;;  %v1396_v48 = vadd.f32 %v1364_v61, %v4390_v52  ;;  %v1397_v1 = vadd.f32 %v1365_v30, %v4392_v27  ;;  %1794 = vrot.lane.b32.xlu0 %v7230_v55, %s2901_s18  ;;  %v4564_v33 = vpop.permute.xlu0 %1776 }
 0x29d   :  { %v1638_v6 = vmul.f32 %v4481_v25, %v1581_v57  ;;  %v4556_v21 = vadd.f32 %v1677_v26, %v1468_v49  ;;  %v4558_v20 = vadd.f32 %v1678_v54, %v1469_v59  ;;  %v4560_v8 = vadd.f32 %v1676_v10, %v1467_v7  ;;  %7247 = vst [vmem:[#allocation13_spill] sm:$0xff] %v4564_v33  ;;  %v4566_v61 = vpop.permute.xlu1 %1665  ;;  %v7249_v7 = vld [vmem:[#allocation196_spill] sm:$0xff]  ;;  %v7257_v26 = vld [vmem:[#allocation38_spill] sm:$0xff] }
 0x29e   :  { %v606_v9 = vmul.f32 %v4106_v31, %v539_v3  ;;  %v850_v0 = vmul.f32 %v4118_v23, %v788_v63  ;;  %7248 = vst [vmem:[#allocation209_spill] sm:$0xff] %v4566_v61  ;;  %v1476_v27 = vadd.f32 %v1444_v37, %v1396_v48  ;;  %v1477_v30 = vadd.f32 %v1445_v4, %v1397_v1  ;;  %v7250_v31 = vld [vmem:[#allocation27_spill] sm:$0xff]  ;;  %v7251_v63 = vld [vmem:[#allocation98_spill] sm:$0xff]  ;;  %v7313_v33 = vld [vmem:[#allocation180_spill] sm:$0xff] }
 0x29f   :  { %7244 = vst [vmem:[#allocation151_spill] sm:$0xff] %v4556_v21  ;;  %7245 = vst [vmem:[#allocation157_spill] sm:$0xff] %v4558_v20  ;;  %1991 = vrot.lane.b32.xlu1 %v7234_v44, %s2903_s29  ;;  %v1685_v52 = vmul.f32 %v4566_v61, %v1637_v58  ;;  %v1686_v59 = vmul.f32 %v4566_v61, %v1638_v6  ;;  %v1684_v10 = vmul.f32 %v4566_v61, %v1636_v47  ;;  %v7258_v1 = vld [vmem:[#allocation95_spill] sm:$0xff]  ;;  %v7302_v20 = vld [vmem:[#allocation193_spill] sm:$0xff] }
 0x2a0   :  { %7246 = vst [vmem:[#allocation14_spill] sm:$0xff] %v4560_v8  ;;  %v1475_v54 = vadd.f32 %v1443_v22, %v7249_v7  ;;  %v892_v23 = vmul.f32 %v7214_v60, %v4440_v43  ;;  %v657_v3 = vmul.f32 %v7250_v31, %v4447_v17  ;;  %v607_v37 = vmul.f32 %v4114_v28, %v4457_v62  ;;  %v7253_v62 = vld [vmem:[#allocation97_spill] sm:$0xff]  ;;  %v4603_v57 = vpop.permute.xlu0 %1746  ;;  %v7264_v7 = vld [vmem:[#allocation15_spill] sm:$0xff]  ;;  %v7314_v25 = vld [vmem:[#allocation136_spill] sm:$0xff] }
 0x2a1   :  { %v851_v4 = vmul.f32 %v4122_v36, %v4463_v51  ;;  %v780_v58 = vsel %vm760_vm4, %v7220_v35, %v7251_v63  ;;  %1802 = vrot.lane.b32.xlu0 %v7243_v53, %s2901_s18  ;;  %v4588_v34 = vadd.f32 %v1685_v52, %v1476_v27  ;;  %v4590_v43 = vadd.f32 %v1686_v59, %v1477_v30  ;;  %v7254_v51 = vld [vmem:[#allocation93_spill] sm:$0xff]  ;;  %v4605_v47 = vpop.permute.xlu1 %1754  ;;  %v7262_v59 = vld [vmem:[#allocation160_spill] sm:$0xff] }
 0x2a2   :  { %v4592_v11 = vadd.f32 %v1684_v10, %v1475_v54  ;;  %v1132_v28 = vmul.f32 %v7210_v2, %v4399_v42  ;;  %v683_v36 = vadd.f32 %v4428_v38, %v7212_v41  ;;  %v658_v17 = vmul.f32 %v7250_v31, %v606_v9  ;;  %7255 = vst [vmem:[#allocation198_spill] sm:$0xff] %v4603_v57  ;;  %v7261_v52 = vld [vmem:[#allocation125_spill] sm:$0xff]  ;;  %v7277_v57 = vld [vmem:[#allocation78_spill] sm:$0xff] }
 0x2a3   :  { %v1029_v35 = vsel %vm1001_vm5, %v7254_v51, %v7253_v62  ;;  %7256 = vst [vmem:[#allocation196_spill] sm:$0xff] %v4605_v47  ;;  %v1133_v49 = vmul.f32 %v7210_v2, %v4416_v16  ;;  %v922_v42 = vadd.f32 %v4431_v12, %v4419_v29  ;;  %v923_v38 = vadd.f32 %v4434_v24, %v4422_v5  ;;  %v7259_v16 = vld [vmem:[#allocation163_spill] sm:$0xff]  ;;  %v7260_v12 = vld [vmem:[#allocation22_spill] sm:$0xff]  ;;  %v7305_v47 = vld [vmem:[#allocation137_spill] sm:$0xff] }
 0x2a4   :  { %7252 = vst [vmem:[#allocation50_spill] sm:$0xff] %v4592_v11  ;;  %v898_v22 = vmul.f32 %v7257_v26, %v850_v0  ;;  %1999 = vrot.lane.b32.xlu1 %v7236_v46, %s2903_s29  ;;  %v924_v48 = vadd.f32 %v892_v23, %v683_v36  ;;  %v1025_v6 = vsel %vm1001_vm5, %v7253_v62, %v7258_v1  ;;  %v4640_v23 = vpop.permute.xlu0 %1533  ;;  %v7270_v62 = vld [vmem:[#allocation129_spill] sm:$0xff]  ;;  %v7276_v11 = vld [vmem:[#allocation124_spill] sm:$0xff] }
 0x2a5   :  { %v852_v9 = vmul.f32 %v4126_v45, %v780_v58  ;;  %v1366_v27 = vmul.f32 %v7232_v18, %v7259_v16  ;;  %v689_v29 = vadd.f32 %v657_v3, %v7260_v12  ;;  %v659_v5 = vmul.f32 %v7250_v31, %v607_v37  ;;  %2232 = vrot.lane.b32.xlu0 %v7234_v44, %s2905_s4  ;;  %v7267_v44 = vld [vmem:[#allocation148_spill] sm:$0xff] }
 0x2a6   :  { %v899_v24 = vmul.f32 %v7257_v26, %v851_v4  ;;  %v1091_v0 = vmul.f32 %v4090_v32, %v1029_v35  ;;  %v690_v30 = vadd.f32 %v658_v17, %v7260_v12  ;;  %v530_v45 = vsel %vm515_vm3, %v7193_v50, %v7261_v52  ;;  %7265 = vst [vmem:[#allocation98_spill] sm:$0xff] %v4640_v23  ;;  %v4642_v32 = vpop.permute.xlu1 %1762  ;;  %v7268_v4 = vld [vmem:[#allocation99_spill] sm:$0xff] }
 0x2a7   :  { %v4636_v10 = vrot.slane %v7262_v59, %v4410_v13  ;;  %v1446_v54 = vmul.f32 %v7235_v15, %v7264_v7  ;;  %7266 = vst [vmem:[#allocation97_spill] sm:$0xff] %v4642_v32  ;;  %v930_v3 = vadd.f32 %v898_v22, %v689_v29  ;;  %v1092_v37 = vmul.f32 %v7267_v44, %v1025_v6  ;;  %v7269_v50 = vld [vmem:[#allocation63_spill] sm:$0xff]  ;;  %v7272_v6 = vld [vmem:[#allocation89_spill] sm:$0xff]  ;;  %v7273_v44 = vld [vmem:[#allocation40_spill] sm:$0xff] }
 0x2a8   :  { %v1021_v58 = vsel %vm1001_vm5, %v7258_v1, %v7268_v4  ;;  %v1577_v36 = vsel %vm1563_vm6, %v7269_v50, %v4640_v23  ;;  %2007 = vrot.lane.b32.xlu1 %v7264_v7, %s2903_s29  ;;  %v900_v17 = vmul.f32 %v7257_v26, %v852_v9  ;;  %v7271_v35 = vld [vmem:[#allocation91_spill] sm:$0xff]  ;;  %v1398_v16 = vadd.f32 %v1366_v27, %v7272_v6  ;;  %v7274_v50 = vld [vmem:[#allocation53_spill] sm:$0xff]  ;;  %v7275_v9 = vld [vmem:[#allocation154_spill] sm:$0xff] }
 0x2a9   :  { %7263 = vst [vmem:[#allocation27_spill] sm:$0xff] %v4636_v10  ;;  %v775_v22 = vsel %vm760_vm4, %v7271_v35, %v7270_v62  ;;  %v1639_v29 = vmul.f32 %v4636_v10, %v1577_v36  ;;  %v691_v1 = vadd.f32 %v659_v5, %v7260_v12  ;;  %v931_v59 = vadd.f32 %v899_v24, %v690_v30  ;;  %v4675_v5 = vpop.permute.xlu0 %1906  ;;  %v7280_v24 = vld [vmem:[#allocation74_spill] sm:$0xff]  ;;  %v7317_v13 = vld [vmem:[#allocation8_spill] sm:$0xff] }
 0x2aa   :  { %v1139_v15 = vmul.f32 %v7273_v44, %v1091_v0  ;;  %v600_v23 = vmul.f32 %v7274_v50, %v530_v45  ;;  %2240 = vrot.lane.b32.xlu0 %v7236_v46, %s2905_s4  ;;  %v1093_v18 = vmul.f32 %v7275_v9, %v1021_v58  ;;  %v1016_v35 = vsel %vm1001_vm5, %v7277_v57, %v7276_v11  ;;  %v4673_v6 = vpop.permute.xlu1 %1770  ;;  %v7284_v45 = vld [vmem:[#allocation175_spill] sm:$0xff]  ;;  %v7285_v9 = vld [vmem:[#allocation44_spill] sm:$0xff] }
 0x2ab   :  { %v1478_v27 = vadd.f32 %v1446_v54, %v1398_v16  ;;  %v1687_v36 = vmul.f32 %v4566_v61, %v1639_v29  ;;  %7278 = vst [vmem:[#allocation93_spill] sm:$0xff] %v4673_v6  ;;  %7279 = vst [vmem:[#allocation38_spill] sm:$0xff] %v4675_v5  ;;  %v4678_v0 = vadd.f32 %v7280_v24, %v922_v42  ;;  %v7288_v61 = vld [vmem:[#allocation46_spill] sm:$0xff]  ;;  %v7289_v42 = vld [vmem:[#allocation33_spill] sm:$0xff] }
 0x2ac   :  { %v4680_v30 = vadd.f32 %v1132_v28, %v923_v38  ;;  %v4682_v46 = vadd.f32 %v1133_v49, %v924_v48  ;;  %v845_v58 = vmul.f32 %v7284_v45, %v775_v22  ;;  %2015 = vrot.lane.b32.xlu1 %v7285_v9, %s2903_s29  ;;  %v1140_v57 = vmul.f32 %v7273_v44, %v1092_v37  ;;  %v7290_v28 = vld [vmem:[#allocation132_spill] sm:$0xff]  ;;  %v7291_v38 = vld [vmem:[#allocation94_spill] sm:$0xff]  ;;  %v7292_v48 = vld [vmem:[#allocation133_spill] sm:$0xff] }
 0x2ad   :  { %7281 = vst [vmem:[#allocation95_spill] sm:$0xff] %v4678_v0  ;;  %v4688_v54 = vadd.f32 %v1139_v15, %v930_v3  ;;  %v932_v16 = vadd.f32 %v900_v17, %v691_v1  ;;  %v4690_v29 = vadd.f32 %v1687_v36, %v1478_v27  ;;  %v1086_v8 = vmul.f32 %v7288_v61, %v1016_v35  ;;  %v7294_v37 = vld [vmem:[#allocation126_spill] sm:$0xff]  ;;  %v7295_v17 = vld [vmem:[#allocation128_spill] sm:$0xff]  ;;  %v7296_v1 = vld [vmem:[#allocation127_spill] sm:$0xff] }
 0x2ae   :  { %7282 = vst [vmem:[#allocation163_spill] sm:$0xff] %v4680_v30  ;;  %7283 = vst [vmem:[#allocation22_spill] sm:$0xff] %v4682_v46  ;;  %v652_v24 = vmul.f32 %v7289_v42, %v600_v23  ;;  %v531_v49 = vsel %vm515_vm3, %v7291_v38, %v7290_v28  ;;  %v526_v22 = vsel %vm515_vm3, %v7261_v52, %v7292_v48  ;;  %2248 = vrot.lane.b32.xlu0 %v7264_v7, %s2905_s4  ;;  %v4715_v27 = vpop.permute.xlu1 %1778  ;;  %v7299_v36 = vld [vmem:[#allocation72_spill] sm:$0xff]  ;;  %v7343_v46 = vld [vmem:[#allocation134_spill] sm:$0xff] }
 0x2af   :  { %7286 = vst [vmem:[#allocation125_spill] sm:$0xff] %v4688_v54  ;;  %7287 = vst [vmem:[#allocation160_spill] sm:$0xff] %v4690_v29  ;;  %v4704_v15 = vadd.f32 %v1140_v57, %v931_v59  ;;  %v1141_v3 = vmul.f32 %v7273_v44, %v1093_v18  ;;  %v1008_v23 = vsel %vm1001_vm5, %v7295_v17, %v7294_v37  ;;  %v7298_v18 = vld [vmem:[#allocation130_spill] sm:$0xff]  ;;  %v7300_v57 = vld [vmem:[#allocation135_spill] sm:$0xff] }
 0x2b0   :  { %v522_v35 = vsel %vm515_vm3, %v7292_v48, %v7296_v1  ;;  %7297 = vst [vmem:[#allocation148_spill] sm:$0xff] %v4715_v27  ;;  %v1012_v52 = vsel %vm1001_vm5, %v7276_v11, %v7295_v17  ;;  %v893_v7 = vmul.f32 %v7214_v60, %v845_v58  ;;  %v1004_v59 = vsel %vm1001_vm5, %v7294_v37, %v7298_v18  ;;  %v4730_v48 = vpop.permute.xlu0 %2151  ;;  %v7303_v27 = vld [vmem:[#allocation71_spill] sm:$0xff]  ;;  %v7304_v17 = vld [vmem:[#allocation48_spill] sm:$0xff]  ;;  %v7344_v29 = vld [vmem:[#allocation141_spill] sm:$0xff] }
 0x2b1   :  { %7293 = vst [vmem:[#allocation15_spill] sm:$0xff] %v4704_v15  ;;  %v546_v38 = vsel %vm515_vm3, %v7300_v57, %v7299_v36  ;;  %7301 = vst [vmem:[#allocation99_spill] sm:$0xff] %v4730_v48  ;;  %2388 = vperm.xlu1 %2815, %v7302_v20   ;;  %v1032_v11 = vsel %vm1001_vm5, %v7298_v18, %v7303_v27  ;;  %v608_v58 = vmul.f32 %v7274_v50, %v531_v49  ;;  %v7307_v48 = vld [vmem:[#allocation57_spill] sm:$0xff]  ;;  %v7308_v27 = vld [vmem:[#allocation166_spill] sm:$0xff] }
 0x2b2   :  { %v601_v6 = vmul.f32 %v7304_v17, %v526_v22  ;;  %v771_v37 = vsel %vm760_vm4, %v7270_v62, %v7305_v47  ;;  %v4743_v32 = vadd.f32 %v1141_v3, %v932_v16  ;;  %v1134_v36 = vmul.f32 %v7210_v2, %v1086_v8  ;;  %2256 = vrot.lane.b32.xlu0 %v7285_v9, %s2905_s4  ;;  %v7309_v18 = vld [vmem:[#allocation170_spill] sm:$0xff]  ;;  %v7310_v16 = vld [vmem:[#allocation184_spill] sm:$0xff]  ;;  %v4757_v50 = vpop.permute.xlu1 %2155 }
 0x2b3   :  { %v684_v20 = vadd.f32 %v652_v24, %v7212_v41  ;;  %v602_v21 = vmul.f32 %v7307_v48, %v522_v35  ;;  %v1087_v49 = vmul.f32 %v7308_v27, %v1012_v52  ;;  %v1088_v22 = vmul.f32 %v7309_v18, %v1008_v23  ;;  %7311 = vst [vmem:[#allocation129_spill] sm:$0xff] %v4757_v50  ;;  %v7312_v8 = vld [vmem:[#allocation192_spill] sm:$0xff] }
 0x2b4   :  { %7306 = vst [vmem:[#allocation63_spill] sm:$0xff] %v4743_v32  ;;  %v518_v62 = vsel %vm515_vm3, %v7296_v1, %v7300_v57  ;;  %v596_v3 = vmul.f32 %v7310_v16, %v546_v38  ;;  %v1082_v24 = vmul.f32 %v7312_v8, %v1032_v11  ;;  %v1089_v35 = vmul.f32 %v7313_v33, %v1004_v59  ;;  %v7315_v9 = vld [vmem:[#allocation212_spill] sm:$0xff]  ;;  %v4766_v14 = vpop.permute.xlu0 %2001  ;;  %v7318_v11 = vld [vmem:[#allocation131_spill] sm:$0xff] }
 0x2b5   :  { %v776_v52 = vsel %vm760_vm4, %v7251_v63, %v7314_v25  ;;  %v846_v23 = vmul.f32 %v7315_v9, %v771_v37  ;;  %7316 = vst [vmem:[#allocation91_spill] sm:$0xff] %v4766_v14  ;;  %1981 = vrot.lane.b32.xlu1 %v7317_v13, %s2903_s29  ;;  %v925_v1 = vadd.f32 %v893_v7, %v684_v20  ;;  %v7319_v33 = vmov 0   ;;  %v7320_v37 = vld [vmem:[#allocation211_spill] sm:$0xff]  ;;  %v7322_v20 = vld [vmem:[#allocation77_spill] sm:$0xff] }
 0x2b6   :  { %v660_v57 = vmul.f32 %v7250_v31, %v608_v58  ;;  %v653_v38 = vmul.f32 %v7289_v42, %v601_v6  ;;  %v767_v59 = vsel %vm760_vm4, %v7305_v47, %v7318_v11  ;;  %2816 = vset.pattern.permute.xlu1 %v7319_v33  ;;  %v654_v63 = vmul.f32 %v7289_v42, %v602_v21  ;;  %v7321_v14 = vld [vmem:[#allocation139_spill] sm:$0xff]  ;;  %v4795_v33 = vpop.permute.xlu1 %1744 }
 0x2b7   :  { %v603_v50 = vmul.f32 %v7320_v37, %v518_v62  ;;  %v763_v7 = vsel %vm760_vm4, %v7318_v11, %v7321_v14  ;;  %v791_v6 = vsel %vm760_vm4, %v7321_v14, %v7322_v20  ;;  %2224 = vrot.lane.b32.xlu0 %v7197_v56, %s2905_s4  ;;  %v1135_v47 = vmul.f32 %v7210_v2, %v1087_v49  ;;  %v7324_v14 = vld [vmem:[#allocation213_spill] sm:$0xff]  ;;  %v7331_v32 = vld [vmem:[#allocation195_spill] sm:$0xff] }
 0x2b8   :  { %v4791_v58 = vmul.f32 %v7210_v2, %v1088_v22  ;;  %v648_v21 = vmul.f32 %v7289_v42, %v596_v3  ;;  %v853_v62 = vmul.f32 %v7284_v45, %v776_v52  ;;  %7323 = vst [vmem:[#allocation89_spill] sm:$0xff] %v4795_v33  ;;  %v4798_v11 = vmul.f32 %v7210_v2, %v1082_v24  ;;  %v4805_v49 = vpop.permute.xlu0 %2009  ;;  %v7326_v22 = vld [vmem:[#allocation64_spill] sm:$0xff]  ;;  %v7328_v52 = vld [vmem:[#allocation186_spill] sm:$0xff] }
 0x2b9   :  { %v4801_v40 = vmul.f32 %v7210_v2, %v1089_v35  ;;  %v847_v20 = vmul.f32 %v7324_v14, %v767_v59  ;;  %v894_v56 = vmul.f32 %v7214_v60, %v846_v23  ;;  %7325 = vst [vmem:[#allocation154_spill] sm:$0xff] %v4805_v49  ;;  %1784 = vrot.lane.b32.xlu1 %v7326_v22, %s2901_s18  ;;  %v7329_v33 = vld [vmem:[#allocation52_spill] sm:$0xff]  ;;  %v7332_v49 = vld [vmem:[#allocation51_spill] sm:$0xff] }
 0x2ba   :  { %v4809_v3 = vadd.f32 %v1134_v36, %v925_v1  ;;  %v841_v45 = vmul.f32 %v7328_v52, %v791_v6  ;;  %v848_v54 = vmul.f32 %v7329_v33, %v763_v7  ;;  %v7330_v24 = vld [vmem:[#allocation164_spill] sm:$0xff]  ;;  %v692_v2 = vadd.f32 %v660_v57, %v7260_v12  ;;  %v7333_v6 = vld [vmem:[#allocation81_spill] sm:$0xff]  ;;  %v7334_v7 = vld [vmem:[#allocation142_spill] sm:$0xff] }
 0x2bb   :  { %v1358_v30 = vmul.f32 %v7331_v32, %v7330_v24  ;;  %v685_v35 = vadd.f32 %v653_v38, %v7212_v41  ;;  %v686_v23 = vadd.f32 %v654_v63, %v7212_v41  ;;  %v655_v59 = vmul.f32 %v7289_v42, %v603_v50  ;;  %1541 = vrot.lane.b32.xlu0 %v7332_v49, %s2898_s15  ;;  %v7335_v32 = vld [vmem:[#allocation11_spill] sm:$0xff]  ;;  %v7336_v57 = vld [vmem:[#allocation200_spill] sm:$0xff]  ;;  %v4829_v38 = vpop.permute.xlu1 %1531 }
 0x2bc   :  { %7327 = vst [vmem:[#allocation124_spill] sm:$0xff] %v4809_v3  ;;  %v680_v36 = vadd.f32 %v648_v21, %v7212_v41  ;;  %v901_v1 = vmul.f32 %v7257_v26, %v853_v62  ;;  %v547_v24 = vsel %vm515_vm3, %v7334_v7, %v7333_v6  ;;  %v1438_v22 = vmul.f32 %v7336_v57, %v7335_v32  ;;  %v7338_v42 = vld [vmem:[#allocation140_spill] sm:$0xff]  ;;  %v4840_v15 = vpop.permute.xlu0 %2017  ;;  %v7341_v6 = vld [vmem:[#allocation61_spill] sm:$0xff] }
 0x2bd   :  { %7337 = vst [vmem:[#allocation78_spill] sm:$0xff] %v4829_v38  ;;  %v895_v63 = vmul.f32 %v7214_v60, %v847_v20  ;;  %v926_v50 = vadd.f32 %v894_v56, %v685_v35  ;;  %v527_v21 = vsel %vm515_vm3, %v7290_v28, %v7338_v42  ;;  %v7339_v62 = vld [vmem:[#allocation60_spill] sm:$0xff]  ;;  %7340 = vst [vmem:[#allocation74_spill] sm:$0xff] %v4840_v15  ;;  %1792 = vrot.lane.b32.xlu1 %v7341_v6, %s2901_s18  ;;  %v7342_v56 = vld [vmem:[#allocation79_spill] sm:$0xff] }
 0x2be   :  { %v1576_v3 = vsel %vm1563_vm6, %v7339_v62, %v4829_v38  ;;  %v889_v57 = vmul.f32 %v7214_v60, %v841_v45  ;;  %v896_v20 = vmul.f32 %v7214_v60, %v848_v54  ;;  %v1390_v35 = vadd.f32 %v1358_v30, %v7342_v56  ;;  %v7345_v15 = vld [vmem:[#allocation86_spill] sm:$0xff]  ;;  %v7346_v45 = vld [vmem:[#allocation147_spill] sm:$0xff] }
 0x2bf   :  { %v1631_v0 = vmul.f32 %v4636_v10, %v1576_v3  ;;  %v523_v28 = vsel %vm515_vm3, %v7338_v42, %v7343_v46  ;;  %v1017_v62 = vsel %vm1001_vm5, %v7268_v4, %v7344_v29  ;;  %v604_v38 = vmul.f32 %v7310_v16, %v547_v24  ;;  %v7347_v30 = vld [vmem:[#allocation47_spill] sm:$0xff]  ;;  %v4869_v56 = vpop.permute.xlu1 %1902 }
 0x2c0   :  { %v792_v60 = vsel %vm760_vm4, %v7346_v45, %v7345_v15  ;;  %1549 = vrot.lane.b32.xlu0 %v7347_v30, %s2898_s15  ;;  %v609_v54 = vmul.f32 %v7304_v17, %v527_v21  ;;  %v519_v3 = vsel %vm515_vm3, %v7343_v46, %v7334_v7  ;;  %v1470_v42 = vadd.f32 %v1438_v22, %v1390_v35  ;;  %v7349_v15 = vld [vmem:[#allocation145_spill] sm:$0xff]  ;;  %v4877_v21 = vpop.permute.xlu0 %1987  ;;  %v7351_v46 = vld [vmem:[#allocation67_spill] sm:$0xff]  ;;  %v7352_v7 = vld [vmem:[#allocation54_spill] sm:$0xff] }
 0x2c1   :  { %v1679_v4 = vmul.f32 %v4539_v19, %v1631_v0  ;;  %7348 = vst [vmem:[#allocation33_spill] sm:$0xff] %v4869_v56  ;;  %v687_v16 = vadd.f32 %v655_v59, %v7212_v41  ;;  %v933_v24 = vadd.f32 %v901_v1, %v692_v2  ;;  %v927_v10 = vadd.f32 %v895_v63, %v686_v23  ;;  %v7389_v17 = vld [vmem:[#allocation181_spill] sm:$0xff] }
 0x2c2   :  { %v772_v6 = vsel %vm760_vm4, %v7314_v25, %v7349_v15  ;;  %7350 = vst [vmem:[#allocation132_spill] sm:$0xff] %v4877_v21  ;;  %1800 = vrot.lane.b32.xlu1 %v7351_v46, %s2901_s18  ;;  %v610_v0 = vmul.f32 %v7307_v48, %v523_v28  ;;  %v1094_v22 = vmul.f32 %v7288_v61, %v1017_v62  ;;  %v7353_v28 = vld [vmem:[#allocation138_spill] sm:$0xff] }
 0x2c3   :  { %v849_v41 = vmul.f32 %v7328_v52, %v792_v60  ;;  %v4884_v2 = vadd.f32 %v1679_v4, %v1470_v42  ;;  %v4886_v23 = vadd.f32 %v1135_v47, %v926_v50  ;;  %v921_v59 = vadd.f32 %v889_v57, %v680_v36  ;;  %v4898_v47 = vpop.permute.xlu1 %1993  ;;  %v7354_v36 = vld [vmem:[#allocation143_spill] sm:$0xff]  ;;  %v7355_v57 = vld [vmem:[#allocation146_spill] sm:$0xff] }
 0x2c4   :  { %v611_v25 = vmul.f32 %v7320_v37, %v519_v3  ;;  %v656_v1 = vmul.f32 %v7250_v31, %v604_v38  ;;  %1557 = vrot.lane.b32.xlu0 %v7352_v7, %s2898_s15  ;;  %v928_v63 = vadd.f32 %v896_v20, %v687_v16  ;;  %v661_v35 = vmul.f32 %v7250_v31, %v609_v54  ;;  %v7356_v20 = vld [vmem:[#allocation149_spill] sm:$0xff]  ;;  %v7357_v54 = vld [vmem:[#allocation144_spill] sm:$0xff]  ;;  %v7360_v42 = vld [vmem:[#allocation10_spill] sm:$0xff] }
 0x2c5   :  { %v768_v52 = vsel %vm760_vm4, %v7349_v15, %v7353_v28  ;;  %v854_v62 = vmul.f32 %v7315_v9, %v772_v6  ;;  %v1009_v38 = vsel %vm1001_vm5, %v7355_v57, %v7354_v36  ;;  %v1013_v50 = vsel %vm1001_vm5, %v7344_v29, %v7355_v57  ;;  %v4915_v6 = vpop.permute.xlu0 %1750  ;;  %v7376_v9 = vld [vmem:[#allocation159_spill] sm:$0xff] }
 0x2c6   :  { %v1033_v60 = vsel %vm1001_vm5, %v7356_v20, %v7254_v51  ;;  %v4913_v3 = vsub.s32 6, %v7357_v54  ;;  %7359 = vst [vmem:[#allocation133_spill] sm:$0xff] %v4915_v6  ;;  %2230 = vrot.lane.b32.xlu1 %v7360_v42, %s2905_s4  ;;  %v4920_v4 = vadd.f32 %v4791_v58, %v927_v10  ;;  %v662_v16 = vmul.f32 %v7250_v31, %v610_v0  ;;  %v7361_v10 = vld [vmem:[#allocation80_spill] sm:$0xff] }
 0x2c7   :  { %v1142_v29 = vmul.f32 %v7273_v44, %v1094_v22  ;;  %v897_v15 = vmul.f32 %v7257_v26, %v849_v41  ;;  %v663_v57 = vmul.f32 %v7250_v31, %v611_v25  ;;  %v688_v51 = vadd.f32 %v656_v1, %v7260_v12  ;;  %v4938_v41 = vpop.permute.xlu1 %1995 }
 0x2c8   :  { %7358 = vst [vmem:[#allocation94_spill] sm:$0xff] %v4913_v3  ;;  %v855_v19 = vmul.f32 %v7324_v14, %v768_v52  ;;  %v764_v42 = vsel %vm760_vm4, %v7353_v28, %v7346_v45  ;;  %2027 = vrot.lane.b32.xlu0 %v7361_v10, %s2903_s29  ;;  %v902_v58 = vmul.f32 %v7257_v26, %v854_v62  ;;  %v4950_v28 = vld [vmem:[%s6528_s1 + $0x8] sm:$0xff] }
 0x2c9   :  { %v1095_v0 = vmul.f32 %v7308_v27, %v1013_v50  ;;  %v1096_v22 = vmul.f32 %v7309_v18, %v1009_v38  ;;  %v1090_v31 = vmul.f32 %v7312_v8, %v1033_v60  ;;  %v4941_v25 = vadd.f32 %v4798_v11, %v921_v59  ;;  %v1759_v8 = vpop.permute.xlu0 %1758  ;;  %v7362_v62 = vld [vmem:[#allocation9_spill] sm:$0xff]  ;;  %v7377_v18 = vld [vmem:[#allocation167_spill] sm:$0xff] }
 0x2ca   :  { %v4944_v1 = vadd.f32 %v4801_v40, %v928_v63  ;;  %v693_v45 = vadd.f32 %v661_v35, %v7260_v12  ;;  %v4954_v52 = vrot.slane %v4950_v28, %v4913_v3  ;;  %2238 = vrot.lane.b32.xlu1 %v7362_v62, %s2905_s4  ;;  %v4959_v11 = vadd.f32 %v662_v16, %v7260_v12  ;;  %v7373_v62 = vld [vmem:[#allocation82_spill] sm:$0xff] }
 0x2cb   :  { %v856_v40 = vmul.f32 %v7329_v33, %v764_v42  ;;  %v929_v59 = vadd.f32 %v897_v15, %v688_v51  ;;  %v1826_v63 = vsel %vm1804_vm7, %v4915_v6, %v1759_v8  ;;  %v4965_v35 = vadd.f32 %v1142_v29, %v933_v24  ;;  %v7370_v29 = vld [vmem:[#allocation153_spill] sm:$0xff]  ;;  %v7372_v42 = vld [vmem:[#allocation155_spill] sm:$0xff] }
 0x2cc   :  { %7363 = vst [vmem:[#allocation126_spill] sm:$0xff] %v4959_v11  ;;  %v4968_v38 = vadd.f32 %v663_v57, %v7260_v12  ;;  %v4971_v50 = vmul.f32 %v7257_v26, %v855_v19  ;;  %v1878_v60 = vmul.f32 %v4954_v52, %v1826_v63  ;;  %2035 = vrot.lane.b32.xlu0 %v7230_v55, %s2903_s29  ;;  %v4985_v12 = vpop.permute.xlu1 %2003  ;;  %v7371_v19 = vld [vmem:[#allocation90_spill] sm:$0xff]  ;;  %v7424_v11 = vld [vmem:[#allocation61_spill] sm:$0xff]  ;;  %v7427_v6 = vld [vmem:[#allocation31_spill] sm:$0xff] }
 0x2cd   :  { %7364 = vst [vmem:[#allocation128_spill] sm:$0xff] %v4965_v35  ;;  %v4976_v16 = vadd.f32 %v902_v58, %v693_v45  ;;  %v4979_v15 = vmul.f32 %v7273_v44, %v1095_v0  ;;  %v4982_v51 = vmul.f32 %v7273_v44, %v1096_v22  ;;  %v1138_v24 = vmul.f32 %v7273_v44, %v1090_v31  ;;  %v2825_v0 = vld [vmem:[%s6528_s1 + $0x10] sm:$0xff]  ;;  %v1767_v45 = vpop.permute.xlu0 %1766 }
 0x2ce   :  { %7365 = vst [vmem:[#allocation127_spill] sm:$0xff] %v4968_v38  ;;  %7366 = vst [vmem:[#allocation130_spill] sm:$0xff] %v4971_v50  ;;  %v1270_v57 = vsel %vm1242_vm2, %v7371_v19, %v7370_v29  ;;  %v1269_v58 = vsel %vm1242_vm2, %v7373_v62, %v7372_v42  ;;  %v4999_v22 = vrot.slane %v2825_v0, %v4913_v3  ;;  %2246 = vrot.lane.b32.xlu1 %v7335_v32, %s2905_s4  ;;  %v7378_v32 = vld [vmem:[#allocation161_spill] sm:$0xff] }
 0x2cf   :  { %7367 = vst [vmem:[#allocation72_spill] sm:$0xff] %v4976_v16  ;;  %7368 = vst [vmem:[#allocation135_spill] sm:$0xff] %v4979_v15  ;;  %v1926_v31 = vmul.f32 %v4675_v5, %v1878_v60  ;;  %v5005_v63 = vmul.f32 %v7257_v26, %v856_v40  ;;  %v5011_v33 = vsel %vm1001_vm5, %v7354_v36, %v7356_v20  ;;  %v7380_v20 = vld [vmem:[#allocation150_spill] sm:$0xff]  ;;  %v7414_v38 = vld [vmem:[#allocation125_spill] sm:$0xff] }
 0x2d0   :  { %7369 = vst [vmem:[#allocation193_spill] sm:$0xff] %v4982_v51  ;;  %7375 = vst [vmem:[#allocation137_spill] sm:$0xff] %v5011_v33  ;;  %v1170_v37 = vadd.f32 %v1138_v24, %v929_v59  ;;  %v1822_v14 = vsel %vm1804_vm7, %v1759_v8, %v1767_v45  ;;  %v1266_v60 = vsel %vm1242_vm2, %v7370_v29, %v7376_v9  ;;  %2043 = vrot.lane.b32.xlu0 %v7243_v53, %s2903_s29  ;;  %v7381_v29 = vld [vmem:[#allocation189_spill] sm:$0xff] }
 0x2d1   :  { %7374 = vst [vmem:[#allocation71_spill] sm:$0xff] %v5005_v63  ;;  %v1261_v26 = vsel %vm1242_vm2, %v7378_v32, %v7377_v18  ;;  %v5024_v40 = vadd.f32 %v1926_v31, %v4588_v34  ;;  %v1879_v36 = vmul.f32 %v4999_v22, %v1822_v14  ;;  %v1332_v8 = vmul.f32 %v7380_v20, %v1270_v57  ;;  %v5039_v18 = vpop.permute.xlu1 %2011  ;;  %v7382_v14 = vld [vmem:[#allocation165_spill] sm:$0xff]  ;;  %v7383_v57 = vld [vmem:[#allocation188_spill] sm:$0xff]  ;;  %v7410_v63 = vld [vmem:[#allocation191_spill] sm:$0xff] }
 0x2d2   :  { %v1324_v59 = vmul.f32 %v7380_v20, %v1269_v58  ;;  %v1265_v24 = vsel %vm1242_vm2, %v7372_v42, %v7378_v32  ;;  %v1273_v34 = vsel %vm1242_vm2, %v7381_v29, %v7373_v62  ;;  %v1262_v31 = vsel %vm1242_vm2, %v7376_v9, %v7382_v14  ;;  %v2826_v42 = vld [vmem:[%s6528_s1 + $0x18] sm:$0xff]  ;;  %v5056_v20 = vpop.permute.xlu0 %1774  ;;  %v7385_v29 = vld [vmem:[#allocation36_spill] sm:$0xff] }
 0x2d3   :  { %7379 = vst [vmem:[#allocation184_spill] sm:$0xff] %v5024_v40  ;;  %v1274_v58 = vsel %vm1242_vm2, %v7383_v57, %v7371_v19  ;;  %v5053_v32 = vrot.slane %v2826_v42, %v4913_v3  ;;  %v1927_v62 = vmul.f32 %v4675_v5, %v1879_v36  ;;  %7384 = vst [vmem:[#allocation192_spill] sm:$0xff] %v5056_v20  ;;  %2254 = vrot.lane.b32.xlu1 %v7385_v29, %s2905_s4  ;;  %v7386_v9 = vld [vmem:[#allocation156_spill] sm:$0xff]  ;;  %v7387_v40 = vld [vmem:[#allocation162_spill] sm:$0xff] }
 0x2d4   :  { %v1333_v14 = vmul.f32 %v7386_v9, %v1266_v60  ;;  %v1326_v27 = vmul.f32 %v7387_v40, %v1261_v26  ;;  %v5063_v19 = vsub.s32 7, %v7357_v54  ;;  %v1818_v57 = vsel %vm1804_vm7, %v1767_v45, %v5056_v20  ;;  %1782 = vrot.lane.b32.xlu0 %v7332_v49, %s2901_s18  ;;  %v7391_v26 = vld [vmem:[#allocation197_spill] sm:$0xff] }
 0x2d5   :  { %v1325_v48 = vmul.f32 %v7386_v9, %v1265_v24  ;;  %v1323_v36 = vmul.f32 %v7389_v17, %v1273_v34  ;;  %v5071_v61 = vadd.f32 %v1927_v62, %v4590_v43  ;;  %v1880_v29 = vmul.f32 %v5053_v32, %v1818_v57  ;;  %v5080_v20 = vpop.permute.xlu1 %2019  ;;  %v7393_v24 = vld [vmem:[#allocation199_spill] sm:$0xff] }
 0x2d6   :  { %7388 = vst [vmem:[#allocation136_spill] sm:$0xff] %v5063_v19  ;;  %v1334_v60 = vmul.f32 %v7387_v40, %v1262_v31  ;;  %v1331_v54 = vmul.f32 %v7389_v17, %v1274_v58  ;;  %v1374_v51 = vmul.f32 %v7391_v26, %v1326_v27  ;;  %v1372_v45 = vmul.f32 %v7391_v26, %v1324_v59  ;;  %v5086_v57 = vpop.permute.xlu0 %2147  ;;  %v2827_v27 = vld [vmem:[%s6528_s1] sm:$0xff] }
 0x2d7   :  { %7390 = vst [vmem:[#allocation8_spill] sm:$0xff] %v5071_v61  ;;  %7392 = vst [vmem:[#allocation131_spill] sm:$0xff] %v5080_v20  ;;  %v1381_v34 = vmul.f32 %v7393_v24, %v1333_v14  ;;  %v1373_v43 = vmul.f32 %v7391_v26, %v1325_v48  ;;  %v1371_v62 = vmul.f32 %v7391_v26, %v1323_v36  ;;  %2222 = vrot.lane.b32.xlu1 %v7317_v13, %s2905_s4  ;;  %v7396_v13 = vld [vmem:[#allocation160_spill] sm:$0xff]  ;;  %v7429_v20 = vld [vmem:[#allocation21_spill] sm:$0xff] }
 0x2d8   :  { %v1928_v9 = vmul.f32 %v4675_v5, %v1880_v29  ;;  %7394 = vst [vmem:[#allocation139_spill] sm:$0xff] %v5086_v57  ;;  %v1382_v17 = vmul.f32 %v7393_v24, %v1334_v60  ;;  %v5095_v40 = vrot.slane %v2827_v27, %v4913_v3  ;;  %v1379_v48 = vmul.f32 %v7393_v24, %v1331_v54  ;;  %v7398_v14 = vld [vmem:[#allocation172_spill] sm:$0xff]  ;;  %v7399_v60 = vld [vmem:[#allocation22_spill] sm:$0xff]  ;;  %v7400_v54 = vld [vmem:[#allocation95_spill] sm:$0xff] }
 0x2d9   :  { %v5099_v59 = vrot.slane %v2825_v0, %v5063_v19  ;;  %v1380_v31 = vmul.f32 %v7393_v24, %v1332_v8  ;;  %v5103_v58 = vrot.slane %v2826_v42, %v5063_v19  ;;  %1790 = vrot.lane.b32.xlu0 %v7347_v30, %s2901_s18  ;;  %v1375_v36 = vmul.f32 %v7391_v26, %v7398_v14  ;;  %v5121_v42 = vpop.permute.xlu1 %2396  ;;  %v7405_v14 = vld [vmem:[#allocation42_spill] sm:$0xff]  ;;  %v7426_v24 = vld [vmem:[#allocation204_spill] sm:$0xff] }
 0x2da   :  { %v5106_v29 = vadd.f32 %v1928_v9, %v7396_v13  ;;  %v1406_v61 = vadd.f32 %v1374_v51, %v7399_v60  ;;  %v1404_v57 = vadd.f32 %v1372_v45, %v7400_v54  ;;  %v5116_v0 = vrot.slane %v4950_v28, %v5063_v19  ;;  %7402 = vst [vmem:[#allocation81_spill] sm:$0xff] %v5121_v42  ;;  %v7403_v9 = vld [vmem:[#allocation15_spill] sm:$0xff]  ;;  %v7406_v51 = vld [vmem:[#allocation177_spill] sm:$0xff]  ;;  %v5131_v44 = vpop.permute.xlu0 %2392 }
 0x2db   :  { %7395 = vst [vmem:[#allocation77_spill] sm:$0xff] %v5103_v58  ;;  %v5119_v8 = vrot.slane %v2827_v27, %v5063_v19  ;;  %v1413_v13 = vadd.f32 %v1381_v34, %v7403_v9  ;;  %v1403_v35 = vadd.f32 %v1371_v62, %v4941_v25  ;;  %1539 = vrot.lane.b32.xlu1 %v7405_v14, %s2898_s15  ;;  %v7407_v60 = vld [vmem:[#allocation63_spill] sm:$0xff]  ;;  %7408 = vst [vmem:[#allocation142_spill] sm:$0xff] %v5131_v44  ;;  %v7413_v62 = vld [vmem:[#allocation18_spill] sm:$0xff] }
 0x2dc   :  { %7397 = vst [vmem:[#allocation186_spill] sm:$0xff] %v5106_v29  ;;  %v7404_v29 = vld [vmem:[#allocation163_spill] sm:$0xff]  ;;  %v1376_v45 = vmul.f32 %v7391_v26, %v7406_v51  ;;  %v1414_v28 = vadd.f32 %v1382_v17, %v7407_v60  ;;  %v1411_v54 = vadd.f32 %v1379_v48, %v1170_v37  ;;  %v1378_v34 = vmul.f32 %v7391_v26, %v7410_v63  ;;  %v7415_v37 = vld [vmem:[#allocation124_spill] sm:$0xff]  ;;  %v7417_v51 = vld [vmem:[#allocation210_spill] sm:$0xff] }
 0x2dd   :  { %7401 = vst [vmem:[#allocation164_spill] sm:$0xff] %v5119_v8  ;;  %v1405_v3 = vadd.f32 %v1373_v43, %v7404_v29  ;;  %v7409_v27 = vld [vmem:[#allocation183_spill] sm:$0xff]  ;;  %v7412_v29 = vld [vmem:[#allocation202_spill] sm:$0xff]  ;;  %v1412_v15 = vadd.f32 %v1380_v31, %v7414_v38  ;;  %1798 = vrot.lane.b32.xlu0 %v7352_v7, %s2901_s18  ;;  %v1407_v17 = vadd.f32 %v1375_v36, %v7415_v37  ;;  %v7416_v48 = vld [vmem:[#allocation56_spill] sm:$0xff]  ;;  %v5153_v16 = vpop.permute.xlu1 %1985 }
 0x2de   :  { %v1377_v19 = vmul.f32 %v7391_v26, %v7409_v27  ;;  %v7411_v43 = vld [vmem:[#allocation19_spill] sm:$0xff]  ;;  %v1452_v9 = vmul.f32 %v7412_v29, %v7413_v62  ;;  %v1587_v60 = vsel %vm1563_vm6, %v7417_v51, %v7416_v48  ;;  %v7418_v27 = vld [vmem:[#allocation17_spill] sm:$0xff]  ;;  %v7419_v26 = vld [vmem:[#allocation16_spill] sm:$0xff]  ;;  %7420 = vst [vmem:[#allocation11_spill] sm:$0xff] %v5153_v16  ;;  %v1408_v36 = vadd.f32 %v1376_v45, %v4886_v23  ;;  %v5170_v21 = vpop.permute.xlu0 %2242 }
 0x2df   :  { %v1454_v25 = vmul.f32 %v7412_v29, %v7411_v43  ;;  %v1453_v63 = vmul.f32 %v7412_v29, %v7418_v27  ;;  %v1451_v43 = vmul.f32 %v7412_v29, %v7419_v26  ;;  %v7421_v62 = vld [vmem:[#allocation59_spill] sm:$0xff]  ;;  %v7423_v37 = vld [vmem:[#allocation64_spill] sm:$0xff]  ;;  %v1457_v5 = vmul.f32 %v7412_v29, %v7424_v11 }
 0x2e0   :  { %v1455_v38 = vmul.f32 %v7412_v29, %v7421_v62  ;;  %v7422_v31 = vld [vmem:[#allocation39_spill] sm:$0xff]  ;;  %v1456_v50 = vmul.f32 %v7412_v29, %v7423_v37  ;;  %v1458_v27 = vmul.f32 %v7412_v29, %v7351_v46  ;;  %v1462_v62 = vmul.f32 %v7426_v24, %v7427_v6  ;;  %v7428_v45 = vld [vmem:[#allocation32_spill] sm:$0xff]  ;;  %v7430_v29 = vld [vmem:[#allocation30_spill] sm:$0xff] }
 0x2e1   :  { %1547 = vrot.lane.b32.xlu1 %v7422_v31, %s2898_s15  ;;  %v7425_v26 = vld [vmem:[#allocation23_spill] sm:$0xff]  ;;  %v1409_v8 = vadd.f32 %v1377_v19, %v4920_v4  ;;  %v1410_v23 = vadd.f32 %v1378_v34, %v4944_v1  ;;  %v1653_v16 = vmul.f32 %v7428_v45, %v1587_v60  ;;  %v5175_v42 = vadd.f32 %v1454_v25, %v1406_v61  ;;  %v1749_v1 = vpop.permute.xlu1 %1748  ;;  %v7432_v61 = vld [vmem:[#allocation208_spill] sm:$0xff]  ;;  %v7433_v34 = vld [vmem:[#allocation205_spill] sm:$0xff] }
 0x2e2   :  { %v1461_v33 = vmul.f32 %v7426_v24, %v7425_v26  ;;  %v1459_v44 = vmul.f32 %v7426_v24, %v7429_v20  ;;  %v1460_v58 = vmul.f32 %v7426_v24, %v7430_v29  ;;  %2268 = vrot.lane.b32.xlu0 %v7361_v10, %s2905_s4  ;;  %v5183_v6 = vadd.f32 %v1452_v9, %v1404_v57  ;;  %v7434_v25 = vld [vmem:[#allocation43_spill] sm:$0xff]  ;;  %v7438_v9 = vld [vmem:[#allocation45_spill] sm:$0xff]  ;;  %v7456_v10 = vld [vmem:[#allocation84_spill] sm:$0xff] }
 0x2e3   :  { %v5185_v26 = vadd.f32 %v1453_v63, %v1405_v3  ;;  %v5187_v4 = vadd.f32 %v1451_v43, %v1403_v35  ;;  %v5189_v19 = vadd.f32 %v1455_v38, %v1407_v17  ;;  %v1590_v20 = vsel %vm1563_vm6, %v7433_v34, %v7432_v61  ;;  %v7437_v3 = vld [vmem:[#allocation207_spill] sm:$0xff]  ;;  %v7440_v38 = vld [vmem:[#allocation66_spill] sm:$0xff] }
 0x2e4   :  { %v5197_v60 = vadd.f32 %v1456_v50, %v1408_v36  ;;  %v5199_v29 = vadd.f32 %v1457_v5, %v1409_v8  ;;  %v5201_v57 = vadd.f32 %v1458_v27, %v1410_v23  ;;  %v1591_v35 = vsel %vm1563_vm6, %v7437_v3, %v7417_v51  ;;  %v5215_v50 = vpop.permute.xlu0 %2250  ;;  %v5225_v51 = vld [vmem:[%s6528_s1 + $0x20] sm:$0xff] }
 0x2e5   :  { %7431 = vst [vmem:[#allocation140_spill] sm:$0xff] %v5187_v4  ;;  %1555 = vrot.lane.b32.xlu1 %v7434_v25, %s2898_s15  ;;  %v1586_v17 = vsel %vm1563_vm6, %v7432_v61, %v7438_v9  ;;  %v5211_v63 = vadd.f32 %v1461_v33, %v1413_v13  ;;  %v5213_v43 = vadd.f32 %v1462_v62, %v1414_v28  ;;  %7441 = vst [vmem:[#allocation141_spill] sm:$0xff] %v5225_v51  ;;  %v7442_v27 = vld [vmem:[#allocation12_spill] sm:$0xff]  ;;  %v7444_v13 = vld [vmem:[#allocation26_spill] sm:$0xff] }
 0x2e6   :  { %7435 = vst [vmem:[#allocation60_spill] sm:$0xff] %v5199_v29  ;;  %7436 = vst [vmem:[#allocation79_spill] sm:$0xff] %v5201_v57  ;;  %v5217_v5 = vadd.f32 %v1459_v44, %v1411_v54  ;;  %v1492_v8 = vadd.f32 %v1460_v58, %v1412_v15  ;;  %v1701_v36 = vmul.f32 %v7440_v38, %v1653_v16  ;;  %2276 = vrot.lane.b32.xlu0 %v7230_v55, %s2905_s4  ;;  %v7445_v62 = vld [vmem:[#allocation65_spill] sm:$0xff]  ;;  %v7446_v16 = vld [vmem:[#allocation76_spill] sm:$0xff]  ;;  %v1757_v58 = vpop.permute.xlu1 %1756 }
 0x2e7   :  { %v5229_v33 = vrot.slane %v5225_v51, %v7442_v27  ;;  %v1644_v28 = vmul.f32 %v7444_v13, %v1590_v20  ;;  %v1582_v44 = vsel %vm1563_vm6, %v7438_v9, %v7445_v62  ;;  %v1583_v15 = vsel %vm1563_vm6, %v7416_v48, %v7446_v16  ;;  %v5243_v54 = vld [vmem:[%s6528_s1 + $0x28] sm:$0xff]  ;;  %v5258_v48 = vld [vmem:[%s6528_s1 + $0x30] sm:$0xff]  ;;  %v5278_v51 = vld [vmem:[%s6528_s1 + $0x38] sm:$0xff] }
 0x2e8   :  { %7439 = vst [vmem:[#allocation134_spill] sm:$0xff] %v5217_v5  ;;  %7447 = vst [vmem:[#allocation147_spill] sm:$0xff] %v5243_v54  ;;  %v5247_v23 = vrot.slane %v5243_v54, %v7442_v27  ;;  %v1652_v61 = vmul.f32 %v7444_v13, %v1591_v35  ;;  %v1645_v20 = vmul.f32 %v7428_v45, %v1586_v17  ;;  %v7451_v54 = vld [vmem:[#allocation85_spill] sm:$0xff]  ;;  %v7452_v35 = vld [vmem:[#allocation92_spill] sm:$0xff]  ;;  %v5273_v55 = vpop.permute.xlu0 %2258 }
 0x2e9   :  { %7443 = vst [vmem:[#allocation86_spill] sm:$0xff] %v5229_v33  ;;  %v1825_v9 = vsel %vm1804_vm7, %v1749_v1, %v1757_v58  ;;  %2025 = vrot.lane.b32.xlu1 %v7423_v37, %s2903_s29  ;;  %7449 = vst [vmem:[#allocation138_spill] sm:$0xff] %v5258_v48  ;;  %v5262_v3 = vrot.slane %v5258_v48, %v7442_v27  ;;  %v1579_v45 = vsel %vm1563_vm6, %v7446_v16, %v7451_v54  ;;  %v7459_v4 = vld [vmem:[#allocation88_spill] sm:$0xff]  ;;  %v7460_v57 = vld [vmem:[#allocation37_spill] sm:$0xff] }
 0x2ea   :  { %7448 = vst [vmem:[#allocation145_spill] sm:$0xff] %v5247_v23  ;;  %v1578_v17 = vsel %vm1563_vm6, %v7445_v62, %v7452_v35  ;;  %v1870_v13 = vmul.f32 %v4954_v52, %v1825_v9  ;;  %7453 = vst [vmem:[#allocation146_spill] sm:$0xff] %v5273_v55  ;;  %v5282_v48 = vrot.slane %v5278_v51, %v7442_v27  ;;  %2284 = vrot.lane.b32.xlu0 %v7243_v53, %s2905_s4  ;;  %v7458_v9 = vld [vmem:[#allocation75_spill] sm:$0xff] }
 0x2eb   :  { %7450 = vst [vmem:[#allocation143_spill] sm:$0xff] %v5262_v3  ;;  %7454 = vst [vmem:[#allocation149_spill] sm:$0xff] %v5278_v51  ;;  %v1646_v16 = vmul.f32 %v7456_v10, %v1582_v44  ;;  %v1654_v54 = vmul.f32 %v7456_v10, %v1583_v15  ;;  %v5287_v24 = vmul.f32 %v7440_v38, %v1652_v61  ;;  %v7461_v51 = vld [vmem:[#allocation96_spill] sm:$0xff]  ;;  %v1765_v15 = vpop.permute.xlu1 %1764  ;;  %v7465_v29 = vld [vmem:[#allocation151_spill] sm:$0xff] }
 0x2ec   :  { %7455 = vst [vmem:[#allocation144_spill] sm:$0xff] %v5282_v48  ;;  %v5289_v62 = vadd.f32 %v1701_v36, %v1492_v8  ;;  %v1693_v5 = vmul.f32 %v7458_v9, %v1645_v20  ;;  %v1827_v27 = vsel %vm1804_vm7, %v7460_v57, %v7459_v4  ;;  %v1823_v10 = vsel %vm1804_vm7, %v7459_v4, %v7461_v51  ;;  %v7462_v8 = vld [vmem:[#allocation27_spill] sm:$0xff]  ;;  %v7463_v20 = vld [vmem:[#allocation13_spill] sm:$0xff] }
 0x2ed   :  { %7457 = vst [vmem:[#allocation10_spill] sm:$0xff] %v5287_v24  ;;  %v1918_v44 = vmul.f32 %v4869_v56, %v1870_v13  ;;  %v1655_v36 = vmul.f32 %v7462_v8, %v1579_v45  ;;  %v1647_v61 = vmul.f32 %v7462_v8, %v1578_v17  ;;  %v1819_v53 = vsel %vm1804_vm7, %v7461_v51, %v7463_v20  ;;  %v5322_v8 = vpop.permute.xlu0 %1740 }
 0x2ee   :  { %v1821_v24 = vsel %vm1804_vm7, %v1757_v58, %v1765_v15  ;;  %2033 = vrot.lane.b32.xlu1 %v7424_v11, %s2903_s29  ;;  %v1694_v4 = vmul.f32 %v7458_v9, %v1646_v16  ;;  %v5316_v13 = vmul.f32 %v7458_v9, %v1644_v28  ;;  %7467 = vst [vmem:[#allocation90_spill] sm:$0xff] %v5322_v8  ;;  %v7469_v28 = vld [vmem:[#allocation196_spill] sm:$0xff] }
 0x2ef   :  { %v5319_v45 = vadd.f32 %v1918_v44, %v7465_v29  ;;  %v1871_v17 = vmul.f32 %v4999_v22, %v1821_v24  ;;  %v1702_v51 = vmul.f32 %v7440_v38, %v1654_v54  ;;  %v1886_v20 = vmul.f32 %v4954_v52, %v1827_v27  ;;  %2023 = vrot.lane.b32.xlu0 %v7332_v49, %s2903_s29  ;;  %v7468_v24 = vld [vmem:[#allocation97_spill] sm:$0xff]  ;;  %v5340_v44 = vpop.permute.xlu1 %1772 }
 0x2f0   :  { %7464 = vst [vmem:[#allocation9_spill] sm:$0xff] %v5316_v13  ;;  %v1887_v58 = vmul.f32 %v4999_v22, %v1823_v10  ;;  %v1829_v16 = vsel %vm1804_vm7, %v5322_v8, %v1749_v1  ;;  %v1888_v29 = vmul.f32 %v5053_v32, %v1819_v53  ;;  %v1828_v54 = vsel %vm1804_vm7, %v7469_v28, %v7468_v24 }
 0x2f1   :  { %7466 = vst [vmem:[#allocation153_spill] sm:$0xff] %v5319_v45  ;;  %v1919_v27 = vmul.f32 %v4869_v56, %v1871_v17  ;;  %v1869_v10 = vmul.f32 %v5095_v40, %v1829_v16  ;;  %7470 = vst [vmem:[#allocation155_spill] sm:$0xff] %v5340_v44  ;;  %v1703_v1 = vmul.f32 %v7440_v38, %v1655_v36  ;;  %v7471_v45 = vld [vmem:[#allocation93_spill] sm:$0xff]  ;;  %v7472_v17 = vld [vmem:[#allocation148_spill] sm:$0xff] }
 0x2f2   :  { %v1695_v8 = vmul.f32 %v7458_v9, %v1647_v61  ;;  %v1824_v53 = vsel %vm1804_vm7, %v7468_v24, %v7471_v45  ;;  %v1817_v13 = vsel %vm1804_vm7, %v1765_v15, %v5340_v44  ;;  %2041 = vrot.lane.b32.xlu1 %v7351_v46, %s2903_s29  ;;  %v1820_v16 = vsel %vm1804_vm7, %v7471_v45, %v7472_v17  ;;  %v7473_v36 = vld [vmem:[#allocation157_spill] sm:$0xff]  ;;  %v5362_v24 = vpop.permute.xlu0 %2226  ;;  %v7476_v15 = vld [vmem:[#allocation152_spill] sm:$0xff] }
 0x2f3   :  { %v5358_v38 = vadd.f32 %v1919_v27, %v7473_v36  ;;  %v1917_v61 = vmul.f32 %v4869_v56, %v1869_v10  ;;  %v1872_v11 = vmul.f32 %v5053_v32, %v1817_v13  ;;  %7475 = vst [vmem:[#allocation159_spill] sm:$0xff] %v5362_v24  ;;  %v1725_v37 = vadd.f32 %v1693_v5, %v5183_v6  ;;  %v7477_v10 = vld [vmem:[#allocation14_spill] sm:$0xff] }
 0x2f4   :  { %v1934_v44 = vmul.f32 %v7476_v15, %v1886_v20  ;;  %v1935_v46 = vmul.f32 %v7476_v15, %v1887_v58  ;;  %v1894_v48 = vmul.f32 %v4954_v52, %v1828_v54  ;;  %2031 = vrot.lane.b32.xlu0 %v7347_v30, %s2903_s29  ;;  %v1936_v45 = vmul.f32 %v7476_v15, %v1888_v29  ;;  %v7480_v58 = vld [vmem:[#allocation198_spill] sm:$0xff]  ;;  %v7481_v29 = vld [vmem:[#allocation91_spill] sm:$0xff]  ;;  %v5415_v54 = vld [vmem:[%s6528_s1 + $0x48] ss:$0 sm:$0xff] }
 0x2f5   :  { %7474 = vst [vmem:[#allocation82_spill] sm:$0xff] %v5358_v38  ;;  %v1895_v27 = vmul.f32 %v4999_v22, %v1824_v53  ;;  %v5373_v36 = vadd.f32 %v1917_v61, %v7477_v10  ;;  %v1920_v13 = vmul.f32 %v4869_v56, %v1872_v11  ;;  %v5376_v38 = vpop.permute.xlu1 %2143  ;;  %v1734_v6 = vadd.f32 %v1702_v51, %v5211_v63  ;;  %v7489_v56 = vld [vmem:[#allocation129_spill] sm:$0xff] }
 0x2f6   :  { %7479 = vst [vmem:[#allocation161_spill] sm:$0xff] %v5376_v38  ;;  %v1735_v5 = vadd.f32 %v1703_v1, %v5213_v43  ;;  %v1726_v52 = vadd.f32 %v1694_v4, %v5185_v26  ;;  %v1896_v20 = vmul.f32 %v5053_v32, %v1820_v16  ;;  %1780 = vrot.lane.b32.xlu1 %v7405_v14, %s2901_s18  ;;  %v1544_v26 = vpop.permute.xlu0 %1543  ;;  %v7483_v4 = vld [vmem:[#allocation87_spill] sm:$0xff]  ;;  %v7484_v16 = vld [vmem:[#allocation89_spill] sm:$0xff] }
 0x2f7   :  { %7478 = vst [vmem:[#allocation167_spill] sm:$0xff] %v5373_v36  ;;  %v1727_v22 = vadd.f32 %v1695_v8, %v5175_v42  ;;  %v1832_v11 = vsel %vm1804_vm7, %v7480_v58, %v7469_v28  ;;  %v2068_v63 = vsel %vm2045_vm8, %v4898_v47, %v7481_v29  ;;  %v5394_v43 = vadd.f32 %v1920_v13, %v4884_v2 }
 0x2f8   :  { %v1966_v32 = vadd.f32 %v1934_v44, %v1725_v37  ;;  %v1942_v51 = vmul.f32 %v7483_v4, %v1894_v48  ;;  %v2069_v42 = vsel %vm2045_vm8, %v4938_v41, %v4985_v12  ;;  %v1574_v8 = vsel %vm1563_vm6, %v7452_v35, %v1544_v26  ;;  %2039 = vrot.lane.b32.xlu0 %v7352_v7, %s2903_s29 }
 0x2f9   :  { %7482 = vst [vmem:[#allocation150_spill] sm:$0xff] %v5394_v43  ;;  %v5406_v28 = vadd.f32 %v1935_v46, %v1726_v52  ;;  %v5408_v2 = vadd.f32 %v1936_v45, %v1727_v22  ;;  %v1943_v37 = vmul.f32 %v7483_v4, %v1895_v27  ;;  %v1648_v48 = vmul.f32 %v5229_v33, %v1574_v8  ;;  %v5417_v44 = vpop.permute.xlu1 %2234  ;;  %v7485_v45 = vld [vmem:[#allocation154_spill] sm:$0xff] }
 0x2fa   :  { %v5420_v35 = vmul.f32 %v5095_v40, %v1832_v11  ;;  %v1944_v1 = vmul.f32 %v7483_v4, %v1896_v20  ;;  %v2127_v46 = vmul.f32 %v5116_v0, %v2068_v63  ;;  %v2309_v53 = vsel %vm2286_vm9, %v5417_v44, %v5170_v21  ;;  %1788 = vrot.lane.b32.xlu1 %v7422_v31, %s2901_s18  ;;  %v1552_v52 = vpop.permute.xlu0 %1551  ;;  %v7486_v22 = vld [vmem:[#allocation74_spill] sm:$0xff] }
 0x2fb   :  { %v1831_v61 = vsel %vm1804_vm7, %v7484_v16, %v7460_v57  ;;  %v2064_v27 = vsel %vm2045_vm8, %v7481_v29, %v7485_v45  ;;  %v2135_v10 = vmul.f32 %v5116_v0, %v2069_v42  ;;  %v1696_v13 = vmul.f32 %v7458_v9, %v1648_v48 }
 0x2fc   :  { %v1974_v20 = vadd.f32 %v1942_v51, %v5289_v62  ;;  %v2060_v11 = vsel %vm2045_vm8, %v7485_v45, %v7486_v22  ;;  %v2368_v63 = vmul.f32 %v5415_v54, %v2309_v53  ;;  %v1570_v57 = vsel %vm1563_vm6, %v1544_v26, %v1552_v52  ;;  %2264 = vrot.lane.b32.xlu0 %v7332_v49, %s2905_s4  ;;  %v7487_v45 = vld [vmem:[#allocation99_spill] sm:$0xff] }
 0x2fd   :  { %v1975_v29 = vadd.f32 %v1943_v37, %v1734_v6  ;;  %v2065_v42 = vsel %vm2045_vm8, %v4985_v12, %v5039_v18  ;;  %v5455_v62 = vadd.f32 %v1696_v13, %v5189_v19  ;;  %v1649_v51 = vmul.f32 %v5247_v23, %v1570_v57  ;;  %v5458_v8 = vpop.permute.xlu1 %2236  ;;  %v7488_v37 = vld [vmem:[#allocation77_spill] sm:$0xff]  ;;  %v5472_v13 = vld [vmem:[%s6528_s1 + $0x58] ss:$0 sm:$0xff] }
 0x2fe   :  { %v5460_v48 = vadd.f32 %v1944_v1, %v1735_v5  ;;  %v1885_v26 = vmul.f32 %v5095_v40, %v1831_v61  ;;  %v2128_v53 = vmul.f32 %v5099_v59, %v2064_v27  ;;  %v2175_v6 = vmul.f32 %v7487_v45, %v2127_v46  ;;  %1796 = vrot.lane.b32.xlu1 %v7434_v25, %s2901_s18  ;;  %v1560_v46 = vpop.permute.xlu0 %1559  ;;  %v7491_v27 = vld [vmem:[#allocation142_spill] sm:$0xff] }
 0x2ff   :  { %v2129_v12 = vmul.f32 %v7488_v37, %v2060_v11  ;;  %v2183_v19 = vmul.f32 %v7489_v56, %v2135_v10  ;;  %7490 = vst [vmem:[#allocation189_spill] sm:$0xff] %v5472_v13  ;;  %v2301_v5 = vsel %vm2286_vm9, %v5215_v50, %v5273_v55  ;;  %v1697_v1 = vmul.f32 %v7458_v9, %v1649_v51  ;;  %v5491_v55 = vld [vmem:[%s6528_s1 + $0x50] ss:$0 sm:$0xff]  ;;  %v7492_v51 = vld [vmem:[#allocation144_spill] sm:$0xff] }
 0x300   :  { %v2136_v61 = vmul.f32 %v5099_v59, %v2065_v42  ;;  %v2416_v57 = vmul.f32 %v7491_v27, %v2368_v63  ;;  %v1566_v10 = vsel %vm1563_vm6, %v1552_v52, %v1560_v46  ;;  %v1594_v11 = vsel %vm1563_vm6, %v1560_v46, %v7433_v34  ;;  %2272 = vrot.lane.b32.xlu0 %v7347_v30, %s2905_s4  ;;  %v7493_v30 = vld [vmem:[#allocation131_spill] sm:$0xff] }
 0x301   :  { %v2305_v63 = vsel %vm2286_vm9, %v5170_v21, %v5215_v50  ;;  %v5498_v42 = vadd.f32 %v1697_v1, %v5197_v60  ;;  %v1650_v52 = vmul.f32 %v5262_v3, %v1566_v10  ;;  %v1651_v34 = vmul.f32 %v7492_v51, %v1594_v11  ;;  %v2245_v46 = vpop.permute.xlu1 %2244  ;;  %v7494_v60 = vld [vmem:[#allocation64_spill] sm:$0xff] }
 0x302   :  { %v2207_v22 = vadd.f32 %v2175_v6, %v1966_v32  ;;  %v2061_v49 = vsel %vm2045_vm8, %v5039_v18, %v7493_v30  ;;  %v2370_v36 = vmul.f32 %v5472_v13, %v2301_v5  ;;  %v2310_v21 = vsel %vm2286_vm9, %v5458_v8, %v2245_v46  ;;  %2266 = vrot.lane.b32.xlu1 %v7494_v60, %s2905_s4  ;;  %v5516_v10 = vpop.permute.xlu0 %1989 }
 0x303   :  { %v2177_v50 = vmul.f32 %v7487_v45, %v2129_v12  ;;  %v1698_v1 = vmul.f32 %v7458_v9, %v1650_v52  ;;  %v1699_v32 = vmul.f32 %v7458_v9, %v1651_v34  ;;  %v2376_v6 = vmul.f32 %v5415_v54, %v2310_v21  ;;  %v7495_v12 = vld [vmem:[#allocation60_spill] sm:$0xff]  ;;  %v7496_v52 = vld [vmem:[#allocation79_spill] sm:$0xff]  ;;  %v7497_v34 = vld [vmem:[#allocation81_spill] sm:$0xff] }
 0x304   :  { %v2215_v18 = vadd.f32 %v2183_v19, %v1974_v20  ;;  %v2184_v5 = vmul.f32 %v7489_v56, %v2136_v61  ;;  %v2369_v11 = vmul.f32 %v5491_v55, %v2305_v63  ;;  %v2448_v30 = vadd.f32 %v2416_v57, %v2207_v22  ;;  %2280 = vrot.lane.b32.xlu0 %v7352_v7, %s2905_s4  ;;  %v7498_v19 = vld [vmem:[#allocation11_spill] sm:$0xff]  ;;  %v7499_v57 = vld [vmem:[#allocation61_spill] sm:$0xff] }
 0x305   :  { %v2137_v60 = vmul.f32 %v7488_v37, %v2061_v49  ;;  %v5524_v43 = vadd.f32 %v1698_v1, %v7495_v12  ;;  %v5527_v9 = vadd.f32 %v1699_v32, %v7496_v52  ;;  %v2424_v21 = vmul.f32 %v7497_v34, %v2376_v6  ;;  %v2253_v38 = vpop.permute.xlu1 %2252  ;;  %v7530_v7 = vld [vmem:[#allocation85_spill] sm:$0xff] }
 0x306   :  { %v2176_v20 = vmul.f32 %v7487_v45, %v2128_v53  ;;  %v2072_v22 = vsel %vm2045_vm8, %v7498_v19, %v4898_v47  ;;  %v2418_v61 = vmul.f32 %v7491_v27, %v2370_v36  ;;  %v2306_v49 = vsel %vm2286_vm9, %v2245_v46, %v2253_v38  ;;  %2274 = vrot.lane.b32.xlu1 %v7499_v57, %s2905_s4  ;;  %v5543_v6 = vpop.permute.xlu0 %1997  ;;  %v5549_v36 = vld [vmem:[%s6528_s1 + $0x40] ss:$0 sm:$0xff]  ;;  %v7585_v37 = vld [vmem:[#allocation25_spill] sm:$0xff] }
 0x307   :  { %v1933_v63 = vmul.f32 %v7476_v15, %v1885_v26  ;;  %v2209_v1 = vadd.f32 %v2177_v50, %v5408_v2  ;;  %v2456_v32 = vadd.f32 %v2424_v21, %v2215_v18  ;;  %v2377_v53 = vmul.f32 %v5491_v55, %v2306_v49  ;;  %7500 = vst [vmem:[#allocation165_spill] sm:$0xff] %v5549_v36  ;;  %v7501_v50 = vld [vmem:[#allocation164_spill] sm:$0xff] }
 0x308   :  { %v2216_v12 = vadd.f32 %v2184_v5, %v1975_v29  ;;  %v2417_v47 = vmul.f32 %v7491_v27, %v2369_v11  ;;  %v2313_v26 = vsel %vm2286_vm9, %v5362_v24, %v5417_v44  ;;  %v2480_v46 = vmax.f32 %v2448_v30, 0.0  ;;  %v7503_v21 = vld [vmem:[#allocation132_spill] sm:$0xff]  ;;  %v7504_v44 = vld [vmem:[#allocation67_spill] sm:$0xff] }
 0x309   :  { %v2185_v2 = vmul.f32 %v7489_v56, %v2137_v60  ;;  %v2126_v18 = vmul.f32 %v7501_v50, %v2072_v22  ;;  %v2425_v52 = vmul.f32 %v7497_v34, %v2377_v53  ;;  %v5558_v29 = vpop.permute.xlu1 %2260  ;;  %v2488_v5 = vmax.f32 %v2456_v32, 0.0 }
 0x30a   :  { %7502 = vst [vmem:[#allocation188_spill] sm:$0xff] %v5558_v29  ;;  %v2208_v11 = vadd.f32 %v2176_v20, %v5406_v28  ;;  %v2073_v49 = vsel %vm2045_vm8, %v7503_v21, %v4938_v41  ;;  %v2450_v57 = vadd.f32 %v2418_v61, %v2209_v1  ;;  %v2302_v30 = vsel %vm2286_vm9, %v2253_v38, %v5558_v29  ;;  %v5572_v53 = vpop.permute.xlu0 %2005  ;;  %v7505_v41 = vld [vmem:[#allocation140_spill] sm:$0xff]  ;;  %v7506_v61 = vld [vmem:[#allocation9_spill] sm:$0xff]  ;;  %v7515_v21 = vld [vmem:[#allocation199_spill] sm:$0xff] }
 0x30b   :  { %2282 = vrot.lane.b32.xlu1 %v7504_v44, %s2905_s4  ;;  %v2367_v60 = vmul.f32 %v5549_v36, %v2313_v26  ;;  %v2457_v22 = vadd.f32 %v2425_v52, %v2216_v12  ;;  %v2378_v32 = vmul.f32 %v5472_v13, %v2302_v30  ;;  %v2520_v28 = vmin.f32 %v2488_v5, 6.0  ;;  %v7508_v5 = vld [vmem:[#allocation133_spill] sm:$0xff] }
 0x30c   :  { %v1941_v20 = vmul.f32 %v7483_v4, %v5420_v35  ;;  %v1724_v1 = vadd.f32 %v7506_v61, %v7505_v41  ;;  %v2449_v24 = vadd.f32 %v2417_v47, %v2208_v11  ;;  %v2512_v19 = vmin.f32 %v2480_v46, 6.0  ;;  %v7512_v61 = vld [vmem:[#allocation134_spill] sm:$0xff] }
 0x30d   :  { %v2134_v38 = vmul.f32 %v7501_v50, %v2073_v49  ;;  %v2217_v44 = vadd.f32 %v2185_v2, %v5460_v48  ;;  %v2174_v26 = vmul.f32 %v7487_v45, %v2126_v18  ;;  %v2426_v12 = vmul.f32 %v7497_v34, %v2378_v32  ;;  %v5582_v52 = vpop.permute.xlu1 %1742  ;;  %v7510_v32 = vld [vmem:[#allocation137_spill] sm:$0xff]  ;;  %v7513_v45 = vld [vmem:[#allocation10_spill] sm:$0xff] }
 0x30e   :  { %7507 = vst [vmem:[#allocation156_spill] sm:$0xff] %v5582_v52  ;;  %v2489_v30 = vmax.f32 %v2457_v22, 0.0  ;;  %v1830_v35 = vsel %vm1804_vm7, %v5582_v52, %v7508_v5  ;;  %v2537_v47 = vpack.c.bf16 %v2520_v28, %v2512_v19  ;;  %v2482_v46 = vmax.f32 %v2450_v57, 0.0  ;;  %v5592_v49 = vpop.permute.xlu0 %2013  ;;  %v7511_v22 = vld [vmem:[#allocation180_spill] sm:$0xff]  ;;  %v7514_v52 = vld [vmem:[#allocation171_spill] sm:$0xff] }
 0x30f   :  { %2021 = vrot.lane.b32.xlu1 %v7405_v14, %s2903_s29  ;;  %v1965_v11 = vadd.f32 %v1933_v63, %v1724_v1  ;;  %v2415_v48 = vmul.f32 %v7491_v27, %v2367_v60  ;;  %v2458_v2 = vadd.f32 %v2426_v12, %v2217_v44  ;;  %v1877_v18 = vmul.f32 %v5095_v40, %v1830_v35  ;;  %v7516_v60 = vld [vmem:[#allocation38_spill] sm:$0xff] }
 0x310   :  { %7509 = vst [vmem:[#allocation162_spill] sm:$0xff] %v5592_v49  ;;  %v1097_v41 = vmul.f32 %v7511_v22, %v7510_v32  ;;  %v1732_v29 = vadd.f32 %v7513_v45, %v7512_v61  ;;  %v2481_v5 = vmax.f32 %v2449_v24, 0.0  ;;  %2566 = vmatprep.subr.bf16.mxu0 %v2537_v47  ;;  %v1383_v19 = vmul.f32 %v7515_v21, %v7514_v52  ;;  %v7518_v35 = vld [vmem:[#allocation50_spill] sm:$0xff]  ;;  %v7526_v61 = vld [vmem:[#allocation71_spill] sm:$0xff] }
 0x311   :  { %v2182_v63 = vmul.f32 %v7489_v56, %v2134_v38  ;;  %v2206_v57 = vadd.f32 %v2174_v26, %v1965_v11  ;;  %v1925_v28 = vmul.f32 %v7516_v60, %v1877_v18  ;;  %v5602_v1 = vpop.permute.xlu1 %2228  ;;  %v2490_v40 = vmax.f32 %v2458_v2, 0.0  ;;  %v7523_v2 = vld [vmem:[#allocation72_spill] sm:$0xff]  ;;  %v7524_v18 = vld [vmem:[#allocation135_spill] sm:$0xff] }
 0x312   :  { %7517 = vst [vmem:[#allocation181_spill] sm:$0xff] %v5602_v1  ;;  %v1973_v44 = vadd.f32 %v1941_v20, %v1732_v29  ;;  %v2521_v12 = vmin.f32 %v2489_v30, 6.0  ;;  %v2314_v45 = vsel %vm2286_vm9, %v5602_v1, %v5458_v8  ;;  %v2514_v24 = vmin.f32 %v2482_v46, 6.0  ;;  %v5614_v47 = vpop.permute.xlu0 %2384  ;;  %v7521_v29 = vld [vmem:[#allocation126_spill] sm:$0xff]  ;;  %v7525_v8 = vld [vmem:[#allocation127_spill] sm:$0xff]  ;;  %v7529_v60 = vld [vmem:[#allocation40_spill] sm:$0xff] }
 0x313   :  { %2029 = vrot.lane.b32.xlu1 %v7422_v31, %s2903_s29  ;;  %v2447_v52 = vadd.f32 %v2415_v48, %v2206_v57  ;;  %v5611_v38 = vadd.f32 %v1925_v28, %v7518_v35  ;;  %v2375_v26 = vmul.f32 %v5549_v36, %v2314_v45  ;;  %7520 = vst [vmem:[#allocation160_spill] sm:$0xff] %v5614_v47  ;;  %v2522_v11 = vmin.f32 %v2490_v40, 6.0  ;;  %v7522_v20 = vld [vmem:[#allocation130_spill] sm:$0xff]  ;;  %v7528_v28 = vld [vmem:[#allocation204_spill] sm:$0xff]  ;;  %v7582_v47 = vld [vmem:[#allocation111_spill] sm:$0xff] }
 0x314   :  { %v935_v30 = vadd.f32 %v7522_v20, %v7521_v29  ;;  %v1175_v32 = vadd.f32 %v7524_v18, %v7523_v2  ;;  %v936_v27 = vadd.f32 %v7526_v61, %v7525_v8  ;;  %v2513_v1 = vmin.f32 %v2481_v5, 6.0  ;;  %v7527_v57 = vld [vmem:[#allocation70_spill] sm:$0xff]  ;;  %v7531_v2 = vld [vmem:[#allocation176_spill] sm:$0xff] }
 0x315   :  { %7519 = vst [vmem:[#allocation197_spill] sm:$0xff] %v5611_v38  ;;  %v2214_v46 = vadd.f32 %v2182_v63, %v1973_v44  ;;  %v2423_v48 = vmul.f32 %v7497_v34, %v2375_v26  ;;  %v1463_v35 = vmul.f32 %v7528_v28, %v7527_v57  ;;  %v1546_v45 = vpop.permute.xlu1 %1545  ;;  %v2539_v56 = vpack.c.bf16 %v2522_v11, %v2514_v24  ;;  %v7532_v26 = vld [vmem:[#allocation128_spill] sm:$0xff]  ;;  %v7579_v38 = vld [vmem:[#allocation107_spill] sm:$0xff]  ;;  %v7581_v36 = vld [vmem:[#allocation170_spill] sm:$0xff] }
 0x316   :  { %v1145_v40 = vmul.f32 %v7529_v60, %v1097_v41  ;;  %v1575_v29 = vsel %vm1563_vm6, %v7530_v7, %v1546_v45  ;;  %v2538_v20 = vpack.c.bf16 %v2521_v12, %v2513_v1  ;;  %v1384_v5 = vmul.f32 %v7515_v21, %v7531_v2  ;;  %v5635_v24 = vpop.permute.xlu0 %1983  ;;  %v7534_v41 = vld [vmem:[#allocation193_spill] sm:$0xff]  ;;  %v7535_v7 = vld [vmem:[#allocation80_spill] sm:$0xff]  ;;  %v7536_v1 = vld [vmem:[#allocation182_spill] sm:$0xff] }
 0x317   :  { %2037 = vrot.lane.b32.xlu1 %v7434_v25, %s2903_s29  ;;  %v2479_v63 = vmax.f32 %v2447_v52, 0.0  ;;  %v2455_v44 = vadd.f32 %v2423_v48, %v2214_v46  ;;  %v1415_v18 = vadd.f32 %v1383_v19, %v7532_v26  ;;  %v1656_v8 = vmul.f32 %v5229_v33, %v1575_v29  ;;  %7533 = vst [vmem:[#allocation172_spill] sm:$0xff] %v5635_v24  ;;  %v7537_v46 = vld [vmem:[#allocation66_spill] sm:$0xff]  ;;  %v7539_v29 = vld [vmem:[#allocation141_spill] sm:$0xff]  ;;  %v7586_v24 = vld [vmem:[#allocation112_spill] sm:$0xff] }
 0x318   :  { %2607 = vmatprep.subr.bf16.mxu1 %v2539_v56  ;;  %v1176_v60 = vadd.f32 %v7534_v41, %v935_v30  ;;  %v1177_v11 = vadd.f32 %v1145_v40, %v936_v27  ;;  %v1464_v61 = vmul.f32 %v7528_v28, %v7535_v7  ;;  %v1385_v12 = vmul.f32 %v7515_v21, %v7536_v1  ;;  %v7538_v2 = vld [vmem:[#allocation94_spill] sm:$0xff]  ;;  %v7541_v30 = vld [vmem:[#allocation73_spill] sm:$0xff] }
 0x319   :  { %2608 = vmatpush1.bf16.msra.mxu1 %v2538_v20  ;;  %v2487_v57 = vmax.f32 %v2455_v44, 0.0  ;;  %v1495_v52 = vadd.f32 %v1463_v35, %v1415_v18  ;;  %v1704_v48 = vmul.f32 %v7537_v46, %v1656_v8  ;;  %v1554_v19 = vpop.permute.xlu1 %1553  ;;  %v5645_v26 = vrot.slane %v7539_v29, %v7538_v2  ;;  %v7542_v20 = vld [vmem:[#allocation190_spill] sm:$0xff]  ;;  %v7578_v33 = vld [vmem:[#allocation57_spill] sm:$0xff] }
 0x31a   :  { %v1416_v56 = vadd.f32 %v1384_v5, %v1175_v32  ;;  %v1571_v27 = vsel %vm1563_vm6, %v1546_v45, %v1554_v19  ;;  %v1465_v40 = vmul.f32 %v7528_v28, %v7541_v30  ;;  %v1386_v35 = vmul.f32 %v7515_v21, %v7542_v20  ;;  %v1787_v7 = vpop.permute.xlu0 %1786  ;;  %v7543_v45 = vld [vmem:[#allocation83_spill] sm:$0xff] }
 0x31b   :  { %7540 = vst [vmem:[#allocation22_spill] sm:$0xff] %v5645_v26  ;;  %2262 = vrot.lane.b32.xlu1 %v7405_v14, %s2905_s4  ;;  %v2511_v44 = vmin.f32 %v2479_v63, 6.0  ;;  %v2519_v18 = vmin.f32 %v2487_v57, 6.0  ;;  %v1736_v8 = vadd.f32 %v1704_v48, %v1495_v52  ;;  %v1657_v41 = vmul.f32 %v5247_v23, %v1571_v27  ;;  %v7544_v63 = vld [vmem:[#allocation147_spill] sm:$0xff]  ;;  %v7576_v14 = vld [vmem:[#allocation106_spill] sm:$0xff] }
 0x31c   :  { %v1496_v1 = vadd.f32 %v1464_v61, %v1416_v56  ;;  %v1816_v32 = vsel %vm1804_vm7, %v7472_v17, %v1787_v7  ;;  %v1466_v5 = vmul.f32 %v7528_v28, %v7543_v45  ;;  %v1417_v29 = vadd.f32 %v1385_v12, %v1176_v60  ;;  %v7546_v17 = vld [vmem:[#allocation207_spill] sm:$0xff] }
 0x31d   :  { %v1705_v30 = vmul.f32 %v7537_v46, %v1657_v41  ;;  %v1897_v34 = vmul.f32 %v5645_v26, %v1816_v32  ;;  %v1562_v21 = vpop.permute.xlu1 %1561  ;;  %v5665_v57 = vrot.slane %v7544_v63, %v7538_v2  ;;  %v2536_v52 = vpack.c.bf16 %v2519_v18, %v2511_v44  ;;  %v7549_v18 = vld [vmem:[#allocation149_spill] sm:$0xff] }
 0x31e   :  { %v1418_v48 = vadd.f32 %v1386_v35, %v1177_v11  ;;  %v1497_v61 = vadd.f32 %v1465_v40, %v1417_v29  ;;  %v1567_v56 = vsel %vm1563_vm6, %v1554_v19, %v1562_v21  ;;  %v1595_v28 = vsel %vm1563_vm6, %v1562_v21, %v7546_v17  ;;  %v1795_v44 = vpop.permute.xlu0 %1794  ;;  %v7547_v40 = vld [vmem:[#allocation138_spill] sm:$0xff] }
 0x31f   :  { %7545 = vst [vmem:[#allocation95_spill] sm:$0xff] %v5665_v57  ;;  %2270 = vrot.lane.b32.xlu1 %v7422_v31, %s2905_s4  ;;  %v1737_v60 = vadd.f32 %v1705_v30, %v1496_v1  ;;  %v1945_v12 = vmul.f32 %v7483_v4, %v1897_v34  ;;  %v1658_v27 = vmul.f32 %v5262_v3, %v1567_v56  ;;  %v7573_v3 = vld [vmem:[#allocation24_spill] sm:$0xff] }
 0x320   :  { %v1659_v20 = vmul.f32 %v7492_v51, %v1595_v28  ;;  %2567 = vmatpush1.bf16.msra.mxu0 %v2536_v52  ;;  %v1498_v11 = vadd.f32 %v1466_v5, %v1418_v48  ;;  %v1812_v19 = vsel %vm1804_vm7, %v1787_v7, %v1795_v44  ;;  %v5681_v35 = vrot.slane %v7547_v40, %v7538_v2  ;;  %v7553_v28 = vld [vmem:[#allocation101_spill] sm:$0xff]  ;;  %v7559_v40 = vld [vmem:[#allocation58_spill] sm:$0xff] }
 0x321   :  { %v5685_v41 = vrot.slane %v7549_v18, %v7538_v2  ;;  %v5687_v1 = vadd.f32 %v1945_v12, %v1736_v8  ;;  %v1706_v34 = vmul.f32 %v7537_v46, %v1658_v27  ;;  %v1898_v45 = vmul.f32 %v5665_v57, %v1812_v19  ;;  %v5692_v5 = vpop.permute.xlu1 %1991  ;;  %v7554_v12 = vld [vmem:[#allocation55_spill] sm:$0xff]  ;;  %v7558_v19 = vld [vmem:[#allocation105_spill] sm:$0xff] }
 0x322   :  { %7548 = vst [vmem:[#allocation15_spill] sm:$0xff] %v5681_v35  ;;  %v1707_v32 = vmul.f32 %v7537_v46, %v1659_v20  ;;  %v1803_v21 = vpop.permute.xlu0 %1802  ;;  %v528_v27 = vsel %vm515_vm3, %v7554_v12, %v7553_v28  ;;  %v7566_v12 = vld [vmem:[#allocation103_spill] sm:$0xff] }
 0x323   :  { %7550 = vst [vmem:[#allocation163_spill] sm:$0xff] %v5685_v41  ;;  %7551 = vst [vmem:[#allocation177_spill] sm:$0xff] %v5687_v1  ;;  %2278 = vrot.lane.b32.xlu1 %v7434_v25, %s2905_s4  ;;  %v1738_v7 = vadd.f32 %v1706_v34, %v1497_v61  ;;  %v1946_v30 = vmul.f32 %v7483_v4, %v1898_v45  ;;  %v1808_v2 = vsel %vm1804_vm7, %v1795_v44, %v1803_v21  ;;  %v7557_v44 = vld [vmem:[#allocation53_spill] sm:$0xff]  ;;  %v7572_v1 = vld [vmem:[#allocation46_spill] sm:$0xff] }
 0x324   :  { %v1739_v29 = vadd.f32 %v1707_v32, %v1498_v11  ;;  %v1836_v8 = vsel %vm1804_vm7, %v1803_v21, %v7480_v58  ;;  %v1899_v63 = vmul.f32 %v5681_v35, %v1808_v2  ;;  %v584_v11 = vmul.f32 %v7557_v44, %v528_v27  ;;  %v7560_v32 = vld [vmem:[#allocation175_spill] sm:$0xff]  ;;  %v7562_v2 = vld [vmem:[#allocation100_spill] sm:$0xff]  ;;  %v7567_v27 = vld [vmem:[#allocation109_spill] sm:$0xff] }
 0x325   :  { %v5702_v46 = vadd.f32 %v1946_v30, %v1737_v60  ;;  %v1900_v52 = vmul.f32 %v5685_v41, %v1836_v8  ;;  %v5706_v48 = vpop.permute.xlu1 %1999  ;;  %v7561_v30 = vld [vmem:[#allocation29_spill] sm:$0xff]  ;;  %v516_v50 = vsel %vm515_vm3, %v7566_v12, %v7582_v47 }
 0x326   :  { %v1947_v61 = vmul.f32 %v7483_v4, %v1899_v63  ;;  %v5710_v17 = vpop.permute.xlu0 %2232  ;;  %v7563_v8 = vld [vmem:[#allocation49_spill] sm:$0xff] }
 0x327   :  { %7552 = vst [vmem:[#allocation63_spill] sm:$0xff] %v5702_v46  ;;  %v1948_v56 = vmul.f32 %v7483_v4, %v1900_v52  ;;  %v773_v4 = vsel %vm760_vm4, %v7559_v40, %v7558_v19  ;;  %v1014_v63 = vsel %vm1001_vm5, %v7563_v8, %v7562_v2  ;;  %v7564_v52 = vld [vmem:[#allocation108_spill] sm:$0xff]  ;;  %v524_v40 = vsel %vm515_vm3, %v7553_v28, %v7567_v27 }
 0x328   :  { %v5716_v58 = vadd.f32 %v1947_v61, %v1738_v7  ;;  %v829_v45 = vmul.f32 %v7560_v32, %v773_v4  ;;  %v636_v7 = vmul.f32 %v7561_v30, %v584_v11  ;;  %v7565_v61 = vld [vmem:[#allocation62_spill] sm:$0xff]  ;;  %v520_v11 = vsel %vm515_vm3, %v7567_v27, %v7566_v12  ;;  %v7570_v8 = vld [vmem:[#allocation104_spill] sm:$0xff]  ;;  %v7574_v27 = vld [vmem:[#allocation113_spill] sm:$0xff] }
 0x329   :  { %v5718_v60 = vadd.f32 %v1948_v56, %v1739_v29  ;;  %v5720_v20 = vpop.permute.xlu1 %2007  ;;  %v2544_v29 = vld [vmem:[%s6534_s7] sm:$0xff]  ;;  %v529_v56 = vsel %vm515_vm3, %v7565_v61, %v7564_v52  ;;  %v7571_v61 = vld [vmem:[#allocation35_spill] sm:$0xff]  ;;  %v1070_v51 = vmul.f32 %v7572_v1, %v1014_v63  ;;  %v769_v25 = vsel %vm760_vm4, %v7558_v19, %v7574_v27 }
 0x32a   :  { %7555 = vst [vmem:[#allocation183_spill] sm:$0xff] %v5716_v58  ;;  %v5727_v18 = vpop.permute.xlu0 %2240  ;;  %2547 = vperm.xlu1 %2816, %v2544_v29   ;;  %v1010_v29 = vsel %vm1001_vm5, %v7562_v2, %v7570_v8  ;;  %v877_v46 = vmul.f32 %v7571_v61, %v829_v45  ;;  %v668_v23 = vadd.f32 %v636_v7, %v7573_v3  ;;  %v7580_v7 = vld [vmem:[#allocation166_spill] sm:$0xff] }
 0x32b   :  { %7556 = vst [vmem:[#allocation191_spill] sm:$0xff] %v5718_v60  ;;  %v7569_v60 = vld [vmem:[#allocation102_spill] sm:$0xff]  ;;  %v592_v28 = vmul.f32 %v7557_v44, %v529_v56  ;;  %v586_v63 = vmul.f32 %v7578_v33, %v520_v11  ;;  %v765_v44 = vsel %vm760_vm4, %v7574_v27, %v7579_v38  ;;  %v1071_v56 = vmul.f32 %v7580_v7, %v1010_v29  ;;  %v7587_v27 = vld [vmem:[#allocation68_spill] sm:$0xff] }
 0x32c   :  { %v1006_v58 = vsel %vm1001_vm5, %v7570_v8, %v7569_v60  ;;  %v1002_v2 = vsel %vm1001_vm5, %v7569_v60, %v7576_v14  ;;  %v7577_v8 = vld [vmem:[#allocation48_spill] sm:$0xff]  ;;  %v909_v14 = vadd.f32 %v877_v46, %v668_v23  ;;  %v774_v29 = vsel %vm760_vm4, %v7587_v27, %v7586_v24 }
 0x32d   :  { %v5729_v34 = vpop.permute.xlu1 %2015  ;;  %v585_v45 = vmul.f32 %v7577_v8, %v524_v40  ;;  %v1072_v19 = vmul.f32 %v7581_v36, %v1006_v58  ;;  %v7584_v60 = vld [vmem:[#allocation212_spill] sm:$0xff]  ;;  %v1073_v11 = vmul.f32 %v7511_v22, %v1002_v2  ;;  %v7588_v58 = vld [vmem:[#allocation213_spill] sm:$0xff]  ;;  %v638_v23 = vmul.f32 %v7561_v30, %v586_v63 }
 0x32e   :  { %v5733_v21 = vpop.permute.xlu0 %2248  ;;  %v830_v40 = vmul.f32 %v7584_v60, %v769_v25  ;;  %v831_v36 = vmul.f32 %v7588_v58, %v765_v44  ;;  %v7591_v25 = vld [vmem:[#allocation211_spill] sm:$0xff]  ;;  %v7594_v22 = vld [vmem:[#allocation116_spill] sm:$0xff]  ;;  %v7596_v63 = vld [vmem:[#allocation13_spill] sm:$0xff] }
 0x32f   :  { %v637_v12 = vmul.f32 %v7561_v30, %v585_v45  ;;  %v587_v46 = vmul.f32 %v7591_v25, %v516_v50  ;;  %v525_v44 = vsel %vm515_vm3, %v7564_v52, %v7594_v22 }
 0x330   :  { %v878_v45 = vmul.f32 %v7571_v61, %v830_v40  ;;  %v670_v40 = vadd.f32 %v638_v23, %v7573_v3 }
 0x331   :  { %v5754_v4 = vpop.permute.xlu1 %2388 }
 0x332   :  { %7568 = vst [vmem:[#allocation19_spill] sm:$0xff] %v5754_v4  ;;  %v5772_v31 = vpop.permute.xlu0 %2256  ;;  %v7590_v4 = vld [vmem:[#allocation34_spill] sm:$0xff] }
 0x333   :  { %7575 = vst [vmem:[#allocation202_spill] sm:$0xff] %v5772_v31  ;;  %v644_v31 = vmul.f32 %v7585_v37, %v592_v28  ;;  %v1118_v47 = vmul.f32 %v7590_v4, %v1070_v51  ;;  %v5807_v2 = vmul.f32 %v7590_v4, %v1071_v56  ;;  %v5810_v28 = vmul.f32 %v7590_v4, %v1072_v19  ;;  %v7597_v19 = vld [vmem:[#allocation20_spill] sm:$0xff] }
 0x334   :  { %v837_v51 = vmul.f32 %v7560_v32, %v774_v29  ;;  %v5824_v56 = vmul.f32 %v7590_v4, %v1073_v11  ;;  %v669_v32 = vadd.f32 %v637_v12, %v7573_v3  ;;  %v5836_v29 = vmul.f32 %v7561_v30, %v587_v46  ;;  %v7598_v4 = vld [vmem:[#allocation115_spill] sm:$0xff]  ;;  %v7599_v11 = vld [vmem:[#allocation110_spill] sm:$0xff]  ;;  %v7602_v46 = vld [vmem:[#allocation28_spill] sm:$0xff] }
 0x335   :  { %v5790_v13 = vpop.permute.xlu1 %1981  ;;  %7592 = vst [vmem:[#allocation124_spill] sm:$0xff] %v5807_v2  ;;  %7593 = vst [vmem:[#allocation56_spill] sm:$0xff] %v5810_v28  ;;  %v5816_v58 = vadd.f32 %v1118_v47, %v909_v14  ;;  %v5827_v28 = vadd.f32 %v644_v31, %v7597_v19  ;;  %v879_v2 = vmul.f32 %v7571_v61, %v831_v36 }
 0x336   :  { %7583 = vst [vmem:[#allocation18_spill] sm:$0xff] %v5790_v13  ;;  %v5800_v7 = vpop.permute.xlu0 %2224  ;;  %v593_v47 = vmul.f32 %v7577_v8, %v525_v44  ;;  %v761_v31 = vsel %vm760_vm4, %v7579_v38, %v7598_v4  ;;  %v521_v36 = vsel %vm515_vm3, %v7594_v22, %v7599_v11  ;;  %v5853_v8 = vmul.f32 %v7602_v46, %v837_v51 }
 0x337   :  { %7589 = vst [vmem:[#allocation125_spill] sm:$0xff] %v5800_v7  ;;  %7595 = vst [vmem:[#allocation210_spill] sm:$0xff] %v5816_v58  ;;  %v5855_v44 = vadd.f32 %v878_v45, %v669_v32  ;;  %v7603_v58 = vld [vmem:[#allocation118_spill] sm:$0xff]  ;;  %v5863_v4 = vadd.f32 %v879_v2, %v670_v40 }
 0x338   :  { %v517_v38 = vsel %vm515_vm3, %v7599_v11, %v7603_v58  ;;  %v594_v58 = vmul.f32 %v7578_v33, %v521_v36  ;;  %v2063_v11 = vsel %vm2045_vm8, %v5706_v48, %v5720_v20 }
 0x339   :  { %v1785_v27 = vpop.permute.xlu1 %1784  ;;  %v595_v40 = vmul.f32 %v7591_v25, %v517_v38 }
 0x33a   :  { %v1815_v50 = vsel %vm1804_vm7, %v7596_v63, %v1785_v27  ;;  %v5831_v14 = vpop.permute.xlu0 %1541  ;;  %v7600_v63 = vld [vmem:[#allocation117_spill] sm:$0xff] }
 0x33b   :  { %v1889_v52 = vmul.f32 %v5645_v26, %v1815_v50  ;;  %v7601_v50 = vld [vmem:[#allocation69_spill] sm:$0xff] }
 0x33c   :  { %v1015_v12 = vsel %vm1001_vm5, %v7601_v50, %v7600_v63  ;;  %v7605_v50 = vld [vmem:[#allocation52_spill] sm:$0xff] }
 0x33d   :  { %v1937_v30 = vmul.f32 %v7476_v15, %v1889_v52  ;;  %v1793_v23 = vpop.permute.xlu1 %1792  ;;  %v2067_v52 = vsel %vm2045_vm8, %v5692_v5, %v5706_v48  ;;  %v832_v26 = vmul.f32 %v7605_v50, %v761_v31  ;;  %v1078_v2 = vmul.f32 %v7572_v1, %v1015_v12 }
 0x33e   :  { %v1811_v22 = vsel %vm1804_vm7, %v1785_v27, %v1793_v23  ;;  %v5873_v32 = vpop.permute.xlu0 %1549  ;;  %v645_v27 = vmul.f32 %v7585_v37, %v593_v47  ;;  %v2119_v33 = vmul.f32 %v5116_v0, %v2067_v52  ;;  %v2308_v1 = vsel %vm2286_vm9, %v5710_v17, %v5727_v18 }
 0x33f   :  { %v5870_v51 = vadd.f32 %v1937_v30, %v5455_v62  ;;  %v1890_v45 = vmul.f32 %v5665_v57, %v1811_v22  ;;  %v2066_v62 = vsel %vm2045_vm8, %v5516_v10, %v5543_v6  ;;  %v2304_v48 = vsel %vm2286_vm9, %v5727_v18, %v5733_v21 }
 0x340   :  { %v5914_v52 = vmul.f32 %v7585_v37, %v594_v58  ;;  %v2120_v18 = vmul.f32 %v5099_v59, %v2063_v11  ;;  %v5936_v11 = vmul.f32 %v7585_v37, %v595_v40  ;;  %v2058_v37 = vsel %vm2045_vm8, %v5572_v53, %v5592_v49  ;;  %v7612_v40 = vld [vmem:[#allocation19_spill] sm:$0xff] }
 0x341   :  { %7604 = vst [vmem:[#allocation17_spill] sm:$0xff] %v5870_v51  ;;  %v1938_v31 = vmul.f32 %v7476_v15, %v1890_v45  ;;  %v1801_v30 = vpop.permute.xlu1 %1800 }
 0x342   :  { %v1807_v25 = vsel %vm1804_vm7, %v1793_v23, %v1801_v30  ;;  %v1835_v47 = vsel %vm1804_vm7, %v1801_v30, %v7484_v16  ;;  %v5908_v22 = vpop.permute.xlu0 %1557  ;;  %v5911_v23 = vmul.f32 %v7571_v61, %v832_v26  ;;  %v7607_v16 = vld [vmem:[#allocation41_spill] sm:$0xff]  ;;  %v2062_v26 = vsel %vm2045_vm8, %v5543_v6, %v5572_v53  ;;  %v7608_v61 = vld [vmem:[#allocation139_spill] sm:$0xff]  ;;  %v7616_v53 = vld [vmem:[#allocation184_spill] sm:$0xff] }
 0x343   :  { %v5904_v36 = vadd.f32 %v1938_v31, %v5498_v42  ;;  %v1891_v12 = vmul.f32 %v5681_v35, %v1807_v25  ;;  %v1892_v38 = vmul.f32 %v5685_v41, %v1835_v47  ;;  %v5917_v45 = vmul.f32 %v7607_v16, %v1078_v2  ;;  %v7621_v41 = vld [vmem:[#allocation153_spill] sm:$0xff] }
 0x344   :  { %v5921_v42 = vadd.f32 %v645_v27, %v7597_v19  ;;  %v2111_v31 = vmul.f32 %v5116_v0, %v2066_v62  ;;  %v2167_v58 = vmul.f32 %v7608_v61, %v2119_v33  ;;  %v2360_v2 = vmul.f32 %v5415_v54, %v2308_v1  ;;  %v7611_v33 = vld [vmem:[#allocation120_spill] sm:$0xff] }
 0x345   :  { %7606 = vst [vmem:[#allocation16_spill] sm:$0xff] %v5904_v36  ;;  %v1939_v30 = vmul.f32 %v7476_v15, %v1891_v12  ;;  %v1940_v25 = vmul.f32 %v7476_v15, %v1892_v38  ;;  %v5926_v47 = vpop.permute.xlu1 %2230  ;;  %v2361_v27 = vmul.f32 %v5491_v55, %v2304_v48  ;;  %v2059_v0 = vsel %vm2045_vm8, %v5720_v20, %v5729_v34  ;;  %v7613_v48 = vld [vmem:[#allocation161_spill] sm:$0xff]  ;;  %v7614_v38 = vld [vmem:[#allocation172_spill] sm:$0xff] }
 0x346   :  { %v5948_v6 = vpop.permute.xlu0 %2027  ;;  %v770_v1 = vsel %vm760_vm4, %v7586_v24, %v7611_v33  ;;  %v2168_v20 = vmul.f32 %v7608_v61, %v2120_v18  ;;  %v2159_v12 = vmul.f32 %v7613_v48, %v2111_v31  ;;  %v2199_v49 = vadd.f32 %v2167_v58, %v7616_v53  ;;  %v7617_v18 = vld [vmem:[#allocation77_spill] sm:$0xff] }
 0x347   :  { %v5943_v15 = vadd.f32 %v1939_v30, %v5524_v43  ;;  %v5946_v62 = vadd.f32 %v1940_v25, %v5527_v9  ;;  %v2408_v43 = vmul.f32 %v7612_v40, %v2360_v2  ;;  %v2112_v9 = vmul.f32 %v5099_v59, %v2062_v26  ;;  %v7615_v25 = vld [vmem:[#allocation202_spill] sm:$0xff] }
 0x348   :  { %v2071_v30 = vsel %vm2045_vm8, %v7614_v38, %v5692_v5  ;;  %v2300_v24 = vsel %vm2286_vm9, %v5733_v21, %v7615_v25  ;;  %v2409_v59 = vmul.f32 %v7612_v40, %v2361_v27  ;;  %v7618_v26 = vld [vmem:[#allocation114_spill] sm:$0xff]  ;;  %v838_v2 = vmul.f32 %v7584_v60, %v770_v1  ;;  %v7620_v25 = vld [vmem:[#allocation189_spill] sm:$0xff]  ;;  %v7622_v1 = vld [vmem:[#allocation164_spill] sm:$0xff] }
 0x349   :  { %7609 = vst [vmem:[#allocation59_spill] sm:$0xff] %v5943_v15  ;;  %7610 = vst [vmem:[#allocation23_spill] sm:$0xff] %v5946_v62  ;;  %v2239_v62 = vpop.permute.xlu1 %2238  ;;  %v2121_v15 = vmul.f32 %v7617_v18, %v2059_v0  ;;  %v766_v5 = vsel %vm760_vm4, %v7611_v33, %v7618_v26  ;;  %v2113_v21 = vmul.f32 %v7617_v18, %v2058_v37  ;;  %v7619_v0 = vld [vmem:[#allocation8_spill] sm:$0xff] }
 0x34a   :  { %v2307_v31 = vsel %vm2286_vm9, %v5926_v47, %v2239_v62  ;;  %v5983_v58 = vpop.permute.xlu0 %2035  ;;  %v2200_v53 = vadd.f32 %v2168_v20, %v7619_v0  ;;  %v2362_v36 = vmul.f32 %v7620_v25, %v2300_v24  ;;  %v2312_v27 = vsel %vm2286_vm9, %v5800_v7, %v5710_v17  ;;  %v7623_v18 = vld [vmem:[#allocation160_spill] sm:$0xff]  ;;  %v7626_v0 = vld [vmem:[#allocation121_spill] sm:$0xff] }
 0x34b   :  { %v2352_v38 = vmul.f32 %v5415_v54, %v2307_v31  ;;  %v2440_v51 = vadd.f32 %v2408_v43, %v2199_v49  ;;  %v2191_v33 = vadd.f32 %v2159_v12, %v7621_v41  ;;  %v2160_v60 = vmul.f32 %v7613_v48, %v2112_v9  ;;  %v7624_v43 = vld [vmem:[#allocation213_spill] sm:$0xff] }
 0x34c   :  { %v2118_v37 = vmul.f32 %v7622_v1, %v2071_v30  ;;  %v2169_v35 = vmul.f32 %v7608_v61, %v2121_v15  ;;  %v2070_v20 = vsel %vm2045_vm8, %v5790_v13, %v5516_v10  ;;  %v2441_v49 = vadd.f32 %v2409_v59, %v2200_v53  ;;  %v7625_v12 = vld [vmem:[#allocation165_spill] sm:$0xff]  ;;  %v7627_v59 = vld [vmem:[#allocation82_spill] sm:$0xff] }
 0x34d   :  { %v2400_v54 = vmul.f32 %v7623_v18, %v2352_v38  ;;  %v2247_v31 = vpop.permute.xlu1 %2246  ;;  %v839_v41 = vmul.f32 %v7624_v43, %v766_v5  ;;  %v2359_v9 = vmul.f32 %v7625_v12, %v2312_v27  ;;  %v1011_v15 = vsel %vm1001_vm5, %v7600_v63, %v7626_v0 }
 0x34e   :  { %v2303_v17 = vsel %vm2286_vm9, %v2239_v62, %v2247_v31  ;;  %v6005_v38 = vpop.permute.xlu0 %2043  ;;  %v2161_v10 = vmul.f32 %v7613_v48, %v2113_v21  ;;  %v2410_v13 = vmul.f32 %v7612_v40, %v2362_v36  ;;  %v2472_v62 = vmax.f32 %v2440_v51, 0.0  ;;  %v7630_v36 = vld [vmem:[#allocation122_spill] sm:$0xff] }
 0x34f   :  { %v2432_v24 = vadd.f32 %v2400_v54, %v2191_v33  ;;  %v2353_v30 = vmul.f32 %v5491_v55, %v2303_v17  ;;  %v2192_v53 = vadd.f32 %v2160_v60, %v7627_v59  ;;  %v2166_v5 = vmul.f32 %v7608_v61, %v2118_v37  ;;  %v7629_v54 = vld [vmem:[#allocation186_spill] sm:$0xff] }
 0x350   :  { %v2110_v27 = vmul.f32 %v7622_v1, %v2070_v20  ;;  %v2201_v17 = vadd.f32 %v2169_v35, %v7629_v54  ;;  %v2473_v43 = vmax.f32 %v2441_v49, 0.0  ;;  %v762_v51 = vsel %vm760_vm4, %v7618_v26, %v7630_v36 }
 0x351   :  { %v2401_v55 = vmul.f32 %v7623_v18, %v2353_v30  ;;  %v6017_v33 = vpop.permute.xlu1 %2254  ;;  %v2464_v21 = vmax.f32 %v2432_v24, 0.0  ;;  %v2407_v60 = vmul.f32 %v7612_v40, %v2359_v9  ;;  %v7631_v30 = vld [vmem:[#allocation150_spill] sm:$0xff]  ;;  %v2504_v7 = vmin.f32 %v2472_v62, 6.0 }
 0x352   :  { %7628 = vst [vmem:[#allocation31_spill] sm:$0xff] %v6017_v33  ;;  %v2299_v63 = vsel %vm2286_vm9, %v2247_v31, %v6017_v33  ;;  %v6029_v20 = vpop.permute.xlu0 %1782  ;;  %v2193_v35 = vadd.f32 %v2161_v10, %v7631_v30  ;;  %v2442_v59 = vadd.f32 %v2410_v13, %v2201_v17  ;;  %v7632_v31 = vld [vmem:[#allocation197_spill] sm:$0xff]  ;;  %v2158_v49 = vmul.f32 %v7613_v48, %v2110_v27 }
 0x353   :  { %v2433_v1 = vadd.f32 %v2401_v55, %v2192_v53  ;;  %v2354_v37 = vmul.f32 %v7620_v25, %v2299_v63  ;;  %v2496_v54 = vmin.f32 %v2464_v21, 6.0  ;;  %v2198_v24 = vadd.f32 %v2166_v5, %v7632_v31  ;;  %v7634_v63 = vld [vmem:[#allocation119_spill] sm:$0xff] }
 0x354   :  { %v840_v9 = vmul.f32 %v7605_v50, %v762_v51  ;;  %v2505_v13 = vmin.f32 %v2473_v43, 6.0  ;;  %v886_v17 = vmul.f32 %v7602_v46, %v838_v2  ;;  %v1007_v50 = vsel %vm1001_vm5, %v7626_v0, %v7634_v63  ;;  %v7635_v21 = vld [vmem:[#allocation123_spill] sm:$0xff] }
 0x355   :  { %v2465_v33 = vmax.f32 %v2433_v1, 0.0  ;;  %v2402_v57 = vmul.f32 %v7623_v18, %v2354_v37  ;;  %v6035_v26 = vpop.permute.xlu1 %2222  ;;  %v2529_v10 = vpack.c.bf16 %v2504_v7, %v2496_v54  ;;  %v2439_v53 = vadd.f32 %v2407_v60, %v2198_v24  ;;  %v7637_v60 = vld [vmem:[#allocation166_spill] sm:$0xff] }
 0x356   :  { %7633 = vst [vmem:[#allocation32_spill] sm:$0xff] %v6035_v26  ;;  %v2311_v25 = vsel %vm2286_vm9, %v6035_v26, %v5926_v47  ;;  %v6043_v27 = vpop.permute.xlu0 %1790  ;;  %v1003_v7 = vsel %vm1001_vm5, %v7634_v63, %v7635_v21  ;;  %v2474_v47 = vmax.f32 %v2442_v59, 0.0  ;;  %v678_v51 = vadd.f32 %v5914_v52, %v7597_v19 }
 0x357   :  { %v2497_v62 = vmin.f32 %v2465_v33, 6.0  ;;  %v2434_v55 = vadd.f32 %v2402_v57, %v2193_v35  ;;  %v2351_v5 = vmul.f32 %v7625_v12, %v2311_v25  ;;  %2568 = vmatprep.subr.bf16.mxu0 %v2529_v10  ;;  %v7636_v33 = vld [vmem:[#allocation167_spill] sm:$0xff]  ;;  %v887_v0 = vmul.f32 %v7602_v46, %v839_v41  ;;  %v7639_v10 = vld [vmem:[#allocation180_spill] sm:$0xff] }
 0x358   :  { %v2190_v57 = vadd.f32 %v2158_v49, %v7636_v33  ;;  %v1079_v1 = vmul.f32 %v7637_v60, %v1011_v15  ;;  %v888_v37 = vmul.f32 %v7602_v46, %v840_v9  ;;  %v679_v30 = vadd.f32 %v5936_v11, %v7597_v19  ;;  %v7638_v49 = vld [vmem:[#allocation170_spill] sm:$0xff]  ;;  %v7640_v19 = vld [vmem:[#allocation124_spill] sm:$0xff] }
 0x359   :  { %v2399_v12 = vmul.f32 %v7623_v18, %v2351_v5  ;;  %v6056_v43 = vpop.permute.xlu1 %1539  ;;  %v2466_v36 = vmax.f32 %v2434_v55, 0.0  ;;  %v2530_v2 = vpack.c.bf16 %v2505_v13, %v2497_v62  ;;  %v2471_v35 = vmax.f32 %v2439_v53, 0.0  ;;  %v7641_v5 = vld [vmem:[#allocation56_spill] sm:$0xff]  ;;  %v7646_v60 = vld [vmem:[#allocation98_spill] sm:$0xff] }
 0x35a   :  { %v6065_v54 = vpop.permute.xlu0 %1798  ;;  %v918_v24 = vadd.f32 %v886_v17, %v5921_v42  ;;  %v1080_v25 = vmul.f32 %v7638_v49, %v1007_v50  ;;  %v1081_v52 = vmul.f32 %v7639_v10, %v1003_v7  ;;  %v2506_v13 = vmin.f32 %v2474_v47, 6.0  ;;  %v7642_v7 = vld [vmem:[#allocation168_spill] sm:$0xff]  ;;  %v7643_v47 = vld [vmem:[#allocation194_spill] sm:$0xff] }
 0x35b   :  { %v2431_v59 = vadd.f32 %v2399_v12, %v2190_v57  ;;  %v2498_v31 = vmin.f32 %v2466_v36, 6.0  ;;  %v671_v41 = vadd.f32 %v5836_v29, %v7573_v3  ;;  %v917_v46 = vadd.f32 %v5853_v8, %v5827_v28  ;;  %v7644_v57 = vld [vmem:[#allocation173_spill] sm:$0xff]  ;;  %v7645_v12 = vld [vmem:[#allocation178_spill] sm:$0xff]  ;;  %v6112_v10 = vld [vmem:[%s6533_s6] sm:$0xf] }
 0x35c   :  { %v1151_v11 = vadd.f32 %v7640_v19, %v5855_v44  ;;  %v919_v53 = vadd.f32 %v887_v0, %v678_v51  ;;  %v1127_v42 = vmul.f32 %v7607_v16, %v1079_v1  ;;  %v920_v62 = vadd.f32 %v888_v37, %v679_v30  ;;  %v7647_v1 = vld [vmem:[#allocation185_spill] sm:$0xff]  ;;  %v7648_v30 = vld [vmem:[#allocation44_spill] sm:$0xff]  ;;  %7652 = vst [vmem:[#allocation21_spill] sm:$0xff] %v6112_v10 }
 0x35d   :  { %v2463_v15 = vmax.f32 %v2431_v59, 0.0  ;;  %v6076_v9 = vpop.permute.xlu1 %1547  ;;  %v2531_v55 = vpack.c.bf16 %v2506_v13, %v2498_v31  ;;  %v1152_v17 = vadd.f32 %v7641_v5, %v5863_v4  ;;  %v912_v63 = vadd.f32 %v5911_v23, %v671_v41  ;;  %v7650_v31 = vld [vmem:[#allocation51_spill] sm:$0xff]  ;;  %v7654_v41 = vld [vmem:[#allocation192_spill] sm:$0xff]  ;;  %v7655_v19 = vld [vmem:[#allocation169_spill] sm:$0xff] }
 0x35e   :  { %v2503_v3 = vmin.f32 %v2471_v35, 6.0  ;;  %v6082_v50 = vpop.permute.xlu0 %2268  ;;  %v1158_v28 = vadd.f32 %v5917_v45, %v917_v46  ;;  %v1128_v8 = vmul.f32 %v7607_v16, %v1080_v25  ;;  %v1159_v44 = vadd.f32 %v1127_v42, %v918_v24  ;;  %v7649_v35 = vld [vmem:[#allocation201_spill] sm:$0xff]  ;;  %v7657_v42 = vld [vmem:[#allocation174_spill] sm:$0xff] }
 0x35f   :  { %v2495_v29 = vmin.f32 %v2463_v15, 6.0  ;;  %v1129_v21 = vmul.f32 %v7607_v16, %v1081_v52  ;;  %2609 = vmatprep.subr.bf16.mxu1 %v2531_v55  ;;  %v1367_v33 = vmul.f32 %v7643_v47, %v7642_v7  ;;  %v1368_v4 = vmul.f32 %v7643_v47, %v7644_v57  ;;  %v7653_v52 = vld [vmem:[#allocation54_spill] sm:$0xff]  ;;  %v7656_v15 = vld [vmem:[#allocation195_spill] sm:$0xff]  ;;  %v7660_v57 = vld [vmem:[#allocation36_spill] sm:$0xff] }
 0x360   :  { %v1369_v23 = vmul.f32 %v7643_v47, %v7645_v12  ;;  %2610 = vmatpush1.bf16.msra.mxu1 %v2530_v2  ;;  %v1160_v45 = vadd.f32 %v1128_v8, %v919_v53  ;;  %v1573_v16 = vsel %vm1563_vm6, %v7646_v60, %v5831_v14  ;;  %v1370_v37 = vmul.f32 %v7643_v47, %v7647_v1  ;;  %v7651_v2 = vld [vmem:[#allocation47_spill] sm:$0xff]  ;;  %v7658_v5 = vld [vmem:[#allocation86_spill] sm:$0xff]  ;;  %v7661_v12 = vld [vmem:[#allocation200_spill] sm:$0xff] }
 0x361   :  { %v6093_v36 = vpop.permute.xlu1 %1555  ;;  %v2528_v51 = vpack.c.bf16 %v2503_v3, %v2495_v29  ;;  %v1161_v0 = vadd.f32 %v1129_v21, %v920_v62  ;;  %v1447_v59 = vmul.f32 %v7649_v35, %v7648_v30  ;;  %v1448_v24 = vmul.f32 %v7649_v35, %v7650_v31  ;;  %v7662_v60 = vld [vmem:[#allocation42_spill] sm:$0xff]  ;;  %v7663_v30 = vld [vmem:[#allocation179_spill] sm:$0xff] }
 0x362   :  { %v1449_v49 = vmul.f32 %v7649_v35, %v7651_v2  ;;  %v6107_v25 = vpop.permute.xlu0 %2276  ;;  %v1450_v13 = vmul.f32 %v7649_v35, %v7653_v52  ;;  %v1814_v46 = vsel %vm1804_vm7, %v7654_v41, %v6029_v20  ;;  %v1359_v53 = vmul.f32 %v7656_v15, %v7655_v19  ;;  %v7666_v52 = vld [vmem:[#allocation209_spill] sm:$0xff]  ;;  %v7667_v19 = vld [vmem:[#allocation39_spill] sm:$0xff] }
 0x363   :  { %2569 = vmatpush1.bf16.msra.mxu0 %v2528_v51  ;;  %v1360_v62 = vmul.f32 %v7656_v15, %v7657_v42  ;;  %2772 = vmatmul.mubr.msk.bf16.vlgmr.msra.gmra.mxu1 %vm2550_vm10, %v6112_v10  ;;  %v1399_v55 = vadd.f32 %v1367_v33, %v1158_v28  ;;  %v1640_v3 = vmul.f32 %v7658_v5, %v1573_v16  ;;  %v7659_v7 = vmov 0  }
 0x364   :  { %v1400_v29 = vadd.f32 %v1368_v4, %v1159_v44  ;;  %v1401_v8 = vadd.f32 %v1369_v23, %v1160_v45  ;;  %2709 = vmatprep.mubr.bf16.mxu1 %v7659_v7  ;;  %v1402_v47 = vadd.f32 %v1370_v37, %v1161_v0  ;;  %v1439_v51 = vmul.f32 %v7661_v12, %v7660_v57  ;;  %v7664_v4 = vld [vmem:[#allocation22_spill] sm:$0xff] }
 0x365   :  { %v6127_v21 = vpop.permute.xlu1 %2025  ;;  %v1440_v1 = vmul.f32 %v7661_v12, %v7662_v60  ;;  %v1361_v35 = vmul.f32 %v7656_v15, %v7663_v30  ;;  %v1153_v28 = vadd.f32 %v5824_v56, %v912_v63  ;;  %v1479_v44 = vadd.f32 %v1447_v59, %v1399_v55  ;;  %v7665_v37 = vld [vmem:[#allocation210_spill] sm:$0xff]  ;;  %v7668_v63 = vld [vmem:[#allocation43_spill] sm:$0xff] }
 0x366   :  { %2771 = vmatmul.mubr.msk.bf16.vlgmr.msra.gmra.mxu0 %vm2550_vm10, %v6112_v10  ;;  %v6139_v33 = vadd.f32 %v1448_v24, %v1400_v29  ;;  %v1881_v23 = vmul.f32 %v7664_v4, %v1814_v46  ;;  %v6142_v45 = vpop.permute.xlu0 %2284  ;;  %v6145_v0 = vadd.f32 %v1449_v49, %v1401_v8  ;;  %v6147_v16 = vadd.f32 %v1450_v13, %v1402_v47  ;;  %v7669_v24 = vld [vmem:[#allocation187_spill] sm:$0xff]  ;;  %v2832_v49 = vld [vmem:[%s6528_s1 + $0x20] sm:$0xff]  ;;  %v2833_v29 = vld [vmem:[%s6528_s1 + $0x28] sm:$0xff] }
 0x367   :  { %2668 = vmatprep.mubr.bf16.mxu0 %v7659_v7  ;;  %v1391_v31 = vadd.f32 %v1359_v53, %v7665_v37  ;;  %v1392_v2 = vadd.f32 %v1360_v62, %v1151_v11  ;;  %v1688_v41 = vmul.f32 %v7666_v52, %v1640_v3  ;;  %v1441_v56 = vmul.f32 %v7661_v12, %v7667_v19  ;;  %v7670_v13 = vld [vmem:[#allocation136_spill] sm:$0xff]  ;;  %v7671_v7 = vld [vmem:[#allocation38_spill] sm:$0xff]  ;;  %v7673_v30 = vld [vmem:[#allocation131_spill] sm:$0xff] }
 0x368   :  { %v1442_v59 = vmul.f32 %v7661_v12, %v7668_v63  ;;  %v1362_v46 = vmul.f32 %v7656_v15, %v7669_v24  ;;  %v6163_v53 = vrot.slane %v2832_v49, %v7670_v13  ;;  %v1393_v55 = vadd.f32 %v1361_v35, %v1152_v17  ;;  %v7672_v57 = vld [vmem:[#allocation206_spill] sm:$0xff]  ;;  %v7675_v63 = vld [vmem:[#allocation143_spill] sm:$0xff]  ;;  %v7677_v49 = vld [vmem:[#allocation144_spill] sm:$0xff] }
 0x369   :  { %v6157_v42 = vpop.permute.xlu1 %2033  ;;  %v6165_v11 = vadd.f32 %v1439_v51, %v1391_v31  ;;  %v6167_v62 = vadd.f32 %v1440_v1, %v1392_v2  ;;  %v1569_v3 = vsel %vm1563_vm6, %v5831_v14, %v5873_v32  ;;  %v1565_v15 = vsel %vm1563_vm6, %v5873_v32, %v5908_v22  ;;  %v2834_v32 = vld [vmem:[%s6528_s1 + $0x30] sm:$0xff]  ;;  %v2835_v51 = vld [vmem:[%s6528_s1 + $0x38] sm:$0xff]  ;;  %v7674_v2 = vld [vmem:[#allocation145_spill] sm:$0xff] }
 0x36a   :  { %v6181_v8 = vrot.slane %v2833_v29, %v7670_v13  ;;  %v1929_v47 = vmul.f32 %v7671_v7, %v1881_v23  ;;  %v6184_v17 = vpop.permute.xlu0 %2023  ;;  %v1593_v14 = vsel %vm1563_vm6, %v5908_v22, %v7672_v57  ;;  %v6194_v12 = vrot.slane %v2834_v32, %v7670_v13  ;;  %v7683_v10 = vld [vmem:[#allocation15_spill] sm:$0xff] }
 0x36b   :  { %v6200_v60 = vrot.slane %v2835_v51, %v7670_v13  ;;  %v2055_v1 = vsel %vm2045_vm8, %v5729_v34, %v6184_v17  ;;  %v1720_v22 = vadd.f32 %v1688_v41, %v1479_v44  ;;  %v2057_v35 = vsel %vm2045_vm8, %v7673_v30, %v5948_v6  ;;  %v7676_v44 = vld [vmem:[#allocation132_spill] sm:$0xff]  ;;  %v6249_v51 = vld [vmem:[%s6528_s1 + $0x68] ss:$0 sm:$0xff] }
 0x36c   :  { %v2053_v23 = vsel %vm2045_vm8, %v5948_v6, %v5983_v58  ;;  %v2122_v37 = vmul.f32 %v6163_v53, %v2055_v1  ;;  %v1641_v19 = vmul.f32 %v7674_v2, %v1569_v3  ;;  %v1642_v24 = vmul.f32 %v7675_v63, %v1565_v15 }
 0x36d   :  { %v6215_v31 = vpop.permute.xlu1 %2041  ;;  %v2049_v34 = vsel %vm2045_vm8, %v5983_v58, %v6005_v38  ;;  %v2077_v41 = vsel %vm2045_vm8, %v6005_v38, %v7676_v44  ;;  %v1643_v6 = vmul.f32 %v7677_v49, %v1593_v14  ;;  %v1961_v13 = vadd.f32 %v1929_v47, %v1720_v22  ;;  %v6238_v58 = vld [vmem:[%s6528_s1 + $0x60] ss:$0 sm:$0xff] }
 0x36e   :  { %v1810_v3 = vsel %vm1804_vm7, %v6029_v20, %v6043_v27  ;;  %v2170_v15 = vmul.f32 %v7608_v61, %v2122_v37  ;;  %v2138_v29 = vmul.f32 %v6163_v53, %v2057_v35  ;;  %v2139_v57 = vmul.f32 %v6181_v8, %v2053_v23  ;;  %v7678_v38 = vld [vmem:[#allocation188_spill] sm:$0xff]  ;;  %v7679_v35 = vld [vmem:[#allocation95_spill] sm:$0xff]  ;;  %v7680_v37 = vld [vmem:[#allocation78_spill] sm:$0xff] }
 0x36f   :  { %v2298_v47 = vsel %vm2286_vm9, %v7678_v38, %v6082_v50  ;;  %v1394_v14 = vadd.f32 %v1362_v46, %v1153_v28  ;;  %v2140_v32 = vmul.f32 %v6194_v12, %v2049_v34  ;;  %v2141_v20 = vmul.f32 %v6200_v60, %v2077_v41 }
 0x370   :  { %v2294_v1 = vsel %vm2286_vm9, %v6082_v50, %v6107_v25  ;;  %v6255_v22 = vadd.f32 %v2170_v15, %v1961_v13  ;;  %v1689_v28 = vmul.f32 %v7666_v52, %v1641_v19  ;;  %v1690_v46 = vmul.f32 %v7666_v52, %v1642_v24  ;;  %v7681_v19 = vld [vmem:[#allocation129_spill] sm:$0xff]  ;;  %v7682_v15 = vld [vmem:[#allocation156_spill] sm:$0xff] }
 0x371   :  { %v6257_v30 = vpop.permute.xlu1 %1780  ;;  %v1882_v23 = vmul.f32 %v7679_v35, %v1810_v3  ;;  %v1572_v34 = vsel %vm1563_vm6, %v7680_v37, %v6056_v43  ;;  %v1691_v44 = vmul.f32 %v7666_v52, %v1643_v6  ;;  %v1806_v50 = vsel %vm1804_vm7, %v6043_v27, %v6065_v54 }
 0x372   :  { %v2379_v41 = vmul.f32 %v6238_v58, %v2298_v47  ;;  %v6272_v13 = vadd.f32 %v1441_v56, %v1393_v55  ;;  %v2186_v24 = vmul.f32 %v7681_v19, %v2138_v29  ;;  %v2187_v3 = vmul.f32 %v7681_v19, %v2139_v57 }
 0x373   :  { %v1834_v38 = vsel %vm1804_vm7, %v6065_v54, %v7682_v15  ;;  %v2380_v52 = vmul.f32 %v6249_v51, %v2294_v1  ;;  %v2188_v6 = vmul.f32 %v7681_v19, %v2140_v32  ;;  %v2189_v37 = vmul.f32 %v7681_v19, %v2141_v20  ;;  %v7684_v15 = vld [vmem:[#allocation163_spill] sm:$0xff]  ;;  %v7687_v20 = vld [vmem:[#allocation177_spill] sm:$0xff] }
 0x374   :  { %v1632_v27 = vmul.f32 %v7658_v5, %v1572_v34  ;;  %v6284_v47 = vadd.f32 %v1442_v59, %v1394_v14  ;;  %v1721_v55 = vadd.f32 %v1689_v28, %v6139_v33  ;;  %v1722_v29 = vadd.f32 %v1690_v46, %v6145_v0  ;;  %v7685_v5 = vld [vmem:[#allocation81_spill] sm:$0xff]  ;;  %v7686_v14 = vld [vmem:[#allocation74_spill] sm:$0xff]  ;;  %v7688_v46 = vld [vmem:[#allocation63_spill] sm:$0xff] }
 0x375   :  { %v6286_v56 = vpop.permute.xlu1 %1788  ;;  %v1930_v57 = vmul.f32 %v7671_v7, %v1882_v23  ;;  %v1883_v54 = vmul.f32 %v7683_v10, %v1806_v50  ;;  %v1884_v1 = vmul.f32 %v7684_v15, %v1834_v38  ;;  %v1568_v32 = vsel %vm1563_vm6, %v6056_v43, %v6076_v9  ;;  %v6306_v50 = vpop.permute.xlu0 %2031  ;;  %v7689_v19 = vld [vmem:[#allocation183_spill] sm:$0xff] }
 0x376   :  { %v2427_v59 = vmul.f32 %v7685_v5, %v2379_v41  ;;  %v2056_v33 = vsel %vm2045_vm8, %v7686_v14, %v6127_v21  ;;  %v1723_v0 = vadd.f32 %v1691_v44, %v6147_v16  ;;  %v2218_v28 = vadd.f32 %v2186_v24, %v7687_v20  ;;  %v7690_v43 = vld [vmem:[#allocation191_spill] sm:$0xff]  ;;  %v7691_v41 = vld [vmem:[#allocation158_spill] sm:$0xff] }
 0x377   :  { %v2219_v23 = vadd.f32 %v2187_v3, %v7688_v46  ;;  %v2428_v34 = vmul.f32 %v7685_v5, %v2380_v52  ;;  %v2220_v38 = vadd.f32 %v2188_v6, %v7689_v19  ;;  %v2221_v26 = vadd.f32 %v2189_v37, %v7690_v43  ;;  %v6314_v14 = vld [vmem:[%s6528_s1 + $0x70] ss:$0 sm:$0xff]  ;;  %v6327_v52 = vld [vmem:[%s6528_s1 + $0x78] ss:$0 sm:$0xff]  ;;  %v7692_v6 = vld [vmem:[#allocation181_spill] sm:$0xff]  ;;  %s2906_s1 = smov [#allocation5]  }
 0x378   :  { %v1680_v18 = vmul.f32 %v7691_v41, %v1632_v27  ;;  %v2290_v16 = vsel %vm2286_vm9, %v6107_v25, %v6142_v45  ;;  %v1633_v24 = vmul.f32 %v7674_v2, %v1568_v32  ;;  %v2130_v3 = vmul.f32 %v6163_v53, %v2056_v33  ;;  %v7693_v46 = vld [vmem:[#allocation203_spill] sm:$0xff]  ;;  %v7696_v43 = vld [vmem:[#allocation146_spill] sm:$0xff]  ;;  %s2740_s9 = sshll.u32 %s2906_s1, 4  ;;  %s2741_s9 = int_to_ptr.vmem [resolvable:$true] %s2740_s9 }
 0x379   :  { %v6320_v44 = vpop.permute.xlu1 %1796  ;;  %v2318_v37 = vsel %vm2286_vm9, %v6142_v45, %v7692_v6  ;;  %v2052_v25 = vsel %vm2045_vm8, %v6127_v21, %v6157_v42  ;;  %v6337_v27 = vadd.f32 %v1930_v57, %v1721_v55  ;;  %v1931_v2 = vmul.f32 %v7671_v7, %v1883_v54  ;;  %v7694_v54 = vld [vmem:[#allocation11_spill] sm:$0xff]  ;;  %s2864_s5 = scalar_lea.vmem %s2741_s9, 1024  ;;  %p2869_p6 = scmp.lt.s32.totalorder %s2741_s9, %s2741_s9 }
 0x37a   :  { %v1932_v32 = vmul.f32 %v7671_v7, %v1884_v1  ;;  %v2459_v33 = vadd.f32 %v2427_v59, %v2218_v28  ;;  %v1564_v20 = vsel %vm1563_vm6, %v6076_v9, %v6093_v36  ;;  %v1592_v45 = vsel %vm1563_vm6, %v6093_v36, %v7693_v46  ;;  %v7695_v28 = vld [vmem:[#allocation99_spill] sm:$0xff]  ;;  %p2865_p5 = scmp.ne.s32.totalorder %s2741_s9, %s2864_s5  ;;  %p2870_p7 = scmp.lt.s32.totalorder %s2864_s5, %s2864_s5 }
 0x37b   :  { %v2460_v19 = vadd.f32 %v2428_v34, %v2219_v23  ;;  %v2381_v21 = vmul.f32 %v6314_v14, %v2290_v16  ;;  %v2382_v55 = vmul.f32 %v6327_v52, %v2318_v37  ;;  %v2131_v57 = vmul.f32 %v6181_v8, %v2052_v25  ;;  %v6365_v34 = vpop.permute.xlu0 %2039 }
 0x37c   :  { %v2048_v7 = vsel %vm2045_vm8, %v6157_v42, %v6215_v31  ;;  %v2076_v9 = vsel %vm2045_vm8, %v6215_v31, %v7694_v54  ;;  %v6361_v36 = vadd.f32 %v1680_v18, %v6165_v11  ;;  %v1681_v59 = vmul.f32 %v7691_v41, %v1633_v24  ;;  %p2871_p8 = por %p2870_p7, %p2869_p6 }
 0x37d   :  { %v2267_v1 = vpop.permute.xlu1 %2266  ;;  %v2178_v23 = vmul.f32 %v7695_v28, %v2130_v3  ;;  %v6370_v42 = vadd.f32 %v1931_v2, %v1722_v29  ;;  %v2491_v6 = vmax.f32 %v2459_v33, 0.0  ;;  %v1634_v37 = vmul.f32 %v7675_v63, %v1564_v20 }
 0x37e   :  { %v2297_v16 = vsel %vm2286_vm9, %v7696_v43, %v2267_v1  ;;  %v1635_v31 = vmul.f32 %v7677_v49, %v1592_v45  ;;  %v2429_v18 = vmul.f32 %v7685_v5, %v2381_v21  ;;  %v2132_v11 = vmul.f32 %v6194_v12, %v2048_v7  ;;  %v7697_v49 = vld [vmem:[#allocation17_spill] sm:$0xff]  ;;  %v7698_v45 = vld [vmem:[#allocation142_spill] sm:$0xff]  ;;  %p2872_p9 = pnand %p2871_p8, %p2865_p5 }
 0x37f   :  { %v2133_v24 = vmul.f32 %v6200_v60, %v2076_v9  ;;  %v2371_v3 = vmul.f32 %v6238_v58, %v2297_v16  ;;  %v6378_v25 = vadd.f32 %v1932_v32, %v1723_v0  ;;  %v2430_v46 = vmul.f32 %v7685_v5, %v2382_v55 }
 0x380   :  { %v2179_v29 = vmul.f32 %v7695_v28, %v2131_v57  ;;  %v2492_v33 = vmax.f32 %v2460_v19, 0.0  ;;  %v6383_v63 = vadd.f32 %v1681_v59, %v6167_v62  ;;  %v2210_v20 = vadd.f32 %v2178_v23, %v7697_v49  ;;  %v2265_v57 = vpop.permute.xlu0 %2264  ;;  %v7699_v23 = vld [vmem:[#allocation16_spill] sm:$0xff] }
 0x381   :  { %v2275_v2 = vpop.permute.xlu1 %2274  ;;  %v2419_v21 = vmul.f32 %v7698_v45, %v2371_v3  ;;  %v6389_v54 = vmin.f32 %v2491_v6, 6.0  ;;  %v1682_v0 = vmul.f32 %v7691_v41, %v1634_v37  ;;  %v1683_v5 = vmul.f32 %v7691_v41, %v1635_v31  ;;  %v7700_v31 = vld [vmem:[#allocation159_spill] sm:$0xff] }
 0x382   :  { %v2293_v7 = vsel %vm2286_vm9, %v2267_v1, %v2275_v2  ;;  %v2461_v55 = vadd.f32 %v2429_v18, %v2220_v38  ;;  %v2180_v19 = vmul.f32 %v7695_v28, %v2132_v11  ;;  %v2181_v62 = vmul.f32 %v7695_v28, %v2133_v24 }
 0x383   :  { %v2372_v32 = vmul.f32 %v6249_v51, %v2293_v7  ;;  %v2451_v9 = vadd.f32 %v2419_v21, %v2210_v20  ;;  %v2462_v59 = vadd.f32 %v2430_v46, %v2221_v26  ;;  %v2211_v43 = vadd.f32 %v2179_v29, %v7699_v23  ;;  %v7701_v26 = vld [vmem:[#allocation155_spill] sm:$0xff]  ;;  %v7704_v20 = vld [vmem:[#allocation202_spill] sm:$0xff] }
 0x384   :  { %v2524_v6 = vmin.f32 %v2492_v33, 6.0  ;;  %v2051_v41 = vsel %vm2045_vm8, %v6184_v17, %v6306_v50  ;;  %v1813_v18 = vsel %vm1804_vm7, %v7701_v26, %v6257_v30  ;;  %v2493_v46 = vmax.f32 %v2461_v55, 0.0  ;;  %v7702_v17 = vld [vmem:[#allocation59_spill] sm:$0xff]  ;;  %v2273_v55 = vpop.permute.xlu0 %2272 }
 0x385   :  { %v2420_v1 = vmul.f32 %v7698_v45, %v2372_v32  ;;  %v2283_v16 = vpop.permute.xlu1 %2282  ;;  %v2483_v37 = vmax.f32 %v2451_v9, 0.0  ;;  %v2212_v29 = vadd.f32 %v2180_v19, %v7702_v17  ;;  %v7703_v33 = vld [vmem:[#allocation23_spill] sm:$0xff]  ;;  %v2296_v21 = vsel %vm2286_vm9, %v7704_v20, %v2265_v57 }
 0x386   :  { %v2289_v38 = vsel %vm2286_vm9, %v2275_v2, %v2283_v16  ;;  %v2317_v28 = vsel %vm2286_vm9, %v2283_v16, %v7700_v31  ;;  %v2213_v49 = vadd.f32 %v2181_v62, %v7703_v33  ;;  %v2494_v16 = vmax.f32 %v2462_v59, 0.0 }
 0x387   :  { %v2452_v11 = vadd.f32 %v2420_v1, %v2211_v43  ;;  %v2373_v24 = vmul.f32 %v6314_v14, %v2289_v38  ;;  %v2374_v3 = vmul.f32 %v6327_v52, %v2317_v28  ;;  %v2515_v2 = vmin.f32 %v2483_v37, 6.0 }
 0x388   :  { %v2123_v43 = vmul.f32 %v6181_v8, %v2051_v41  ;;  %v1873_v1 = vmul.f32 %v7664_v4, %v1813_v18  ;;  %v2047_v62 = vsel %vm2045_vm8, %v6306_v50, %v6365_v34  ;;  %v6431_v28 = vadd.f32 %v1683_v5, %v6284_v47  ;;  %v2281_v20 = vpop.permute.xlu0 %2280 }
 0x389   :  { %v2421_v7 = vmul.f32 %v7698_v45, %v2373_v24  ;;  %v2422_v32 = vmul.f32 %v7698_v45, %v2374_v3  ;;  %v2022_v9 = vpop.permute.xlu1 %2021  ;;  %v2484_v23 = vmax.f32 %v2452_v11, 0.0  ;;  %v2540_v19 = vpack.c.bf16 %v6389_v54, %v2515_v2  ;;  %v7705_v3 = vld [vmem:[#allocation162_spill] sm:$0xff] }
 0x38a   :  { %v6428_v45 = vadd.f32 %v1682_v0, %v6272_v13  ;;  %v2525_v41 = vmin.f32 %v2493_v46, 6.0  ;;  %v2363_v4 = vmul.f32 %v6238_v58, %v2296_v21  ;;  %v2292_v54 = vsel %vm2286_vm9, %v2265_v57, %v2273_v55  ;;  %v7706_v0 = vld [vmem:[#allocation33_spill] sm:$0xff]  ;;  %v7707_v46 = vld [vmem:[#allocation172_spill] sm:$0xff] }
 0x38b   :  { %v2453_v37 = vadd.f32 %v2421_v7, %v2212_v29  ;;  %v2454_v38 = vadd.f32 %v2422_v32, %v2213_v49  ;;  %v2516_v31 = vmin.f32 %v2484_v23, 6.0  ;;  %v2171_v50 = vmul.f32 %v7608_v61, %v2123_v43 }
 0x38c   :  { %v2124_v24 = vmul.f32 %v6194_v12, %v2047_v62  ;;  %v2054_v13 = vsel %vm2045_vm8, %v7705_v3, %v2022_v9  ;;  %v2526_v47 = vmin.f32 %v2494_v16, 6.0  ;;  %v1921_v5 = vmul.f32 %v7706_v0, %v1873_v1 }
 0x38d   :  { %v2485_v59 = vmax.f32 %v2453_v37, 0.0  ;;  %v2030_v26 = vpop.permute.xlu1 %2029  ;;  %v2541_v18 = vpack.c.bf16 %v2524_v6, %v2516_v31  ;;  %v2486_v11 = vmax.f32 %v2454_v38, 0.0  ;;  %v2075_v57 = vsel %vm2045_vm8, %v6365_v34, %v7707_v46  ;;  %v7708_v34 = vld [vmem:[#allocation90_spill] sm:$0xff] }
 0x38e   :  { %v1809_v29 = vsel %vm1804_vm7, %v6257_v30, %v6286_v56  ;;  %v2411_v33 = vmul.f32 %v7612_v40, %v2363_v4  ;;  %v1805_v49 = vsel %vm1804_vm7, %v6286_v56, %v6320_v44  ;;  %v2364_v2 = vmul.f32 %v6249_v51, %v2292_v54 }
 0x38f   :  { %v2517_v17 = vmin.f32 %v2485_v59, 6.0  ;;  %2648 = vmatprep.subr.bf16.mxu0 %v2541_v18  ;;  %v2518_v6 = vmin.f32 %v2486_v11, 6.0  ;;  %v1833_v21 = vsel %vm1804_vm7, %v6320_v44, %v7708_v34  ;;  %v2114_v7 = vmul.f32 %v6163_v53, %v2054_v13  ;;  %v7709_v53 = vld [vmem:[#allocation125_spill] sm:$0xff]  ;;  %v7711_v59 = vld [vmem:[#allocation31_spill] sm:$0xff] }
 0x390   :  { %2649 = vmatpush1.bf16.msra.mxu0 %v2540_v19  ;;  %v2203_v43 = vadd.f32 %v2171_v50, %v6337_v27  ;;  %v2125_v1 = vmul.f32 %v6200_v60, %v2075_v57  ;;  %v2172_v56 = vmul.f32 %v7608_v61, %v2124_v24  ;;  %v2050_v16 = vsel %vm2045_vm8, %v2022_v9, %v2030_v26  ;;  %v7712_v57 = vld [vmem:[#allocation160_spill] sm:$0xff] }
 0x391   :  { %v2038_v32 = vpop.permute.xlu1 %2037  ;;  %v2543_v30 = vpack.c.bf16 %v2526_v47, %v2518_v6  ;;  %v2542_v23 = vpack.c.bf16 %v2525_v41, %v2517_v17  ;;  %v1874_v19 = vmul.f32 %v7679_v35, %v1809_v29  ;;  %v1875_v62 = vmul.f32 %v7683_v10, %v1805_v49  ;;  %v7710_v41 = vld [vmem:[#allocation18_spill] sm:$0xff] }
 0x392   :  { %v2288_v44 = vsel %vm2286_vm9, %v2273_v55, %v2281_v20  ;;  %v2316_v37 = vsel %vm2286_vm9, %v2281_v20, %v7709_v53  ;;  %v1953_v27 = vadd.f32 %v1921_v5, %v6361_v36  ;;  %v2443_v38 = vadd.f32 %v2411_v33, %v6255_v22 }
 0x393   :  { %2689 = vmatprep.subr.bf16.mxu1 %v2543_v30  ;;  %v1876_v31 = vmul.f32 %v7684_v15, %v1833_v21  ;;  %v2412_v9 = vmul.f32 %v7612_v40, %v2364_v2  ;;  %v2162_v35 = vmul.f32 %v7613_v48, %v2114_v7  ;;  %v2115_v10 = vmul.f32 %v6181_v8, %v2050_v16 }
 0x394   :  { %2690 = vmatpush1.bf16.msra.mxu1 %v2542_v23  ;;  %v2046_v55 = vsel %vm2045_vm8, %v2030_v26, %v2038_v32  ;;  %v2074_v4 = vsel %vm2045_vm8, %v2038_v32, %v7710_v41  ;;  %v2173_v36 = vmul.f32 %v7608_v61, %v2125_v1  ;;  %v2365_v22 = vmul.f32 %v6314_v14, %v2288_v44 }
 0x395   :  { %v2263_v54 = vpop.permute.xlu1 %2262  ;;  %v2366_v15 = vmul.f32 %v6327_v52, %v2316_v37  ;;  %v2204_v8 = vadd.f32 %v2172_v56, %v6370_v42  ;;  %v1922_v11 = vmul.f32 %v7706_v0, %v1874_v19  ;;  %v1923_v26 = vmul.f32 %v7706_v0, %v1875_v62 }
 0x396   :  { %v2295_v18 = vsel %vm2286_vm9, %v7711_v59, %v2263_v54  ;;  %v2475_v24 = vmax.f32 %v2443_v38, 0.0  ;;  %v1924_v3 = vmul.f32 %v7706_v0, %v1876_v31  ;;  %v2116_v61 = vmul.f32 %v6194_v12, %v2046_v55 }
 0x397   :  { %v2355_v50 = vmul.f32 %v6238_v58, %v2295_v18  ;;  %v2117_v13 = vmul.f32 %v6200_v60, %v2074_v4  ;;  %v2444_v47 = vadd.f32 %v2412_v9, %v2203_v43  ;;  %v2194_v5 = vadd.f32 %v2162_v35, %v1953_v27  ;;  %v7713_v43 = vld [vmem:[#allocation32_spill] sm:$0xff] }
 0x398   :  { %v2163_v46 = vmul.f32 %v7613_v48, %v2115_v10  ;;  %v2205_v6 = vadd.f32 %v2173_v36, %v6378_v25  ;;  %v2413_v29 = vmul.f32 %v7612_v40, %v2365_v22  ;;  %v2414_v58 = vmul.f32 %v7612_v40, %v2366_v15  ;;  %v7714_v15 = vld [vmem:[#allocation21_spill] sm:$0xff] }
 0x399   :  { %v2403_v17 = vmul.f32 %v7712_v57, %v2355_v50  ;;  %v2271_v42 = vpop.permute.xlu1 %2270  ;;  %v1954_v12 = vadd.f32 %v1922_v11, %v6383_v63  ;;  %v1955_v60 = vadd.f32 %v1923_v26, %v6428_v45  ;;  %v2507_v2 = vmin.f32 %v2475_v24, 6.0 }
 0x39a   :  { %v2291_v0 = vsel %vm2286_vm9, %v2263_v54, %v2271_v42  ;;  %v1956_v20 = vadd.f32 %v1924_v3, %v6431_v28  ;;  %v2164_v34 = vmul.f32 %v7613_v48, %v2116_v61  ;;  %v2165_v25 = vmul.f32 %v7613_v48, %v2117_v13  ;;  %v2836_v3 = vld [vmem:[#allocation2 + $0x10] sm:$0xff] }
 0x39b   :  { %v2435_v33 = vadd.f32 %v2403_v17, %v2194_v5  ;;  %v2356_v49 = vmul.f32 %v6249_v51, %v2291_v0  ;;  %v2195_v21 = vadd.f32 %v2163_v46, %v1954_v12  ;;  %v2476_v30 = vmax.f32 %v2444_v47, 0.0  ;;  %v2837_v46 = vld [vmem:[#allocation2] sm:$0xff]  ;;  %v2838_v17 = vld [vmem:[#allocation2 + $0x18] sm:$0xff] }
 0x39c   :  { %v2445_v23 = vadd.f32 %v2413_v29, %v2204_v8  ;;  %v2446_v63 = vadd.f32 %v2414_v58, %v2205_v6  ;;  %v2196_v16 = vadd.f32 %v2164_v34, %v1955_v60  ;;  %v2197_v19 = vadd.f32 %v2165_v25, %v1956_v20  ;;  %v2839_v58 = vld [vmem:[#allocation2 + $0x8] sm:$0xff] }
 0x39d   :  { %v2467_v7 = vmax.f32 %v2435_v33, 0.0  ;;  %v2404_v40 = vmul.f32 %v7712_v57, %v2356_v49  ;;  %v2279_v32 = vpop.permute.xlu1 %2278  ;;  %v2508_v38 = vmin.f32 %v2476_v30, 6.0 }
 0x39e   :  { %v2287_v45 = vsel %vm2286_vm9, %v2271_v42, %v2279_v32  ;;  %v2315_v51 = vsel %vm2286_vm9, %v2279_v32, %v7713_v43  ;;  %v2477_v27 = vmax.f32 %v2445_v23, 0.0  ;;  %v2478_v35 = vmax.f32 %v2446_v63, 0.0  ;;  %v2842_v63 = vld [vmem:[#allocation2 + $0x30] sm:$0xff] }
 0x39f   :  { %v2499_v28 = vmin.f32 %v2467_v7, 6.0  ;;  %v2436_v1 = vadd.f32 %v2404_v40, %v2195_v21  ;;  %v2357_v56 = vmul.f32 %v6314_v14, %v2287_v45  ;;  %v2358_v48 = vmul.f32 %v6327_v52, %v2315_v51  ;;  %v2841_v7 = vld [vmem:[#allocation2 + $0x28] sm:$0xff] }
 0x3a0   :  { %v2509_v14 = vmin.f32 %v2477_v27, 6.0  ;;  %v2510_v54 = vmin.f32 %v2478_v35, 6.0 }
 0x3a1   :  { %v2405_v62 = vmul.f32 %v7712_v57, %v2357_v56  ;;  %v2406_v44 = vmul.f32 %v7712_v57, %v2358_v48  ;;  %v2468_v53 = vmax.f32 %v2436_v1, 0.0  ;;  %v2532_v37 = vpack.c.bf16 %v2507_v2, %v2499_v28  ;;  %v2840_v2 = vld [vmem:[#allocation2 + $0x20] sm:$0xff]  ;;  %v2843_v28 = vld [vmem:[#allocation2 + $0x38] sm:$0xff] }
 0x3a3   :  { %v2437_v31 = vadd.f32 %v2405_v62, %v2196_v16  ;;  %v2438_v9 = vadd.f32 %v2406_v44, %v2197_v19  ;;  %v2500_v39 = vmin.f32 %v2468_v53, 6.0 }
 0x3a5   :  { %v2469_v10 = vmax.f32 %v2437_v31, 0.0  ;;  %v2533_v55 = vpack.c.bf16 %v2508_v38, %v2500_v39  ;;  %v2470_v41 = vmax.f32 %v2438_v9, 0.0  ;;  %v2548_v59 = vpop.permute.xlu1 %2547 }
 0x3a7   :  { %v2501_v4 = vmin.f32 %v2469_v10, 6.0  ;;  %2650 = vmatprep.subr.bf16.mxu0 %v2533_v55  ;;  %v2502_v52 = vmin.f32 %v2470_v41, 6.0 }
 0x3a8   :  { %2651 = vmatpush1.bf16.msra.mxu0 %v2532_v37 }
 0x3a9   :  { %v2535_v36 = vpack.c.bf16 %v2510_v54, %v2502_v52  ;;  %v2534_v22 = vpack.c.bf16 %v2509_v14, %v2501_v4 }
 0x3ab   :  { %2773 = vmatmul.mubr.msk.bf16.vlgmr.msra.gmra.mxu0 %vm2550_vm10, %v7714_v15  ;;  %2691 = vmatprep.subr.bf16.mxu1 %v2535_v36 }
 0x3ac   :  { %2692 = vmatpush1.bf16.msra.mxu1 %v2534_v22 }
 0x3af   :  { %2774 = vmatmul.mubr.msk.bf16.vlgmr.msra.gmra.mxu1 %vm2550_vm10, %v7714_v15 }
 0x423   :  { %v2629_v18 = vpop.f32.mrf.mxu1 }
 0x424   :  { %v2630_v8 = vadd.f32 %v2629_v18, %v2548_v59 }
 0x425   :  { %v2631_v26 = vpop.f32.mrf.mxu1 }
 0x426   :  { %v2588_v11 = vpop.f32.mrf.mxu0  ;;  %v2632_v24 = vadd.f32 %v2631_v26, %v2548_v59  ;;  %v2720_v61 = vadd.f32 %v2836_v3, %v2630_v8 }
 0x427   :  { %v2589_v50 = vadd.f32 %v2588_v11, %v2548_v59  ;;  %v2633_v47 = vpop.f32.mrf.mxu1 }
 0x428   :  { %v2590_v13 = vpop.f32.mrf.mxu0  ;;  %v2721_v42 = vadd.f32 %v2838_v17, %v2632_v24  ;;  %2728 = vst [vmem:[#allocation5 + $0x10] sm:$0xff] %v2720_v61 }
 0x429   :  { %v2591_v5 = vadd.f32 %v2590_v13, %v2548_v59  ;;  %v2718_v57 = vadd.f32 %v2837_v46, %v2589_v50  ;;  %v2634_v29 = vpop.f32.mrf.mxu1 }
 0x42a   :  { %v2592_v6 = vpop.f32.mrf.mxu0  ;;  %2729 = vst [vmem:[#allocation5 + $0x18] sm:$0xff] %v2721_v42 }
 0x42b   :  { %v2719_v0 = vadd.f32 %v2839_v58, %v2591_v5  ;;  %2726 = vst [vmem:[#allocation5] sm:$0xff] %v2718_v57 }
 0x42c   :  { %v2593_v12 = vpop.f32.mrf.mxu0 }
 0x42d   :  { %2727 = vst [vmem:[#allocation5 + $0x8] sm:$0xff] %v2719_v0 }
 0x46b   :  { %v2670_v60 = vpop.f32.mrf.mxu0 }
 0x46c   :  { %v2671_v33 = vadd.f32 %v2670_v60, %v2548_v59 }
 0x46d   :  { %v2672_v49 = vpop.f32.mrf.mxu0 }
 0x46e   :  { %v2722_v20 = vadd.f32 %v2840_v2, %v2671_v33  ;;  %v2673_v34 = vadd.f32 %v2672_v49, %v2548_v59 }
 0x46f   :  { %v2674_v25 = vpop.f32.mrf.mxu0  ;;  %v2711_v21 = vpop.f32.mrf.mxu1 }
 0x470   :  { %2730 = vst [vmem:[#allocation5 + $0x20] sm:$0xff] %v2722_v20  ;;  %v2723_v40 = vadd.f32 %v2841_v7, %v2673_v34  ;;  %v2712_v32 = vadd.f32 %v2711_v21, %v2548_v59 }
 0x471   :  { %v2675_v30 = vpop.f32.mrf.mxu0  ;;  %v2713_v23 = vpop.f32.mrf.mxu1 }
 0x472   :  { %2731 = vst [vmem:[#allocation5 + $0x28] sm:$0xff] %v2723_v40  ;;  %v2724_v45 = vadd.f32 %v2842_v63, %v2712_v32  ;;  %v2714_v43 = vadd.f32 %v2713_v23, %v2548_v59 }
 0x473   :  { %v2715_v51 = vpop.f32.mrf.mxu1 }
 0x474   :  { %2732 = vst [vmem:[#allocation5 + $0x30] sm:$0xff] %v2724_v45  ;;  %v2725_v1 = vadd.f32 %v2843_v28, %v2714_v43 }
 0x475   :  { %v2716_v56 = vpop.f32.mrf.mxu1 }
 0x476   :  { %2733 = vst [vmem:[#allocation5 + $0x38] sm:$0xff] %v2725_v1 }
 0x477   :  { %2875 = shalt.err (!%p2872_p9)
}
 0x478   :  { %2743 = dma.vmem_to_hbm [thread:$0]  %s2741_s9, 1024, %s6535_s8, [#allocation4]  }
 0x479   :  { %2886 = dma.done.wait [#allocation4], 1024  }
 0x47a   :  { %2887 = vsyncadd [#allocation4], 4294966272 }
 0x47b   :  { %2747 = vsyncpa [#allocation3], 1 }
 0x47c   :  { %2748 = vsyncpa [#allocation4], 1 }

</bundles_post_ra>
